<compile_context>
chip_gen: v6e
topology: v6e:2x2x1
jax: 0.10.0
libtpu: 0.0.40
codegen_flags: <defaults>
</compile_context>

<pallas_src>
import numpy as np
import jax
import jax.numpy as jnp
from jax.experimental import pallas as pl
from jax.experimental.pallas import tpu as pltpu

# ---------------- small ViT configuration ----------------
BATCH        = 2
IN_CHANNELS  = 4
PIC_SIZE     = 16
PATCH_SIZE   = 4
EMBED_DIM    = 32
NUM_HEADS    = 4
HEAD_DIM     = EMBED_DIM // NUM_HEADS
MLP_HIDDEN   = int(EMBED_DIM * 4.0)
NUM_LAYERS   = 2
NUM_CLASSES  = 10
NUM_PATCHES  = (PIC_SIZE // PATCH_SIZE) ** 2            # 16
NUM_TOKENS   = NUM_PATCHES + 1                          # 17 (+ class token)
PATCH_FLAT   = IN_CHANNELS * PATCH_SIZE * PATCH_SIZE    # 64
SCALE        = HEAD_DIM ** (-0.5)                       # qk_scale=None default
LN_EPS_BLOCK = 1e-5                                     # nn.LayerNorm default
LN_EPS_FINAL = 1e-6                                     # partial(nn.LayerNorm, eps=1e-6)
M_TOK        = BATCH * NUM_TOKENS                       # 34  (batch folded into rows)
HM_TOK       = NUM_HEADS * M_TOK                        # 136 (heads x batch*tokens)
NEG_INF      = -1e30


# ---------------- in-kernel helpers ----------------
def _layernorm(x, w, b, eps):
    mu = jnp.mean(x, axis=-1, keepdims=True)
    var = jnp.mean(jnp.square(x - mu), axis=-1, keepdims=True)
    return (x - mu) * jax.lax.rsqrt(var + eps) * w + b


# ---------------- the single fused kernel ----------------
def _vit_kernel(xp_ref, base_ref, convw_ref,
                rep_ref, rept_ref, hmask_ref, bias_ref, sel_ref,
                lnw_ref, lnb_ref, wq_ref, wk_ref, wv_ref, pw_ref, pb_ref,
                f1w_ref, f1b_ref, f2w_ref, f2b_ref,
                flnw_ref, flnb_ref, hw_ref, hb_ref, o_ref):
    f32, bf16 = jnp.float32, jnp.bfloat16
    rep   = rep_ref[...]      # (H*M, M)  0/1 head-replication matrix
    rept  = rept_ref[...]     # (M, H*M)  head-merge matrix (rep^T)
    hmask = hmask_ref[...]    # (H*M, D)  keeps only head-h columns in row block h
    bias  = bias_ref[...]     # (H*M, M)  0 same-batch / -1e30 cross-batch

    # ---- patch embedding + class token + positional embedding ----------------
    # `base` already holds class_token+pos[0] on the cls rows and pos[1:]+conv_b on
    # the patch rows; `xp` has zero rows at the cls positions, so one matmul + add
    # assembles the full (B*17, D) token slab with no in-kernel concatenation.
    h = base_ref[...] + jnp.dot(xp_ref[...].astype(bf16), convw_ref[...],
                                preferred_element_type=f32)           # (M, D)

    for l in range(NUM_LAYERS):
        lnw, lnb = lnw_ref[l], lnb_ref[l]

        # ---- multi-head self-attention (pre-LN). The PyTorch block reuses the
        #      SAME LayerNorm parameters for both branches. ----
        xn = _layernorm(h, lnw, lnb, LN_EPS_BLOCK).astype(bf16)
        q = jnp.dot(xn, wq_ref[l], preferred_element_type=f32)        # scale folded in wq
        k = jnp.dot(xn, wk_ref[l], preferred_element_type=f32)
        v = jnp.dot(xn, wv_ref[l], preferred_element_type=f32)

        # Head-batched attention without per-head lane slicing: replicate Q rows
        # once per head (matmul with rep), zero all but that head's columns.
        q_m = jnp.dot(rep, q, preferred_element_type=f32) * hmask     # (H*M, D)
        s = jax.lax.dot_general(q_m.astype(bf16), k.astype(bf16),
                                (((1,), (1,)), ((), ())),
                                preferred_element_type=f32)           # (H*M, M)
        s = s + bias                                                  # kill cross-batch
        s = s - jnp.max(s, axis=-1, keepdims=True)
        p = jnp.exp(s)
        p = p * pl.reciprocal(jnp.sum(p, axis=-1, keepdims=True), approx=True)
        pv = jnp.dot(p.astype(bf16), v.astype(bf16),
                     preferred_element_type=f32) * hmask              # (H*M, D)
        heads = jnp.dot(rept, pv, preferred_element_type=f32)         # (M, D) concat heads
        attn = jnp.dot(heads.astype(bf16), pw_ref[l],
                       preferred_element_type=f32) + pb_ref[l]
        h = h + attn                                                  # residual 1 (dropout = id)

        # ---- MLP branch (same LayerNorm params, per the reference module) ----
        xn2 = _layernorm(h, lnw, lnb, LN_EPS_BLOCK).astype(bf16)
        h1 = jnp.dot(xn2, f1w_ref[l], preferred_element_type=f32) + f1b_ref[l]
        # TODO(synk): torch nn.GELU() is the exact erf form; tanh approximation used
        # here for robust Mosaic lowering (max abs deviation ~3e-4).
        h1 = jax.nn.gelu(h1, approximate=True)
        h2 = jnp.dot(h1.astype(bf16), f2w_ref[l],
                     preferred_element_type=f32) + f2b_ref[l]
        h = h + h2                                                    # residual 2

    # ---- final LayerNorm (eps=1e-6), class-token rows, classification head ----
    hn = _layernorm(h, flnw_ref[...], flnb_ref[...], LN_EPS_FINAL)
    cls = jnp.dot(sel_ref[...], hn, preferred_element_type=f32)       # (B, D) pick cls rows
    o_ref[...] = (jnp.dot(cls.astype(bf16), hw_ref[...],
                          preferred_element_type=f32) + hb_ref[...])


# ---------------- pallas_call wrapper ----------------
def _full_spec(shape):
    nd = len(shape)
    return pl.BlockSpec(shape, lambda i, nd=nd: (0,) * nd)


def vit_fused_call(xp, base, params):
    c = params["consts"]
    args = (
        xp, base, params["conv_w"],
        c["rep"], c["rep_t"], c["head_mask"], c["attn_bias"], c["cls_sel"],
        params["ln_w"], params["ln_b"],
        params["wq"], params["wk"], params["wv"],
        params["proj_w"], params["proj_b"],
        params["fc1_w"], params["fc1_b"], params["fc2_w"], params["fc2_b"],
        params["final_ln_w"], params["final_ln_b"],
        params["head_w"], params["head_b"],
    )
    return pl.pallas_call(
        _vit_kernel,
        out_shape=jax.ShapeDtypeStruct((BATCH, NUM_CLASSES), jnp.float32),
        grid=(1,),
        in_specs=[_full_spec(a.shape) for a in args],
        out_specs=pl.BlockSpec((BATCH, NUM_CLASSES), lambda i: (0, 0)),
        compiler_params=pltpu.CompilerParams(dimension_semantics=("arbitrary",)),
    )(*args)


# ---------------- glue (JAX, outside the kernel: reshapes / parameter prep only) ----------------
def _extract_patches(x):
    # NCHW -> (B, num_patches, C*p*p); per-patch flat order is (C, kh, kw), matching
    # torch Conv2d weight layout, so the stride=p conv becomes a plain matmul.
    B, C, H, W = x.shape
    ps = PATCH_SIZE
    x = x.reshape(B, C, H // ps, ps, W // ps, ps)
    x = x.transpose(0, 2, 4, 1, 3, 5)
    return x.reshape(B, (H // ps) * (W // ps), C * ps * ps)


@jax.jit
def vit_forward(x, params):
    B = x.shape[0]
    patches = _extract_patches(x)                                      # (B, 16, 64)
    # zero rows at the class-token positions -> the patch matmul leaves them untouched
    xp = jnp.pad(patches, ((0, 0), (1, 0), (0, 0))).reshape(B * NUM_TOKENS, PATCH_FLAT)
    cls_row = params["class_token"].reshape(1, EMBED_DIM) + params["pos_embedding"][0, :1, :]
    patch_rows = params["pos_embedding"][0, 1:, :] + params["conv_b"]   # conv bias folded here
    base = jnp.tile(jnp.concatenate([cls_row, patch_rows], axis=0), (B, 1))  # (B*17, D)
    return vit_fused_call(xp, base, params)


# ---------------- deterministic parameter init ----------------
def _trunc_normal(key, shape, std, dtype=jnp.float32):
    return (std * jax.random.truncated_normal(key, -2.0, 2.0, shape)).astype(dtype)


def _build_consts():
    rep = np.tile(np.eye(M_TOK, dtype=np.float32), (NUM_HEADS, 1))            # (H*M, M)
    row_head = np.arange(HM_TOK) // M_TOK
    col_head = np.arange(EMBED_DIM) // HEAD_DIM
    head_mask = (row_head[:, None] == col_head[None, :]).astype(np.float32)   # (H*M, D)
    row_batch = (np.arange(HM_TOK) % M_TOK) // NUM_TOKENS
    col_batch = np.arange(M_TOK) // NUM_TOKENS
    attn_bias = np.where(row_batch[:, None] == col_batch[None, :],
                         0.0, NEG_INF).astype(np.float32)                     # (H*M, M)
    cls_sel = np.zeros((BATCH, M_TOK), np.float32)
    cls_sel[np.arange(BATCH), np.arange(BATCH) * NUM_TOKENS] = 1.0            # (B, M)
    return {"rep": jnp.asarray(rep), "rep_t": jnp.asarray(rep.T.copy()),
            "head_mask": jnp.asarray(head_mask),
            "attn_bias": jnp.asarray(attn_bias),
            "cls_sel": jnp.asarray(cls_sel)}


def init_params(key):
    ks = iter(jax.random.split(key, 4 + 6 * NUM_LAYERS))
    p = {}
    # Conv2d patch embedding (kaiming_normal, mode='fan_out') flattened to a matmul weight.
    fan_out = EMBED_DIM * PATCH_SIZE * PATCH_SIZE
    conv_w = (jax.random.normal(next(ks), (EMBED_DIM, IN_CHANNELS, PATCH_SIZE, PATCH_SIZE))
              * np.sqrt(2.0 / fan_out))
    p["conv_w"] = conv_w.reshape(EMBED_DIM, PATCH_FLAT).T.astype(jnp.bfloat16)  # (K, D)
    p["conv_b"] = jnp.zeros((1, EMBED_DIM), jnp.float32)
    p["class_token"]   = _trunc_normal(next(ks), (1, 1, EMBED_DIM), 0.02)
    p["pos_embedding"] = _trunc_normal(next(ks), (1, NUM_TOKENS, EMBED_DIM), 0.02)

    lnw, lnb, wq, wk, wv, pw, pb, f1w, f1b, f2w, f2b = ([] for _ in range(11))
    for _ in range(NUM_LAYERS):
        lnw.append(jnp.ones((1, EMBED_DIM), jnp.float32))
        lnb.append(jnp.zeros((1, EMBED_DIM), jnp.float32))
        # qkv Linear (qkv_bias=False) split into q/k/v; attention scale folded into wq.
        wq.append((_trunc_normal(next(ks), (EMBED_DIM, EMBED_DIM), 0.01) * SCALE
                   ).astype(jnp.bfloat16))
        wk.append(_trunc_normal(next(ks), (EMBED_DIM, EMBED_DIM), 0.01, jnp.bfloat16))
        wv.append(_trunc_normal(next(ks), (EMBED_DIM, EMBED_DIM), 0.01, jnp.bfloat16))
        pw.append(_trunc_normal(next(ks), (EMBED_DIM, EMBED_DIM), 0.01, jnp.bfloat16))
        pb.append(jnp.zeros((1, EMBED_DIM), jnp.float32))
        f1w.append(_trunc_normal(next(ks), (EMBED_DIM, MLP_HIDDEN), 0.01, jnp.bfloat16))
        f1b.append(jnp.zeros((1, MLP_HIDDEN), jnp.float32))
        f2w.append(_trunc_normal(next(ks), (MLP_HIDDEN, EMBED_DIM), 0.01, jnp.bfloat16))
        f2b.append(jnp.zeros((1, EMBED_DIM), jnp.float32))
    p["ln_w"], p["ln_b"] = jnp.stack(lnw), jnp.stack(lnb)
    p["wq"], p["wk"], p["wv"] = jnp.stack(wq), jnp.stack(wk), jnp.stack(wv)
    p["proj_w"], p["proj_b"] = jnp.stack(pw), jnp.stack(pb)
    p["fc1_w"], p["fc1_b"] = jnp.stack(f1w), jnp.stack(f1b)
    p["fc2_w"], p["fc2_b"] = jnp.stack(f2w), jnp.stack(f2b)

    p["final_ln_w"] = jnp.ones((1, EMBED_DIM), jnp.float32)
    p["final_ln_b"] = jnp.zeros((1, EMBED_DIM), jnp.float32)
    p["head_w"] = _trunc_normal(next(ks), (EMBED_DIM, NUM_CLASSES), 0.01, jnp.bfloat16)
    p["head_b"] = jnp.zeros((1, NUM_CLASSES), jnp.float32)
    p["consts"] = _build_consts()
    return p


if __name__ == "__main__":
    key = jax.random.PRNGKey(0)
    params = init_params(key)
    x = jax.random.normal(jax.random.fold_in(key, 999),
                          (BATCH, IN_CHANNELS, PIC_SIZE, PIC_SIZE), jnp.float32)
    logits = jax.block_until_ready(vit_forward(x, params))
    assert logits.shape == (BATCH, NUM_CLASSES)
    assert bool(jnp.all(jnp.isfinite(logits)))
    print("KERNEL_OK")
</pallas_src>

<mosaic_0001>
module attributes {stable_mosaic.version = 11 : i64} {
  func.func @_vit_kernel(%arg0: i32, %arg1: memref<34x64xf32, #tpu.memory_space<vmem>>, %arg2: memref<34x32xf32, #tpu.memory_space<vmem>>, %arg3: memref<64x32xbf16, #tpu.memory_space<vmem>>, %arg4: memref<136x34xf32, #tpu.memory_space<vmem>>, %arg5: memref<34x136xf32, #tpu.memory_space<vmem>>, %arg6: memref<136x32xf32, #tpu.memory_space<vmem>>, %arg7: memref<136x34xf32, #tpu.memory_space<vmem>>, %arg8: memref<2x34xf32, #tpu.memory_space<vmem>>, %arg9: memref<2x1x32xf32, #tpu.memory_space<vmem>>, %arg10: memref<2x1x32xf32, #tpu.memory_space<vmem>>, %arg11: memref<2x32x32xbf16, #tpu.memory_space<vmem>>, %arg12: memref<2x32x32xbf16, #tpu.memory_space<vmem>>, %arg13: memref<2x32x32xbf16, #tpu.memory_space<vmem>>, %arg14: memref<2x32x32xbf16, #tpu.memory_space<vmem>>, %arg15: memref<2x1x32xf32, #tpu.memory_space<vmem>>, %arg16: memref<2x32x128xbf16, #tpu.memory_space<vmem>>, %arg17: memref<2x1x128xf32, #tpu.memory_space<vmem>>, %arg18: memref<2x128x32xbf16, #tpu.memory_space<vmem>>, %arg19: memref<2x1x32xf32, #tpu.memory_space<vmem>>, %arg20: memref<1x32xf32, #tpu.memory_space<vmem>>, %arg21: memref<1x32xf32, #tpu.memory_space<vmem>>, %arg22: memref<32x10xbf16, #tpu.memory_space<vmem>>, %arg23: memref<1x10xf32, #tpu.memory_space<vmem>>, %arg24: memref<2x10xf32, #tpu.memory_space<vmem>>) attributes {dimension_semantics = [#tpu.dimension_semantics<arbitrary>], iteration_bounds = array<i64: 1>, scalar_prefetch = 0 : i64, scratch_operands = 0 : i64, tpu.core_type = #tpu.core_type<tc>, window_params = [{pipeline_mode = #tpu.pipeline_mode<synchronous>, transform_indices = @transform_0, window_bounds = array<i64: 34, 64>}, {pipeline_mode = #tpu.pipeline_mode<synchronous>, transform_indices = @transform_1, window_bounds = array<i64: 34, 32>}, {pipeline_mode = #tpu.pipeline_mode<synchronous>, transform_indices = @transform_2, window_bounds = array<i64: 64, 32>}, {pipeline_mode = #tpu.pipeline_mode<synchronous>, transform_indices = @transform_3, window_bounds = array<i64: 136, 34>}, {pipeline_mode = #tpu.pipeline_mode<synchronous>, transform_indices = @transform_4, window_bounds = array<i64: 34, 136>}, {pipeline_mode = #tpu.pipeline_mode<synchronous>, transform_indices = @transform_5, window_bounds = array<i64: 136, 32>}, {pipeline_mode = #tpu.pipeline_mode<synchronous>, transform_indices = @transform_6, window_bounds = array<i64: 136, 34>}, {pipeline_mode = #tpu.pipeline_mode<synchronous>, transform_indices = @transform_7, window_bounds = array<i64: 2, 34>}, {pipeline_mode = #tpu.pipeline_mode<synchronous>, transform_indices = @transform_8, window_bounds = array<i64: 2, 1, 32>}, {pipeline_mode = #tpu.pipeline_mode<synchronous>, transform_indices = @transform_9, window_bounds = array<i64: 2, 1, 32>}, {pipeline_mode = #tpu.pipeline_mode<synchronous>, transform_indices = @transform_10, window_bounds = array<i64: 2, 32, 32>}, {pipeline_mode = #tpu.pipeline_mode<synchronous>, transform_indices = @transform_11, window_bounds = array<i64: 2, 32, 32>}, {pipeline_mode = #tpu.pipeline_mode<synchronous>, transform_indices = @transform_12, window_bounds = array<i64: 2, 32, 32>}, {pipeline_mode = #tpu.pipeline_mode<synchronous>, transform_indices = @transform_13, window_bounds = array<i64: 2, 32, 32>}, {pipeline_mode = #tpu.pipeline_mode<synchronous>, transform_indices = @transform_14, window_bounds = array<i64: 2, 1, 32>}, {pipeline_mode = #tpu.pipeline_mode<synchronous>, transform_indices = @transform_15, window_bounds = array<i64: 2, 32, 128>}, {pipeline_mode = #tpu.pipeline_mode<synchronous>, transform_indices = @transform_16, window_bounds = array<i64: 2, 1, 128>}, {pipeline_mode = #tpu.pipeline_mode<synchronous>, transform_indices = @transform_17, window_bounds = array<i64: 2, 128, 32>}, {pipeline_mode = #tpu.pipeline_mode<synchronous>, transform_indices = @transform_18, window_bounds = array<i64: 2, 1, 32>}, {pipeline_mode = #tpu.pipeline_mode<synchronous>, transform_indices = @transform_19, window_bounds = array<i64: 1, 32>}, {pipeline_mode = #tpu.pipeline_mode<synchronous>, transform_indices = @transform_20, window_bounds = array<i64: 1, 32>}, {pipeline_mode = #tpu.pipeline_mode<synchronous>, transform_indices = @transform_21, window_bounds = array<i64: 32, 10>}, {pipeline_mode = #tpu.pipeline_mode<synchronous>, transform_indices = @transform_22, window_bounds = array<i64: 1, 10>}, {pipeline_mode = #tpu.pipeline_mode<synchronous>, transform_indices = @transform_23, window_bounds = array<i64: 2, 10>}]} {
    %c0 = arith.constant 0 : index
    %c0_0 = arith.constant 0 : index
    %0 = vector.load %arg4[%c0, %c0_0] : memref<136x34xf32, #tpu.memory_space<vmem>>, vector<136x34xf32>
    %c0_1 = arith.constant 0 : index
    %c0_2 = arith.constant 0 : index
    %1 = vector.load %arg5[%c0_1, %c0_2] : memref<34x136xf32, #tpu.memory_space<vmem>>, vector<34x136xf32>
    %c0_3 = arith.constant 0 : index
    %c0_4 = arith.constant 0 : index
    %2 = vector.load %arg6[%c0_3, %c0_4] : memref<136x32xf32, #tpu.memory_space<vmem>>, vector<136x32xf32>
    %c0_5 = arith.constant 0 : index
    %c0_6 = arith.constant 0 : index
    %3 = vector.load %arg7[%c0_5, %c0_6] : memref<136x34xf32, #tpu.memory_space<vmem>>, vector<136x34xf32>
    %c0_7 = arith.constant 0 : index
    %c0_8 = arith.constant 0 : index
    %4 = vector.load %arg2[%c0_7, %c0_8] : memref<34x32xf32, #tpu.memory_space<vmem>>, vector<34x32xf32>
    %c0_9 = arith.constant 0 : index
    %c0_10 = arith.constant 0 : index
    %5 = vector.load %arg1[%c0_9, %c0_10] : memref<34x64xf32, #tpu.memory_space<vmem>>, vector<34x64xf32>
    %6 = arith.truncf %5 : vector<34x64xf32> to vector<34x64xbf16>
    %c0_11 = arith.constant 0 : index
    %c0_12 = arith.constant 0 : index
    %7 = vector.load %arg3[%c0_11, %c0_12] : memref<64x32xbf16, #tpu.memory_space<vmem>>, vector<64x32xbf16>
    %cst = arith.constant dense<0.000000e+00> : vector<34x32xf32>
    %8 = tpu.matmul %6, %7, %cst {dimension_numbers = #tpu.dot_dimension_numbers<[1], [0], [0], [1], [0, 0, 1, 1], [], []>} : vector<34x64xbf16>, vector<64x32xbf16>, vector<34x32xf32> -> vector<34x32xf32>
    %9 = arith.addf %4, %8 : vector<34x32xf32>
    %c0_13 = arith.constant 0 : index
    %c0_14 = arith.constant 0 : index
    %c0_15 = arith.constant 0 : index
    %10 = vector.load %arg9[%c0_13, %c0_14, %c0_15] : memref<2x1x32xf32, #tpu.memory_space<vmem>>, vector<1x1x32xf32>
    %11 = vector.shape_cast %10 : vector<1x1x32xf32> to vector<1x32xf32>
    %c0_16 = arith.constant 0 : index
    %c0_17 = arith.constant 0 : index
    %c0_18 = arith.constant 0 : index
    %12 = vector.load %arg10[%c0_16, %c0_17, %c0_18] : memref<2x1x32xf32, #tpu.memory_space<vmem>>, vector<1x1x32xf32>
    %13 = vector.shape_cast %12 : vector<1x1x32xf32> to vector<1x32xf32>
    %cst_19 = arith.constant dense<0.000000e+00> : vector<34xf32>
    %14 = vector.multi_reduction <add>, %9, %cst_19 [1] : vector<34x32xf32> to vector<34xf32>
    %15 = vector.shape_cast %14 : vector<34xf32> to vector<34x1xf32>
    %cst_20 = arith.constant 3.200000e+01 : f32
    %16 = vector.broadcast %cst_20 : f32 to vector<34x1xf32>
    %17 = arith.divf %15, %16 : vector<34x1xf32>
    %18 = vector.broadcast %17 : vector<34x1xf32> to vector<34x32xf32>
    %19 = arith.subf %9, %18 : vector<34x32xf32>
    %20 = arith.mulf %19, %19 : vector<34x32xf32>
    %cst_21 = arith.constant dense<0.000000e+00> : vector<34xf32>
    %21 = vector.multi_reduction <add>, %20, %cst_21 [1] : vector<34x32xf32> to vector<34xf32>
    %22 = vector.shape_cast %21 : vector<34xf32> to vector<34x1xf32>
    %cst_22 = arith.constant 3.200000e+01 : f32
    %23 = vector.broadcast %cst_22 : f32 to vector<34x1xf32>
    %24 = arith.divf %22, %23 : vector<34x1xf32>
    %25 = vector.broadcast %17 : vector<34x1xf32> to vector<34x32xf32>
    %26 = arith.subf %9, %25 : vector<34x32xf32>
    %cst_23 = arith.constant 9.99999974E-6 : f32
    %27 = vector.broadcast %cst_23 : f32 to vector<34x1xf32>
    %28 = arith.addf %24, %27 : vector<34x1xf32>
    %29 = math.rsqrt %28 : vector<34x1xf32>
    %30 = vector.broadcast %29 : vector<34x1xf32> to vector<34x32xf32>
    %31 = arith.mulf %26, %30 : vector<34x32xf32>
    %32 = vector.broadcast %11 : vector<1x32xf32> to vector<34x32xf32>
    %33 = arith.mulf %31, %32 : vector<34x32xf32>
    %34 = vector.broadcast %13 : vector<1x32xf32> to vector<34x32xf32>
    %35 = arith.addf %33, %34 : vector<34x32xf32>
    %36 = arith.truncf %35 : vector<34x32xf32> to vector<34x32xbf16>
    %c0_24 = arith.constant 0 : index
    %c0_25 = arith.constant 0 : index
    %c0_26 = arith.constant 0 : index
    %37 = vector.load %arg11[%c0_24, %c0_25, %c0_26] : memref<2x32x32xbf16, #tpu.memory_space<vmem>>, vector<1x32x32xbf16>
    %38 = vector.shape_cast %37 : vector<1x32x32xbf16> to vector<32x32xbf16>
    %cst_27 = arith.constant dense<0.000000e+00> : vector<34x32xf32>
    %39 = tpu.matmul %36, %38, %cst_27 {dimension_numbers = #tpu.dot_dimension_numbers<[1], [0], [0], [1], [0, 0, 1, 1], [], []>} : vector<34x32xbf16>, vector<32x32xbf16>, vector<34x32xf32> -> vector<34x32xf32>
    %c0_28 = arith.constant 0 : index
    %c0_29 = arith.constant 0 : index
    %c0_30 = arith.constant 0 : index
    %40 = vector.load %arg12[%c0_28, %c0_29, %c0_30] : memref<2x32x32xbf16, #tpu.memory_space<vmem>>, vector<1x32x32xbf16>
    %41 = vector.shape_cast %40 : vector<1x32x32xbf16> to vector<32x32xbf16>
    %cst_31 = arith.constant dense<0.000000e+00> : vector<34x32xf32>
    %42 = tpu.matmul %36, %41, %cst_31 {dimension_numbers = #tpu.dot_dimension_numbers<[1], [0], [0], [1], [0, 0, 1, 1], [], []>} : vector<34x32xbf16>, vector<32x32xbf16>, vector<34x32xf32> -> vector<34x32xf32>
    %c0_32 = arith.constant 0 : index
    %c0_33 = arith.constant 0 : index
    %c0_34 = arith.constant 0 : index
    %43 = vector.load %arg13[%c0_32, %c0_33, %c0_34] : memref<2x32x32xbf16, #tpu.memory_space<vmem>>, vector<1x32x32xbf16>
    %44 = vector.shape_cast %43 : vector<1x32x32xbf16> to vector<32x32xbf16>
    %cst_35 = arith.constant dense<0.000000e+00> : vector<34x32xf32>
    %45 = tpu.matmul %36, %44, %cst_35 {dimension_numbers = #tpu.dot_dimension_numbers<[1], [0], [0], [1], [0, 0, 1, 1], [], []>} : vector<34x32xbf16>, vector<32x32xbf16>, vector<34x32xf32> -> vector<34x32xf32>
    %cst_36 = arith.constant dense<0.000000e+00> : vector<136x32xf32>
    %46 = tpu.matmul %0, %39, %cst_36 {dimension_numbers = #tpu.dot_dimension_numbers<[1], [0], [0], [1], [0, 0, 1, 1], [], []>} : vector<136x34xf32>, vector<34x32xf32>, vector<136x32xf32> -> vector<136x32xf32>
    %47 = arith.mulf %46, %2 : vector<136x32xf32>
    %48 = arith.truncf %47 : vector<136x32xf32> to vector<136x32xbf16>
    %49 = arith.truncf %42 : vector<34x32xf32> to vector<34x32xbf16>
    %cst_37 = arith.constant dense<0.000000e+00> : vector<136x34xf32>
    %50 = tpu.matmul %48, %49, %cst_37 {dimension_numbers = #tpu.dot_dimension_numbers<[1], [1], [0], [0], [0, 0, 1, 0], [], []>} : vector<136x32xbf16>, vector<34x32xbf16>, vector<136x34xf32> -> vector<136x34xf32>
    %51 = arith.addf %50, %3 : vector<136x34xf32>
    %cst_38 = arith.constant dense<0xFF800000> : vector<136xf32>
    %52 = vector.multi_reduction <maximumf>, %51, %cst_38 [1] : vector<136x34xf32> to vector<136xf32>
    %53 = vector.shape_cast %52 : vector<136xf32> to vector<136x1xf32>
    %54 = vector.broadcast %53 : vector<136x1xf32> to vector<136x34xf32>
    %55 = arith.subf %51, %54 : vector<136x34xf32>
    %56 = math.exp %55 : vector<136x34xf32>
    %cst_39 = arith.constant dense<0.000000e+00> : vector<136xf32>
    %57 = vector.multi_reduction <add>, %56, %cst_39 [1] : vector<136x34xf32> to vector<136xf32>
    %58 = vector.shape_cast %57 : vector<136xf32> to vector<136x1xf32>
    %59 = tpu.reciprocal %58 {approx = true} : vector<136x1xf32> -> vector<136x1xf32>
    %60 = vector.broadcast %59 : vector<136x1xf32> to vector<136x34xf32>
    %61 = arith.mulf %56, %60 : vector<136x34xf32>
    %62 = arith.truncf %61 : vector<136x34xf32> to vector<136x34xbf16>
    %63 = arith.truncf %45 : vector<34x32xf32> to vector<34x32xbf16>
    %cst_40 = arith.constant dense<0.000000e+00> : vector<136x32xf32>
    %64 = tpu.matmul %62, %63, %cst_40 {dimension_numbers = #tpu.dot_dimension_numbers<[1], [0], [0], [1], [0, 0, 1, 1], [], []>} : vector<136x34xbf16>, vector<34x32xbf16>, vector<136x32xf32> -> vector<136x32xf32>
    %65 = arith.mulf %64, %2 : vector<136x32xf32>
    %cst_41 = arith.constant dense<0.000000e+00> : vector<34x32xf32>
    %66 = tpu.matmul %1, %65, %cst_41 {dimension_numbers = #tpu.dot_dimension_numbers<[1], [0], [0], [1], [0, 0, 1, 1], [], []>} : vector<34x136xf32>, vector<136x32xf32>, vector<34x32xf32> -> vector<34x32xf32>
    %67 = arith.truncf %66 : vector<34x32xf32> to vector<34x32xbf16>
    %c0_42 = arith.constant 0 : index
    %c0_43 = arith.constant 0 : index
    %c0_44 = arith.constant 0 : index
    %68 = vector.load %arg14[%c0_42, %c0_43, %c0_44] : memref<2x32x32xbf16, #tpu.memory_space<vmem>>, vector<1x32x32xbf16>
    %69 = vector.shape_cast %68 : vector<1x32x32xbf16> to vector<32x32xbf16>
    %cst_45 = arith.constant dense<0.000000e+00> : vector<34x32xf32>
    %70 = tpu.matmul %67, %69, %cst_45 {dimension_numbers = #tpu.dot_dimension_numbers<[1], [0], [0], [1], [0, 0, 1, 1], [], []>} : vector<34x32xbf16>, vector<32x32xbf16>, vector<34x32xf32> -> vector<34x32xf32>
    %c0_46 = arith.constant 0 : index
    %c0_47 = arith.constant 0 : index
    %c0_48 = arith.constant 0 : index
    %71 = vector.load %arg15[%c0_46, %c0_47, %c0_48] : memref<2x1x32xf32, #tpu.memory_space<vmem>>, vector<1x1x32xf32>
    %72 = vector.shape_cast %71 : vector<1x1x32xf32> to vector<1x32xf32>
    %73 = vector.broadcast %72 : vector<1x32xf32> to vector<34x32xf32>
    %74 = arith.addf %70, %73 : vector<34x32xf32>
    %75 = arith.addf %9, %74 : vector<34x32xf32>
    %cst_49 = arith.constant dense<0.000000e+00> : vector<34xf32>
    %76 = vector.multi_reduction <add>, %75, %cst_49 [1] : vector<34x32xf32> to vector<34xf32>
    %77 = vector.shape_cast %76 : vector<34xf32> to vector<34x1xf32>
    %cst_50 = arith.constant 3.200000e+01 : f32
    %78 = vector.broadcast %cst_50 : f32 to vector<34x1xf32>
    %79 = arith.divf %77, %78 : vector<34x1xf32>
    %80 = vector.broadcast %79 : vector<34x1xf32> to vector<34x32xf32>
    %81 = arith.subf %75, %80 : vector<34x32xf32>
    %82 = arith.mulf %81, %81 : vector<34x32xf32>
    %cst_51 = arith.constant dense<0.000000e+00> : vector<34xf32>
    %83 = vector.multi_reduction <add>, %82, %cst_51 [1] : vector<34x32xf32> to vector<34xf32>
    %84 = vector.shape_cast %83 : vector<34xf32> to vector<34x1xf32>
    %cst_52 = arith.constant 3.200000e+01 : f32
    %85 = vector.broadcast %cst_52 : f32 to vector<34x1xf32>
    %86 = arith.divf %84, %85 : vector<34x1xf32>
    %87 = vector.broadcast %79 : vector<34x1xf32> to vector<34x32xf32>
    %88 = arith.subf %75, %87 : vector<34x32xf32>
    %cst_53 = arith.constant 9.99999974E-6 : f32
    %89 = vector.broadcast %cst_53 : f32 to vector<34x1xf32>
    %90 = arith.addf %86, %89 : vector<34x1xf32>
    %91 = math.rsqrt %90 : vector<34x1xf32>
    %92 = vector.broadcast %91 : vector<34x1xf32> to vector<34x32xf32>
    %93 = arith.mulf %88, %92 : vector<34x32xf32>
    %94 = vector.broadcast %11 : vector<1x32xf32> to vector<34x32xf32>
    %95 = arith.mulf %93, %94 : vector<34x32xf32>
    %96 = vector.broadcast %13 : vector<1x32xf32> to vector<34x32xf32>
    %97 = arith.addf %95, %96 : vector<34x32xf32>
    %98 = arith.truncf %97 : vector<34x32xf32> to vector<34x32xbf16>
    %c0_54 = arith.constant 0 : index
    %c0_55 = arith.constant 0 : index
    %c0_56 = arith.constant 0 : index
    %99 = vector.load %arg16[%c0_54, %c0_55, %c0_56] : memref<2x32x128xbf16, #tpu.memory_space<vmem>>, vector<1x32x128xbf16>
    %100 = vector.shape_cast %99 : vector<1x32x128xbf16> to vector<32x128xbf16>
    %cst_57 = arith.constant dense<0.000000e+00> : vector<34x128xf32>
    %101 = tpu.matmul %98, %100, %cst_57 {dimension_numbers = #tpu.dot_dimension_numbers<[1], [0], [0], [1], [0, 0, 1, 1], [], []>} : vector<34x32xbf16>, vector<32x128xbf16>, vector<34x128xf32> -> vector<34x128xf32>
    %c0_58 = arith.constant 0 : index
    %c0_59 = arith.constant 0 : index
    %c0_60 = arith.constant 0 : index
    %102 = vector.load %arg17[%c0_58, %c0_59, %c0_60] : memref<2x1x128xf32, #tpu.memory_space<vmem>>, vector<1x1x128xf32>
    %103 = vector.shape_cast %102 : vector<1x1x128xf32> to vector<1x128xf32>
    %104 = vector.broadcast %103 : vector<1x128xf32> to vector<34x128xf32>
    %105 = arith.addf %101, %104 : vector<34x128xf32>
    %106 = arith.mulf %105, %105 : vector<34x128xf32>
    %107 = arith.mulf %105, %106 : vector<34x128xf32>
    %cst_61 = arith.constant 4.471500e-02 : f32
    %108 = vector.broadcast %cst_61 : f32 to vector<34x128xf32>
    %109 = arith.mulf %108, %107 : vector<34x128xf32>
    %110 = arith.addf %105, %109 : vector<34x128xf32>
    %cst_62 = arith.constant 0.797884583 : f32
    %111 = vector.broadcast %cst_62 : f32 to vector<34x128xf32>
    %112 = arith.mulf %111, %110 : vector<34x128xf32>
    %113 = math.tanh %112 : vector<34x128xf32>
    %cst_63 = arith.constant 1.000000e+00 : f32
    %114 = vector.broadcast %cst_63 : f32 to vector<34x128xf32>
    %115 = arith.addf %114, %113 : vector<34x128xf32>
    %cst_64 = arith.constant 5.000000e-01 : f32
    %116 = vector.broadcast %cst_64 : f32 to vector<34x128xf32>
    %117 = arith.mulf %116, %115 : vector<34x128xf32>
    %118 = arith.mulf %105, %117 : vector<34x128xf32>
    %119 = arith.truncf %118 : vector<34x128xf32> to vector<34x128xbf16>
    %c0_65 = arith.constant 0 : index
    %c0_66 = arith.constant 0 : index
    %c0_67 = arith.constant 0 : index
    %120 = vector.load %arg18[%c0_65, %c0_66, %c0_67] : memref<2x128x32xbf16, #tpu.memory_space<vmem>>, vector<1x128x32xbf16>
    %121 = vector.shape_cast %120 : vector<1x128x32xbf16> to vector<128x32xbf16>
    %cst_68 = arith.constant dense<0.000000e+00> : vector<34x32xf32>
    %122 = tpu.matmul %119, %121, %cst_68 {dimension_numbers = #tpu.dot_dimension_numbers<[1], [0], [0], [1], [0, 0, 1, 1], [], []>} : vector<34x128xbf16>, vector<128x32xbf16>, vector<34x32xf32> -> vector<34x32xf32>
    %c0_69 = arith.constant 0 : index
    %c0_70 = arith.constant 0 : index
    %c0_71 = arith.constant 0 : index
    %123 = vector.load %arg19[%c0_69, %c0_70, %c0_71] : memref<2x1x32xf32, #tpu.memory_space<vmem>>, vector<1x1x32xf32>
    %124 = vector.shape_cast %123 : vector<1x1x32xf32> to vector<1x32xf32>
    %125 = vector.broadcast %124 : vector<1x32xf32> to vector<34x32xf32>
    %126 = arith.addf %122, %125 : vector<34x32xf32>
    %127 = arith.addf %75, %126 : vector<34x32xf32>
    %c1 = arith.constant 1 : index
    %c0_72 = arith.constant 0 : index
    %c0_73 = arith.constant 0 : index
    %128 = vector.load %arg9[%c1, %c0_72, %c0_73] : memref<2x1x32xf32, #tpu.memory_space<vmem>>, vector<1x1x32xf32>
    %129 = vector.shape_cast %128 : vector<1x1x32xf32> to vector<1x32xf32>
    %c1_74 = arith.constant 1 : index
    %c0_75 = arith.constant 0 : index
    %c0_76 = arith.constant 0 : index
    %130 = vector.load %arg10[%c1_74, %c0_75, %c0_76] : memref<2x1x32xf32, #tpu.memory_space<vmem>>, vector<1x1x32xf32>
    %131 = vector.shape_cast %130 : vector<1x1x32xf32> to vector<1x32xf32>
    %cst_77 = arith.constant dense<0.000000e+00> : vector<34xf32>
    %132 = vector.multi_reduction <add>, %127, %cst_77 [1] : vector<34x32xf32> to vector<34xf32>
    %133 = vector.shape_cast %132 : vector<34xf32> to vector<34x1xf32>
    %cst_78 = arith.constant 3.200000e+01 : f32
    %134 = vector.broadcast %cst_78 : f32 to vector<34x1xf32>
    %135 = arith.divf %133, %134 : vector<34x1xf32>
    %136 = vector.broadcast %135 : vector<34x1xf32> to vector<34x32xf32>
    %137 = arith.subf %127, %136 : vector<34x32xf32>
    %138 = arith.mulf %137, %137 : vector<34x32xf32>
    %cst_79 = arith.constant dense<0.000000e+00> : vector<34xf32>
    %139 = vector.multi_reduction <add>, %138, %cst_79 [1] : vector<34x32xf32> to vector<34xf32>
    %140 = vector.shape_cast %139 : vector<34xf32> to vector<34x1xf32>
    %cst_80 = arith.constant 3.200000e+01 : f32
    %141 = vector.broadcast %cst_80 : f32 to vector<34x1xf32>
    %142 = arith.divf %140, %141 : vector<34x1xf32>
    %143 = vector.broadcast %135 : vector<34x1xf32> to vector<34x32xf32>
    %144 = arith.subf %127, %143 : vector<34x32xf32>
    %cst_81 = arith.constant 9.99999974E-6 : f32
    %145 = vector.broadcast %cst_81 : f32 to vector<34x1xf32>
    %146 = arith.addf %142, %145 : vector<34x1xf32>
    %147 = math.rsqrt %146 : vector<34x1xf32>
    %148 = vector.broadcast %147 : vector<34x1xf32> to vector<34x32xf32>
    %149 = arith.mulf %144, %148 : vector<34x32xf32>
    %150 = vector.broadcast %129 : vector<1x32xf32> to vector<34x32xf32>
    %151 = arith.mulf %149, %150 : vector<34x32xf32>
    %152 = vector.broadcast %131 : vector<1x32xf32> to vector<34x32xf32>
    %153 = arith.addf %151, %152 : vector<34x32xf32>
    %154 = arith.truncf %153 : vector<34x32xf32> to vector<34x32xbf16>
    %c1_82 = arith.constant 1 : index
    %c0_83 = arith.constant 0 : index
    %c0_84 = arith.constant 0 : index
    %155 = vector.load %arg11[%c1_82, %c0_83, %c0_84] : memref<2x32x32xbf16, #tpu.memory_space<vmem>>, vector<1x32x32xbf16>
    %156 = vector.shape_cast %155 : vector<1x32x32xbf16> to vector<32x32xbf16>
    %cst_85 = arith.constant dense<0.000000e+00> : vector<34x32xf32>
    %157 = tpu.matmul %154, %156, %cst_85 {dimension_numbers = #tpu.dot_dimension_numbers<[1], [0], [0], [1], [0, 0, 1, 1], [], []>} : vector<34x32xbf16>, vector<32x32xbf16>, vector<34x32xf32> -> vector<34x32xf32>
    %c1_86 = arith.constant 1 : index
    %c0_87 = arith.constant 0 : index
    %c0_88 = arith.constant 0 : index
    %158 = vector.load %arg12[%c1_86, %c0_87, %c0_88] : memref<2x32x32xbf16, #tpu.memory_space<vmem>>, vector<1x32x32xbf16>
    %159 = vector.shape_cast %158 : vector<1x32x32xbf16> to vector<32x32xbf16>
    %cst_89 = arith.constant dense<0.000000e+00> : vector<34x32xf32>
    %160 = tpu.matmul %154, %159, %cst_89 {dimension_numbers = #tpu.dot_dimension_numbers<[1], [0], [0], [1], [0, 0, 1, 1], [], []>} : vector<34x32xbf16>, vector<32x32xbf16>, vector<34x32xf32> -> vector<34x32xf32>
    %c1_90 = arith.constant 1 : index
    %c0_91 = arith.constant 0 : index
    %c0_92 = arith.constant 0 : index
    %161 = vector.load %arg13[%c1_90, %c0_91, %c0_92] : memref<2x32x32xbf16, #tpu.memory_space<vmem>>, vector<1x32x32xbf16>
    %162 = vector.shape_cast %161 : vector<1x32x32xbf16> to vector<32x32xbf16>
    %cst_93 = arith.constant dense<0.000000e+00> : vector<34x32xf32>
    %163 = tpu.matmul %154, %162, %cst_93 {dimension_numbers = #tpu.dot_dimension_numbers<[1], [0], [0], [1], [0, 0, 1, 1], [], []>} : vector<34x32xbf16>, vector<32x32xbf16>, vector<34x32xf32> -> vector<34x32xf32>
    %cst_94 = arith.constant dense<0.000000e+00> : vector<136x32xf32>
    %164 = tpu.matmul %0, %157, %cst_94 {dimension_numbers = #tpu.dot_dimension_numbers<[1], [0], [0], [1], [0, 0, 1, 1], [], []>} : vector<136x34xf32>, vector<34x32xf32>, vector<136x32xf32> -> vector<136x32xf32>
    %165 = arith.mulf %164, %2 : vector<136x32xf32>
    %166 = arith.truncf %165 : vector<136x32xf32> to vector<136x32xbf16>
    %167 = arith.truncf %160 : vector<34x32xf32> to vector<34x32xbf16>
    %cst_95 = arith.constant dense<0.000000e+00> : vector<136x34xf32>
    %168 = tpu.matmul %166, %167, %cst_95 {dimension_numbers = #tpu.dot_dimension_numbers<[1], [1], [0], [0], [0, 0, 1, 0], [], []>} : vector<136x32xbf16>, vector<34x32xbf16>, vector<136x34xf32> -> vector<136x34xf32>
    %169 = arith.addf %168, %3 : vector<136x34xf32>
    %cst_96 = arith.constant dense<0xFF800000> : vector<136xf32>
    %170 = vector.multi_reduction <maximumf>, %169, %cst_96 [1] : vector<136x34xf32> to vector<136xf32>
    %171 = vector.shape_cast %170 : vector<136xf32> to vector<136x1xf32>
    %172 = vector.broadcast %171 : vector<136x1xf32> to vector<136x34xf32>
    %173 = arith.subf %169, %172 : vector<136x34xf32>
    %174 = math.exp %173 : vector<136x34xf32>
    %cst_97 = arith.constant dense<0.000000e+00> : vector<136xf32>
    %175 = vector.multi_reduction <add>, %174, %cst_97 [1] : vector<136x34xf32> to vector<136xf32>
    %176 = vector.shape_cast %175 : vector<136xf32> to vector<136x1xf32>
    %177 = tpu.reciprocal %176 {approx = true} : vector<136x1xf32> -> vector<136x1xf32>
    %178 = vector.broadcast %177 : vector<136x1xf32> to vector<136x34xf32>
    %179 = arith.mulf %174, %178 : vector<136x34xf32>
    %180 = arith.truncf %179 : vector<136x34xf32> to vector<136x34xbf16>
    %181 = arith.truncf %163 : vector<34x32xf32> to vector<34x32xbf16>
    %cst_98 = arith.constant dense<0.000000e+00> : vector<136x32xf32>
    %182 = tpu.matmul %180, %181, %cst_98 {dimension_numbers = #tpu.dot_dimension_numbers<[1], [0], [0], [1], [0, 0, 1, 1], [], []>} : vector<136x34xbf16>, vector<34x32xbf16>, vector<136x32xf32> -> vector<136x32xf32>
    %183 = arith.mulf %182, %2 : vector<136x32xf32>
    %cst_99 = arith.constant dense<0.000000e+00> : vector<34x32xf32>
    %184 = tpu.matmul %1, %183, %cst_99 {dimension_numbers = #tpu.dot_dimension_numbers<[1], [0], [0], [1], [0, 0, 1, 1], [], []>} : vector<34x136xf32>, vector<136x32xf32>, vector<34x32xf32> -> vector<34x32xf32>
    %185 = arith.truncf %184 : vector<34x32xf32> to vector<34x32xbf16>
    %c1_100 = arith.constant 1 : index
    %c0_101 = arith.constant 0 : index
    %c0_102 = arith.constant 0 : index
    %186 = vector.load %arg14[%c1_100, %c0_101, %c0_102] : memref<2x32x32xbf16, #tpu.memory_space<vmem>>, vector<1x32x32xbf16>
    %187 = vector.shape_cast %186 : vector<1x32x32xbf16> to vector<32x32xbf16>
    %cst_103 = arith.constant dense<0.000000e+00> : vector<34x32xf32>
    %188 = tpu.matmul %185, %187, %cst_103 {dimension_numbers = #tpu.dot_dimension_numbers<[1], [0], [0], [1], [0, 0, 1, 1], [], []>} : vector<34x32xbf16>, vector<32x32xbf16>, vector<34x32xf32> -> vector<34x32xf32>
    %c1_104 = arith.constant 1 : index
    %c0_105 = arith.constant 0 : index
    %c0_106 = arith.constant 0 : index
    %189 = vector.load %arg15[%c1_104, %c0_105, %c0_106] : memref<2x1x32xf32, #tpu.memory_space<vmem>>, vector<1x1x32xf32>
    %190 = vector.shape_cast %189 : vector<1x1x32xf32> to vector<1x32xf32>
    %191 = vector.broadcast %190 : vector<1x32xf32> to vector<34x32xf32>
    %192 = arith.addf %188, %191 : vector<34x32xf32>
    %193 = arith.addf %127, %192 : vector<34x32xf32>
    %cst_107 = arith.constant dense<0.000000e+00> : vector<34xf32>
    %194 = vector.multi_reduction <add>, %193, %cst_107 [1] : vector<34x32xf32> to vector<34xf32>
    %195 = vector.shape_cast %194 : vector<34xf32> to vector<34x1xf32>
    %cst_108 = arith.constant 3.200000e+01 : f32
    %196 = vector.broadcast %cst_108 : f32 to vector<34x1xf32>
    %197 = arith.divf %195, %196 : vector<34x1xf32>
    %198 = vector.broadcast %197 : vector<34x1xf32> to vector<34x32xf32>
    %199 = arith.subf %193, %198 : vector<34x32xf32>
    %200 = arith.mulf %199, %199 : vector<34x32xf32>
    %cst_109 = arith.constant dense<0.000000e+00> : vector<34xf32>
    %201 = vector.multi_reduction <add>, %200, %cst_109 [1] : vector<34x32xf32> to vector<34xf32>
    %202 = vector.shape_cast %201 : vector<34xf32> to vector<34x1xf32>
    %cst_110 = arith.constant 3.200000e+01 : f32
    %203 = vector.broadcast %cst_110 : f32 to vector<34x1xf32>
    %204 = arith.divf %202, %203 : vector<34x1xf32>
    %205 = vector.broadcast %197 : vector<34x1xf32> to vector<34x32xf32>
    %206 = arith.subf %193, %205 : vector<34x32xf32>
    %cst_111 = arith.constant 9.99999974E-6 : f32
    %207 = vector.broadcast %cst_111 : f32 to vector<34x1xf32>
    %208 = arith.addf %204, %207 : vector<34x1xf32>
    %209 = math.rsqrt %208 : vector<34x1xf32>
    %210 = vector.broadcast %209 : vector<34x1xf32> to vector<34x32xf32>
    %211 = arith.mulf %206, %210 : vector<34x32xf32>
    %212 = vector.broadcast %129 : vector<1x32xf32> to vector<34x32xf32>
    %213 = arith.mulf %211, %212 : vector<34x32xf32>
    %214 = vector.broadcast %131 : vector<1x32xf32> to vector<34x32xf32>
    %215 = arith.addf %213, %214 : vector<34x32xf32>
    %216 = arith.truncf %215 : vector<34x32xf32> to vector<34x32xbf16>
    %c1_112 = arith.constant 1 : index
    %c0_113 = arith.constant 0 : index
    %c0_114 = arith.constant 0 : index
    %217 = vector.load %arg16[%c1_112, %c0_113, %c0_114] : memref<2x32x128xbf16, #tpu.memory_space<vmem>>, vector<1x32x128xbf16>
    %218 = vector.shape_cast %217 : vector<1x32x128xbf16> to vector<32x128xbf16>
    %cst_115 = arith.constant dense<0.000000e+00> : vector<34x128xf32>
    %219 = tpu.matmul %216, %218, %cst_115 {dimension_numbers = #tpu.dot_dimension_numbers<[1], [0], [0], [1], [0, 0, 1, 1], [], []>} : vector<34x32xbf16>, vector<32x128xbf16>, vector<34x128xf32> -> vector<34x128xf32>
    %c1_116 = arith.constant 1 : index
    %c0_117 = arith.constant 0 : index
    %c0_118 = arith.constant 0 : index
    %220 = vector.load %arg17[%c1_116, %c0_117, %c0_118] : memref<2x1x128xf32, #tpu.memory_space<vmem>>, vector<1x1x128xf32>
    %221 = vector.shape_cast %220 : vector<1x1x128xf32> to vector<1x128xf32>
    %222 = vector.broadcast %221 : vector<1x128xf32> to vector<34x128xf32>
    %223 = arith.addf %219, %222 : vector<34x128xf32>
    %224 = arith.mulf %223, %223 : vector<34x128xf32>
    %225 = arith.mulf %223, %224 : vector<34x128xf32>
    %cst_119 = arith.constant 4.471500e-02 : f32
    %226 = vector.broadcast %cst_119 : f32 to vector<34x128xf32>
    %227 = arith.mulf %226, %225 : vector<34x128xf32>
    %228 = arith.addf %223, %227 : vector<34x128xf32>
    %cst_120 = arith.constant 0.797884583 : f32
    %229 = vector.broadcast %cst_120 : f32 to vector<34x128xf32>
    %230 = arith.mulf %229, %228 : vector<34x128xf32>
    %231 = math.tanh %230 : vector<34x128xf32>
    %cst_121 = arith.constant 1.000000e+00 : f32
    %232 = vector.broadcast %cst_121 : f32 to vector<34x128xf32>
    %233 = arith.addf %232, %231 : vector<34x128xf32>
    %cst_122 = arith.constant 5.000000e-01 : f32
    %234 = vector.broadcast %cst_122 : f32 to vector<34x128xf32>
    %235 = arith.mulf %234, %233 : vector<34x128xf32>
    %236 = arith.mulf %223, %235 : vector<34x128xf32>
    %237 = arith.truncf %236 : vector<34x128xf32> to vector<34x128xbf16>
    %c1_123 = arith.constant 1 : index
    %c0_124 = arith.constant 0 : index
    %c0_125 = arith.constant 0 : index
    %238 = vector.load %arg18[%c1_123, %c0_124, %c0_125] : memref<2x128x32xbf16, #tpu.memory_space<vmem>>, vector<1x128x32xbf16>
    %239 = vector.shape_cast %238 : vector<1x128x32xbf16> to vector<128x32xbf16>
    %cst_126 = arith.constant dense<0.000000e+00> : vector<34x32xf32>
    %240 = tpu.matmul %237, %239, %cst_126 {dimension_numbers = #tpu.dot_dimension_numbers<[1], [0], [0], [1], [0, 0, 1, 1], [], []>} : vector<34x128xbf16>, vector<128x32xbf16>, vector<34x32xf32> -> vector<34x32xf32>
    %c1_127 = arith.constant 1 : index
    %c0_128 = arith.constant 0 : index
    %c0_129 = arith.constant 0 : index
    %241 = vector.load %arg19[%c1_127, %c0_128, %c0_129] : memref<2x1x32xf32, #tpu.memory_space<vmem>>, vector<1x1x32xf32>
    %242 = vector.shape_cast %241 : vector<1x1x32xf32> to vector<1x32xf32>
    %243 = vector.broadcast %242 : vector<1x32xf32> to vector<34x32xf32>
    %244 = arith.addf %240, %243 : vector<34x32xf32>
    %245 = arith.addf %193, %244 : vector<34x32xf32>
    %c0_130 = arith.constant 0 : index
    %c0_131 = arith.constant 0 : index
    %246 = vector.load %arg20[%c0_130, %c0_131] : memref<1x32xf32, #tpu.memory_space<vmem>>, vector<1x32xf32>
    %c0_132 = arith.constant 0 : index
    %c0_133 = arith.constant 0 : index
    %247 = vector.load %arg21[%c0_132, %c0_133] : memref<1x32xf32, #tpu.memory_space<vmem>>, vector<1x32xf32>
    %cst_134 = arith.constant dense<0.000000e+00> : vector<34xf32>
    %248 = vector.multi_reduction <add>, %245, %cst_134 [1] : vector<34x32xf32> to vector<34xf32>
    %249 = vector.shape_cast %248 : vector<34xf32> to vector<34x1xf32>
    %cst_135 = arith.constant 3.200000e+01 : f32
    %250 = vector.broadcast %cst_135 : f32 to vector<34x1xf32>
    %251 = arith.divf %249, %250 : vector<34x1xf32>
    %252 = vector.broadcast %251 : vector<34x1xf32> to vector<34x32xf32>
    %253 = arith.subf %245, %252 : vector<34x32xf32>
    %254 = arith.mulf %253, %253 : vector<34x32xf32>
    %cst_136 = arith.constant dense<0.000000e+00> : vector<34xf32>
    %255 = vector.multi_reduction <add>, %254, %cst_136 [1] : vector<34x32xf32> to vector<34xf32>
    %256 = vector.shape_cast %255 : vector<34xf32> to vector<34x1xf32>
    %cst_137 = arith.constant 3.200000e+01 : f32
    %257 = vector.broadcast %cst_137 : f32 to vector<34x1xf32>
    %258 = arith.divf %256, %257 : vector<34x1xf32>
    %259 = vector.broadcast %251 : vector<34x1xf32> to vector<34x32xf32>
    %260 = arith.subf %245, %259 : vector<34x32xf32>
    %cst_138 = arith.constant 9.99999997E-7 : f32
    %261 = vector.broadcast %cst_138 : f32 to vector<34x1xf32>
    %262 = arith.addf %258, %261 : vector<34x1xf32>
    %263 = math.rsqrt %262 : vector<34x1xf32>
    %264 = vector.broadcast %263 : vector<34x1xf32> to vector<34x32xf32>
    %265 = arith.mulf %260, %264 : vector<34x32xf32>
    %266 = vector.broadcast %246 : vector<1x32xf32> to vector<34x32xf32>
    %267 = arith.mulf %265, %266 : vector<34x32xf32>
    %268 = vector.broadcast %247 : vector<1x32xf32> to vector<34x32xf32>
    %269 = arith.addf %267, %268 : vector<34x32xf32>
    %c0_139 = arith.constant 0 : index
    %c0_140 = arith.constant 0 : index
    %270 = vector.load %arg8[%c0_139, %c0_140] : memref<2x34xf32, #tpu.memory_space<vmem>>, vector<2x34xf32>
    %cst_141 = arith.constant dense<0.000000e+00> : vector<2x32xf32>
    %271 = tpu.matmul %270, %269, %cst_141 {dimension_numbers = #tpu.dot_dimension_numbers<[1], [0], [0], [1], [0, 0, 1, 1], [], []>} : vector<2x34xf32>, vector<34x32xf32>, vector<2x32xf32> -> vector<2x32xf32>
    %272 = arith.truncf %271 : vector<2x32xf32> to vector<2x32xbf16>
    %c0_142 = arith.constant 0 : index
    %c0_143 = arith.constant 0 : index
    %273 = vector.load %arg22[%c0_142, %c0_143] : memref<32x10xbf16, #tpu.memory_space<vmem>>, vector<32x10xbf16>
    %cst_144 = arith.constant dense<0.000000e+00> : vector<2x10xf32>
    %274 = tpu.matmul %272, %273, %cst_144 {dimension_numbers = #tpu.dot_dimension_numbers<[1], [0], [0], [1], [0, 0, 1, 1], [], []>} : vector<2x32xbf16>, vector<32x10xbf16>, vector<2x10xf32> -> vector<2x10xf32>
    %c0_145 = arith.constant 0 : index
    %c0_146 = arith.constant 0 : index
    %275 = vector.load %arg23[%c0_145, %c0_146] : memref<1x10xf32, #tpu.memory_space<vmem>>, vector<1x10xf32>
    %276 = vector.broadcast %275 : vector<1x10xf32> to vector<2x10xf32>
    %277 = arith.addf %274, %276 : vector<2x10xf32>
    %c0_147 = arith.constant 0 : index
    %c0_148 = arith.constant 0 : index
    %278 = vector.load %arg24[%c0_147, %c0_148] : memref<2x10xf32, #tpu.memory_space<vmem>>, vector<2x10xf32>
    tpu.vector_store %arg24[%c0_147, %c0_148], %277 {strides = array<i32>} : memref<2x10xf32, #tpu.memory_space<vmem>>, vector<2x10xf32>,
    return
  }
  func.func @transform_0(%arg0: i32) -> (i32, i32) {
    %c0_i32 = arith.constant 0 : i32
    %c0_i32_0 = arith.constant 0 : i32
    %c0_i32_1 = arith.constant 0 : i32
    return %c0_i32, %c0_i32_0 : i32, i32
  }
  func.func @transform_1(%arg0: i32) -> (i32, i32) {
    %c0_i32 = arith.constant 0 : i32
    %c0_i32_0 = arith.constant 0 : i32
    %c0_i32_1 = arith.constant 0 : i32
    return %c0_i32, %c0_i32_0 : i32, i32
  }
  func.func @transform_2(%arg0: i32) -> (i32, i32) {
    %c0_i32 = arith.constant 0 : i32
    %c0_i32_0 = arith.constant 0 : i32
    %c0_i32_1 = arith.constant 0 : i32
    return %c0_i32, %c0_i32_0 : i32, i32
  }
  func.func @transform_3(%arg0: i32) -> (i32, i32) {
    %c0_i32 = arith.constant 0 : i32
    %c0_i32_0 = arith.constant 0 : i32
    %c0_i32_1 = arith.constant 0 : i32
    return %c0_i32, %c0_i32_0 : i32, i32
  }
  func.func @transform_4(%arg0: i32) -> (i32, i32) {
    %c0_i32 = arith.constant 0 : i32
    %c0_i32_0 = arith.constant 0 : i32
    %c0_i32_1 = arith.constant 0 : i32
    return %c0_i32, %c0_i32_0 : i32, i32
  }
  func.func @transform_5(%arg0: i32) -> (i32, i32) {
    %c0_i32 = arith.constant 0 : i32
    %c0_i32_0 = arith.constant 0 : i32
    %c0_i32_1 = arith.constant 0 : i32
    return %c0_i32, %c0_i32_0 : i32, i32
  }
  func.func @transform_6(%arg0: i32) -> (i32, i32) {
    %c0_i32 = arith.constant 0 : i32
    %c0_i32_0 = arith.constant 0 : i32
    %c0_i32_1 = arith.constant 0 : i32
    return %c0_i32, %c0_i32_0 : i32, i32
  }
  func.func @transform_7(%arg0: i32) -> (i32, i32) {
    %c0_i32 = arith.constant 0 : i32
    %c0_i32_0 = arith.constant 0 : i32
    %c0_i32_1 = arith.constant 0 : i32
    return %c0_i32, %c0_i32_0 : i32, i32
  }
  func.func @transform_8(%arg0: i32) -> (i32, i32, i32) {
    %c0_i32 = arith.constant 0 : i32
    %c0_i32_0 = arith.constant 0 : i32
    %c0_i32_1 = arith.constant 0 : i32
    %c0_i32_2 = arith.constant 0 : i32
    return %c0_i32, %c0_i32_0, %c0_i32_1 : i32, i32, i32
  }
  func.func @transform_9(%arg0: i32) -> (i32, i32, i32) {
    %c0_i32 = arith.constant 0 : i32
    %c0_i32_0 = arith.constant 0 : i32
    %c0_i32_1 = arith.constant 0 : i32
    %c0_i32_2 = arith.constant 0 : i32
    return %c0_i32, %c0_i32_0, %c0_i32_1 : i32, i32, i32
  }
  func.func @transform_10(%arg0: i32) -> (i32, i32, i32) {
    %c0_i32 = arith.constant 0 : i32
    %c0_i32_0 = arith.constant 0 : i32
    %c0_i32_1 = arith.constant 0 : i32
    %c0_i32_2 = arith.constant 0 : i32
    return %c0_i32, %c0_i32_0, %c0_i32_1 : i32, i32, i32
  }
  func.func @transform_11(%arg0: i32) -> (i32, i32, i32) {
    %c0_i32 = arith.constant 0 : i32
    %c0_i32_0 = arith.constant 0 : i32
    %c0_i32_1 = arith.constant 0 : i32
    %c0_i32_2 = arith.constant 0 : i32
    return %c0_i32, %c0_i32_0, %c0_i32_1 : i32, i32, i32
  }
  func.func @transform_12(%arg0: i32) -> (i32, i32, i32) {
    %c0_i32 = arith.constant 0 : i32
    %c0_i32_0 = arith.constant 0 : i32
    %c0_i32_1 = arith.constant 0 : i32
    %c0_i32_2 = arith.constant 0 : i32
    return %c0_i32, %c0_i32_0, %c0_i32_1 : i32, i32, i32
  }
  func.func @transform_13(%arg0: i32) -> (i32, i32, i32) {
    %c0_i32 = arith.constant 0 : i32
    %c0_i32_0 = arith.constant 0 : i32
    %c0_i32_1 = arith.constant 0 : i32
    %c0_i32_2 = arith.constant 0 : i32
    return %c0_i32, %c0_i32_0, %c0_i32_1 : i32, i32, i32
  }
  func.func @transform_14(%arg0: i32) -> (i32, i32, i32) {
    %c0_i32 = arith.constant 0 : i32
    %c0_i32_0 = arith.constant 0 : i32
    %c0_i32_1 = arith.constant 0 : i32
    %c0_i32_2 = arith.constant 0 : i32
    return %c0_i32, %c0_i32_0, %c0_i32_1 : i32, i32, i32
  }
  func.func @transform_15(%arg0: i32) -> (i32, i32, i32) {
    %c0_i32 = arith.constant 0 : i32
    %c0_i32_0 = arith.constant 0 : i32
    %c0_i32_1 = arith.constant 0 : i32
    %c0_i32_2 = arith.constant 0 : i32
    return %c0_i32, %c0_i32_0, %c0_i32_1 : i32, i32, i32
  }
  func.func @transform_16(%arg0: i32) -> (i32, i32, i32) {
    %c0_i32 = arith.constant 0 : i32
    %c0_i32_0 = arith.constant 0 : i32
    %c0_i32_1 = arith.constant 0 : i32
    %c0_i32_2 = arith.constant 0 : i32
    return %c0_i32, %c0_i32_0, %c0_i32_1 : i32, i32, i32
  }
  func.func @transform_17(%arg0: i32) -> (i32, i32, i32) {
    %c0_i32 = arith.constant 0 : i32
    %c0_i32_0 = arith.constant 0 : i32
    %c0_i32_1 = arith.constant 0 : i32
    %c0_i32_2 = arith.constant 0 : i32
    return %c0_i32, %c0_i32_0, %c0_i32_1 : i32, i32, i32
  }
  func.func @transform_18(%arg0: i32) -> (i32, i32, i32) {
    %c0_i32 = arith.constant 0 : i32
    %c0_i32_0 = arith.constant 0 : i32
    %c0_i32_1 = arith.constant 0 : i32
    %c0_i32_2 = arith.constant 0 : i32
    return %c0_i32, %c0_i32_0, %c0_i32_1 : i32, i32, i32
  }
  func.func @transform_19(%arg0: i32) -> (i32, i32) {
    %c0_i32 = arith.constant 0 : i32
    %c0_i32_0 = arith.constant 0 : i32
    %c0_i32_1 = arith.constant 0 : i32
    return %c0_i32, %c0_i32_0 : i32, i32
  }
  func.func @transform_20(%arg0: i32) -> (i32, i32) {
    %c0_i32 = arith.constant 0 : i32
    %c0_i32_0 = arith.constant 0 : i32
    %c0_i32_1 = arith.constant 0 : i32
    return %c0_i32, %c0_i32_0 : i32, i32
  }
  func.func @transform_21(%arg0: i32) -> (i32, i32) {
    %c0_i32 = arith.constant 0 : i32
    %c0_i32_0 = arith.constant 0 : i32
    %c0_i32_1 = arith.constant 0 : i32
    return %c0_i32, %c0_i32_0 : i32, i32
  }
  func.func @transform_22(%arg0: i32) -> (i32, i32) {
    %c0_i32 = arith.constant 0 : i32
    %c0_i32_0 = arith.constant 0 : i32
    %c0_i32_1 = arith.constant 0 : i32
    return %c0_i32, %c0_i32_0 : i32, i32
  }
  func.func @transform_23(%arg0: i32) -> (i32, i32) {
    %c0_i32 = arith.constant 0 : i32
    %c0_i32_0 = arith.constant 0 : i32
    %c0_i32_1 = arith.constant 0 : i32
    return %c0_i32, %c0_i32_0 : i32, i32
  }
}

</mosaic_0001>

<bundles_post_ra>
// kernel: tile.9
= control target key start
LH: loop header
LB: loop body
LE: loop exit
PB: predicated region body
PF: predicated region fallthrough
CT: control target
= control target key end

     0   :  { %vm3_vm0 = vcmask 261120   ;;  %s11_s6 = smov 3  ;;  %s74_s0 = inlined_call_operand.vmem [shape: f32[2,17,32], index: 0, kind: input, shape index: {}]   ;;  %s75_s1 = inlined_call_operand.vmem [shape: f32[34,32], index: 1, kind: output, shape index: {}]  }
   0x1   :  { %v2_v0 = vld [vmem:[%s74_s0] sm:$0xff]   ;;  %v26_v1 = vld [vmem:[%s74_s0 + $0x8] sm:$0xff]  }
   0x2   :  { %v28_v2 = vld [vmem:[%s74_s0 + $0x10] ss:$8 sm:%s11_s6]   ;;  %4 = vst.msk [vmem:[%s75_s1] sm:$0xff] %vm3_vm0, %v2_v0   ;;  %27 = vst.msk [vmem:[%s75_s1 + $0x8] sm:$0xff] %vm3_vm0, %v26_v1  }
   0x3   :  { %29 = vst.msk [vmem:[%s75_s1 + $0x10] sm:$0x3] %vm3_vm0, %v28_v2   ;;  %v30_v3 = vld [vmem:[%s74_s0 + $0x19] sm:$0xff]   ;;  %v32_v4 = vld [vmem:[%s74_s0 + $0x21] sm:$0xff]  }
   0x4   :  { %31 = vst.msk [vmem:[%s75_s1 + $0x12] sm:$0xff] %vm3_vm0, %v30_v3   ;;  %33 = vst.msk [vmem:[%s75_s1 + $0x1a] sm:$0xff] %vm3_vm0, %v32_v4  }

// kernel: vit_forward.1
= control target key start
LH: loop header
LB: loop body
LE: loop exit
PB: predicated region body
PF: predicated region fallthrough
CT: control target
= control target key end

     0   :  { %s6717_s0 = inlined_call_operand.vmem [shape: f32[34,64], index: 0, kind: input, shape index: {}]   ;;  %s6718_s1 = inlined_call_operand.vmem [shape: f32[34,32], index: 1, kind: input, shape index: {}]   ;;  %s6719_s2 = inlined_call_operand.vmem [shape: bf16[64,32], index: 2, kind: input, shape index: {}]   ;;  %s6720_s3 = inlined_call_operand.vmem [shape: f32[136,34], index: 3, kind: input, shape index: {}]   ;;  %s6721_s4 = inlined_call_operand.vmem [shape: f32[34,136], index: 4, kind: input, shape index: {}]   ;;  %s6722_s5 = inlined_call_operand.vmem [shape: f32[136,32], index: 5, kind: input, shape index: {}]   ;;  %s6723_s6 = inlined_call_operand.vmem [shape: f32[136,34], index: 6, kind: input, shape index: {}]   ;;  %s6724_s7 = inlined_call_operand.vmem [shape: f32[2,34], index: 7, kind: input, shape index: {}]   ;;  %s6725_s8 = inlined_call_operand.vmem [shape: f32[2,1,32], index: 8, kind: input, shape index: {}]   ;;  %s6726_s9 = inlined_call_operand.vmem [shape: f32[2,1,32], index: 9, kind: input, shape index: {}]   ;;  %s6727_s10 = inlined_call_operand.vmem [shape: bf16[2,32,32], index: 10, kind: input, shape index: {}]   ;;  %s6728_s11 = inlined_call_operand.vmem [shape: bf16[2,32,32], index: 11, kind: input, shape index: {}]   ;;  %s6729_s12 = inlined_call_operand.vmem [shape: bf16[2,32,32], index: 12, kind: input, shape index: {}]   ;;  %s6730_s13 = inlined_call_operand.vmem [shape: bf16[2,32,32], index: 13, kind: input, shape index: {}]   ;;  %s6731_s14 = inlined_call_operand.vmem [shape: f32[2,1,32], index: 14, kind: input, shape index: {}]   ;;  %s6732_s15 = inlined_call_operand.vmem [shape: bf16[2,32,128], index: 15, kind: input, shape index: {}]   ;;  %s6733_s16 = inlined_call_operand.vmem [shape: f32[2,1,128], index: 16, kind: input, shape index: {}]   ;;  %s6734_s17 = inlined_call_operand.vmem [shape: bf16[2,128,32], index: 17, kind: input, shape index: {}]   ;;  %s6735_s18 = inlined_call_operand.vmem [shape: f32[2,1,32], index: 18, kind: input, shape index: {}]   ;;  %s6736_s19 = inlined_call_operand.vmem [shape: f32[1,32], index: 19, kind: input, shape index: {}]   ;;  %s6737_s20 = inlined_call_operand.vmem [shape: f32[1,32], index: 20, kind: input, shape index: {}]   ;;  %s6738_s21 = inlined_call_operand.vmem [shape: bf16[32,10], index: 21, kind: input, shape index: {}]   ;;  %s6739_s22 = inlined_call_operand.vmem [shape: f32[1,10], index: 22, kind: input, shape index: {}]   ;;  %s6740_s23 = inlined_call_operand.hbm [shape: f32[2,10], index: 23, kind: output, shape index: {}]  }
   0x1   :  { %6748 = sst [smem:[#allocation5_spill]] %s6717_s0 }
   0x2   :  { %6749 = sst [smem:[#allocation6_spill]] %s6718_s1 }
   0x3   :  { %6750 = sst [smem:[#allocation7_spill]] %s6719_s2 }
   0x4   :  { %6751 = sst [smem:[#allocation8_spill]] %s6720_s3 }
   0x5   :  { %6752 = sst [smem:[#allocation9_spill]] %s6721_s4 }
   0x6   :  { %6753 = sst [smem:[#allocation10_spill]] %s6722_s5 }
   0x7   :  { %6754 = sst [smem:[#allocation11_spill]] %s6723_s6 }
   0x8   :  { %6755 = sst [smem:[#allocation12_spill]] %s6724_s7 }
   0x9   :  { %s6756_s24 = sld [smem:[#allocation7_spill]]  ;;  %v4907_v1 = vmov 0.0   ;;  %vm4908_vm0 = vmmov 0   ;;  %vm182_vm1 = vcmask 523264  }
   0xa   :  { %4022 = vmatprep.subr.bf16.mxu0 %v4907_v1  ;;  %4042 = vmatprep.subr.bf16.mxu1 %v4907_v1  ;;  %s6757_s28 = sld [smem:[#allocation5_spill]] }
   0xb   :  { %4030 = vmatprep.mubr.msk.bf16.mxu0 %vm4908_vm0, %v4907_v1  ;;  %4046 = vmatprep.mubr.msk.bf16.mxu1 %vm4908_vm0, %v4907_v1 }
   0xf   :  { %v4572_v0 = vld [vmem:[%s6756_s24 + $0x18] sm:$0xff]   ;;  %v4573_v2 = vld [vmem:[%s6756_s24 + $0x10] sm:$0xff]   ;;  %v4574_v3 = vld [vmem:[%s6756_s24 + $0x8] sm:$0xff]  }
  0x10   :  { %4023 = vmatpush3.bf16.msra.mxu0 %v4572_v0  ;;  %v4575_v4 = vld [vmem:[%s6756_s24] sm:$0xff]   ;;  %v143_v6 = vld [vmem:[%s6757_s28 + $0x8] sm:$0xff]  ;;  %v144_v8 = vld [vmem:[%s6757_s28 + $0x10] sm:$0xff] }
  0x11   :  { %4024 = vmatprep.subr.bf16.mxu0 %v4907_v1  ;;  %v142_v5 = vld [vmem:[%s6757_s28] sm:$0xff]  ;;  %v145_v9 = vld [vmem:[%s6757_s28 + $0x18] sm:$0xff] }
  0x12   :  { %v147_v7 = vpack.c.bf16 %v143_v6, %v142_v5  ;;  %v148_v10 = vpack.c.bf16 %v145_v9, %v144_v8  ;;  %v146_v11 = vld [vmem:[%s6757_s28 + $0x20] sm:$0x3] }
  0x13   :  { %v149_v12 = vpack.c.bf16 %v146_v11, %v146_v11 }
  0x14   :  { %4025 = vmatpush3.bf16.msra.mxu0 %v4573_v2 }
  0x15   :  { %4026 = vmatprep.subr.bf16.mxu0 %v4907_v1 }
  0x18   :  { %4027 = vmatpush3.bf16.msra.mxu0 %v4574_v3 }
  0x19   :  { %4028 = vmatprep.subr.bf16.mxu0 %v4907_v1 }
  0x1c   :  { %4029 = vmatpush3.bf16.msra.mxu0 %v4575_v4 }
  0x1d   :  { %4074 = vmatprep.subr.bf16.mxu0 %v4907_v1 }
  0x1f   :  { %4031 = vmatmul.mubr.msk.bf16.vlgmr.msra.gmra.mxu0 %vm182_vm1, %v147_v7 }
  0x20   :  { %4034 = vmatprep.mubr.msk.bf16.mxu0 %vm4908_vm0, %v4907_v1 }
  0x27   :  { %4035 = vmatmul.mubr.msk.bf16.gmra.mxu0 %vm182_vm1, %v148_v10 }
  0x28   :  { %4038 = vmatprep.mubr.msk.bf16.mxu0 %vm4908_vm0, %v4907_v1 }
  0x29   :  { %28 = vsyncpa [#allocation3], 0  ;;  %s6758_s2 = sld [smem:[#allocation6_spill]]  ;;  %vm255_vm2 = vcmask 261120   ;;  %vm268_vm3 = vcmask 254976   ;;  %v4576_v2 = vld [vmem:[%s6727_s10 + $0x8] sm:$0xff]  }
  0x2a   :  { %v4577_v3 = vld [vmem:[%s6729_s12 + $0x8] sm:$0xff]   ;;  %4043 = vmatpush3.bf16.msra.mxu1 %v4576_v2  ;;  %v4578_v4 = vld [vmem:[%s6727_s10] sm:$0xff]   ;;  %vm625_vm4 = vcmask 1041408   ;;  %vm1174_vm5 = vcmask 1040384   ;;  %s6759_s5 = sld [smem:[#allocation8_spill]]  ;;  %vm573_vm6 = vcmask 277504  }
  0x2b   :  { %4075 = vmatpush3.bf16.msra.mxu0 %v4577_v3  ;;  %v4579_v5 = vld [vmem:[%s6729_s12] sm:$0xff]   ;;  %4044 = vmatprep.subr.bf16.mxu1 %v4907_v1  ;;  %s6760_s28 = sld [smem:[#allocation10_spill]]  ;;  %vm1299_vm7 = vcmask 64512   ;;  %vm3612_vm8 = vcmask 74752  }
  0x2c   :  { %4076 = vmatprep.subr.bf16.mxu0 %v4907_v1  ;;  %s6761_s26 = sld [smem:[#allocation11_spill]] }
  0x2d   :  { %s6762_s25 = sld [smem:[#allocation9_spill]] }
  0x2e   :  { %4045 = vmatpush3.bf16.msra.mxu1 %v4578_v4 }
  0x2f   :  { %4039 = vmatmul.mubr.msk.bf16.gmra.mxu0 %vm182_vm1, %v149_v12  ;;  %v137_v13 = vld [vmem:[%s6758_s2] sm:$0xff]  ;;  %v138_v17 = vld [vmem:[%s6758_s2 + $0x8] sm:$0xff]  ;;  %v139_v22 = vld [vmem:[%s6758_s2 + $0x10] sm:$0xff]  ;;  %4058 = vmatprep.subr.bf16.mxu1 %v4907_v1 }
  0x30   :  { %4078 = vmatprep.mubr.msk.bf16.mxu0 %vm4908_vm0, %v4907_v1  ;;  %v140_v27 = vld [vmem:[%s6758_s2 + $0x18] sm:$0xff]  ;;  %v141_v32 = vld [vmem:[%s6758_s2 + $0x20] sm:$0x3]  ;;  %4077 = vmatpush3.bf16.msra.mxu0 %v4579_v5 }
  0x31   :  { %4151 = vmatprep.subr.bf16.mxu0 %v4907_v1 }
  0xdf   :  { %v226_v14 = vpop.f32.mrf.mxu0 }
  0xe0   :  { %v5079_v15 = vadd.f32 %v226_v14, %v137_v13 }
  0xe1   :  { %v4032_v16 = vpop.f32.mrf.mxu0 }
  0xe2   :  { %v256_v18 = vsel %vm255_vm2, %v5079_v15, 0.0 }
  0xe3   :  { %v229_v19 = vpop.f32.mrf.mxu0  ;;  %257 = vadd.xlane.f32.xlu0 %v256_v18 }
  0xe4   :  { %v5086_v20 = vadd.f32 %v229_v19, %v138_v17 }
  0xe5   :  { %v4033_v21 = vpop.f32.mrf.mxu0 }
  0xe6   :  { %v259_v23 = vsel %vm255_vm2, %v5086_v20, 0.0 }
  0xe7   :  { %v234_v24 = vpop.f32.mrf.mxu0  ;;  %260 = vadd.xlane.f32.xlu0 %v259_v23 }
  0xe8   :  { %v5093_v25 = vadd.f32 %v234_v24, %v139_v22 }
  0xe9   :  { %v4036_v26 = vpop.f32.mrf.mxu0 }
  0xea   :  { %v262_v28 = vsel %vm255_vm2, %v5093_v25, 0.0  ;;  %v3635_v26 = vld [vmem:[%s6725_s8] ss:$0 sm:$0xff] }
  0xeb   :  { %v237_v29 = vpop.f32.mrf.mxu0  ;;  %263 = vadd.xlane.f32.xlu1 %v262_v28 }
  0xec   :  { %v5100_v30 = vadd.f32 %v237_v29, %v140_v27 }
  0xed   :  { %v4037_v31 = vpop.f32.mrf.mxu0 }
  0xee   :  { %v265_v33 = vsel %vm255_vm2, %v5100_v30, 0.0  ;;  %v3636_v31 = vld [vmem:[%s6726_s9] ss:$0 sm:$0xff] }
  0xef   :  { %v242_v34 = vpop.f32.mrf.mxu0  ;;  %266 = vadd.xlane.f32.xlu1 %v265_v33 }
  0xf0   :  { %v5107_v35 = vadd.f32 %v242_v34, %v141_v32 }
  0xf1   :  { %v4040_v36 = vpop.f32.mrf.mxu0 }
  0xf2   :  { %v269_v37 = vsel %vm268_vm3, %v5107_v35, 0.0 }
  0xf3   :  { %v245_v38 = vpop.f32.mrf.mxu0  ;;  %270 = vadd.xlane.f32.xlu0 %v269_v37 }
  0xf5   :  { %v4041_v39 = vpop.f32.mrf.mxu0 }
  0xf6   :  { %v4580_v39 = vld [vmem:[%s6728_s11 + $0x8] sm:$0xff]  }
 0x16c   :  { %v258_v40 = vpop.xlane.xlu0 %257 }
 0x16d   :  { %v273_v41 = vmul.f32 0.03125, %v258_v40 }
 0x16f   :  { %v278_v42 = vsub.f32 %v5079_v15, %v273_v41 }
 0x170   :  { %v261_v43 = vpop.xlane.xlu0 %260 }
 0x171   :  { %v274_v44 = vmul.f32 0.03125, %v261_v43  ;;  %v283_v45 = vmul.f32 %v278_v42, %v278_v42 }
 0x173   :  { %v279_v46 = vsub.f32 %v5086_v20, %v274_v44  ;;  %v288_v47 = vsel %vm255_vm2, %v283_v45, 0.0  ;;  %v4581_v44 = vld [vmem:[%s6728_s11] sm:$0xff]  }
 0x174   :  { %v264_v48 = vpop.xlane.xlu1 %263  ;;  %289 = vadd.xlane.f32.xlu1 %v288_v47 }
 0x175   :  { %v275_v49 = vmul.f32 0.03125, %v264_v48  ;;  %v284_v50 = vmul.f32 %v279_v46, %v279_v46 }
 0x177   :  { %v280_v51 = vsub.f32 %v5093_v25, %v275_v49  ;;  %v291_v52 = vsel %vm255_vm2, %v284_v50, 0.0 }
 0x178   :  { %v267_v53 = vpop.xlane.xlu1 %266  ;;  %292 = vadd.xlane.f32.xlu0 %v291_v52 }
 0x179   :  { %v276_v54 = vmul.f32 0.03125, %v267_v53  ;;  %v285_v55 = vmul.f32 %v280_v51, %v280_v51 }
 0x17b   :  { %v281_v56 = vsub.f32 %v5100_v30, %v276_v54  ;;  %v294_v57 = vsel %vm255_vm2, %v285_v55, 0.0 }
 0x17c   :  { %295 = vadd.xlane.f32.xlu1 %v294_v57  ;;  %v271_v58 = vpop.xlane.xlu0 %270 }
 0x17d   :  { %v277_v59 = vmul.f32 0.03125, %v271_v58  ;;  %v286_v60 = vmul.f32 %v281_v56, %v281_v56 }
 0x17f   :  { %v5119_v61 = vsub.f32 %v5107_v35, %v277_v59  ;;  %v297_v62 = vsel %vm255_vm2, %v286_v60, 0.0 }
 0x180   :  { %298 = vadd.xlane.f32.xlu0 %v297_v62 }
 0x181   :  { %v287_v63 = vmul.f32 %v5119_v61, %v5119_v61 }
 0x183   :  { %v300_v0 = vsel %vm268_vm3, %v287_v63, 0.0 }
 0x184   :  { %301 = vadd.xlane.f32.xlu1 %v300_v0 }
 0x1fd   :  { %v290_v6 = vpop.xlane.xlu1 %289 }
 0x1fe   :  { %v303_v7 = vmul.f32 0.03125, %v290_v6 }
 0x200   :  { %v308_v8 = vadd.f32 1e-05, %v303_v7 }
 0x201   :  { %v293_v9 = vpop.xlane.xlu0 %292 }
 0x202   :  { %4614 = vrsqrt.f32 %v308_v8  ;;  %v304_v10 = vmul.f32 0.03125, %v293_v9 }
 0x204   :  { %v309_v11 = vadd.f32 1e-05, %v304_v10 }
 0x205   :  { %v296_v12 = vpop.xlane.xlu1 %295 }
 0x206   :  { %4616 = vrsqrt.f32 %v309_v11  ;;  %v305_v13 = vmul.f32 0.03125, %v296_v12 }
 0x208   :  { %v310_v14 = vadd.f32 1e-05, %v305_v13 }
 0x209   :  { %v299_v16 = vpop.xlane.xlu0 %298 }
 0x20a   :  { %4618 = vrsqrt.f32 %v310_v14  ;;  %v306_v17 = vmul.f32 0.03125, %v299_v16  ;;  %v76_v16 = vld [vmem:[%s6759_s5] sm:$0xff] }
 0x20c   :  { %v311_v18 = vadd.f32 1e-05, %v306_v17 }
 0x20d   :  { %v302_v19 = vpop.xlane.xlu1 %301 }
 0x20e   :  { %4620 = vrsqrt.f32 %v311_v18  ;;  %v307_v21 = vmul.f32 0.03125, %v302_v19 }
 0x20f   :  { %v4615_v22 = vpop.eup %4614 }
 0x210   :  { %v312_v23 = vadd.f32 1e-05, %v307_v21  ;;  %v318_v24 = vmul.f32 %v4615_v22, %v278_v42  ;;  %v77_v21 = vld [vmem:[%s6759_s5 + $0x8] sm:$0xff] }
 0x212   :  { %4622 = vrsqrt.f32 %v312_v23  ;;  %v329_v29 = vmul.f32 %v3635_v26, %v318_v24 }
 0x213   :  { %v4617_v27 = vpop.eup %4616 }
 0x214   :  { %v319_v28 = vmul.f32 %v4617_v27, %v279_v46  ;;  %v340_v34 = vadd.f32 %v3636_v31, %v329_v29 }
 0x216   :  { %v330_v32 = vmul.f32 %v3635_v26, %v319_v28 }
 0x217   :  { %v4619_v33 = vpop.eup %4618 }
 0x218   :  { %v341_v36 = vadd.f32 %v3636_v31, %v330_v32  ;;  %v320_v37 = vmul.f32 %v4619_v33, %v280_v51 }
 0x21a   :  { %v345_v38 = vpack.c.bf16 %v341_v36, %v340_v34  ;;  %v331_v42 = vmul.f32 %v3635_v26, %v320_v37  ;;  %v80_v34 = vld [vmem:[%s6759_s5 + $0x20] sm:$0xff] }
 0x21b   :  { %v4621_v40 = vpop.eup %4620 }
 0x21c   :  { %4047 = vmatmul.mubr.msk.bf16.vlgmr.msra.gmra.mxu1 %vm255_vm2, %v345_v38  ;;  %4079 = vmatmul.mubr.msk.bf16.vlgmr.msra.gmra.mxu0 %vm255_vm2, %v345_v38  ;;  %v321_v41 = vmul.f32 %v4621_v40, %v281_v56  ;;  %v342_v46 = vadd.f32 %v3636_v31, %v331_v42  ;;  %v81_v40 = vld [vmem:[%s6759_s5 + $0x28] sm:$0xff] }
 0x21d   :  { %4050 = vmatprep.mubr.msk.bf16.mxu1 %vm4908_vm0, %v4907_v1  ;;  %4082 = vmatprep.mubr.msk.bf16.mxu0 %vm4908_vm0, %v4907_v1 }
 0x21e   :  { %v332_v43 = vmul.f32 %v3635_v26, %v321_v41  ;;  %4059 = vmatpush3.bf16.msra.mxu1 %v4580_v39 }
 0x21f   :  { %v4623_v45 = vpop.eup %4622  ;;  %4060 = vmatprep.subr.bf16.mxu1 %v4907_v1 }
 0x220   :  { %v343_v47 = vadd.f32 %v3636_v31, %v332_v43  ;;  %v322_v48 = vmul.f32 %v4623_v45, %v5119_v61 }
 0x222   :  { %v346_v49 = vpack.c.bf16 %v343_v47, %v342_v46  ;;  %v333_v50 = vmul.f32 %v3635_v26, %v322_v48  ;;  %4061 = vmatpush3.bf16.msra.mxu1 %v4581_v44  ;;  %v78_v26 = vld [vmem:[%s6759_s5 + $0x10] sm:$0xff]  ;;  %v83_v46 = vld [vmem:[%s6759_s5 + $0x38] sm:$0xff]  ;;  %v84_v48 = vld [vmem:[%s6759_s5 + $0x40] sm:$0xff] }
 0x223   :  { %4090 = vmatprep.subr.mxu1 %v4907_v1  ;;  %v82_v44 = vld [vmem:[%s6759_s5 + $0x30] sm:$0xff] }
 0x224   :  { %4051 = vmatmul.mubr.msk.bf16.gmra.mxu1 %vm255_vm2, %v346_v49  ;;  %4083 = vmatmul.mubr.msk.bf16.gmra.mxu0 %vm255_vm2, %v346_v49  ;;  %v344_v51 = vadd.f32 %v3636_v31, %v333_v50  ;;  %v79_v31 = vld [vmem:[%s6759_s5 + $0x18] sm:$0xff]  ;;  %v85_v50 = vld [vmem:[%s6759_s5 + $0x48] sm:$0xff] }
 0x225   :  { %4054 = vmatprep.mubr.msk.bf16.mxu1 %vm4908_vm0, %v4907_v1  ;;  %4086 = vmatprep.mubr.msk.bf16.mxu0 %vm4908_vm0, %v4907_v1 }
 0x226   :  { %v347_v52 = vpack.c.bf16 %v344_v51, %v344_v51  ;;  %v86_v51 = vld [vmem:[%s6759_s5 + $0x50] sm:$0xff] }
 0x22c   :  { %4055 = vmatmul.mubr.msk.bf16.gmra.mxu1 %vm255_vm2, %v347_v52  ;;  %4087 = vmatmul.mubr.msk.bf16.gmra.mxu0 %vm255_vm2, %v347_v52 }
 0x22d   :  { %4062 = vmatprep.mubr.msk.bf16.mxu1 %vm4908_vm0, %v4907_v1  ;;  %4157 = vmatprep.mubr.msk.bf16.mxu0 %vm4908_vm0, %v4907_v1 }
 0x234   :  { %4063 = vmatmul.mubr.msk.bf16.vlgmr.msra.gmra.mxu1 %vm255_vm2, %v345_v38 }
 0x235   :  { %4066 = vmatprep.mubr.msk.bf16.mxu1 %vm4908_vm0, %v4907_v1 }
 0x23c   :  { %4067 = vmatmul.mubr.msk.bf16.gmra.mxu1 %vm255_vm2, %v346_v49 }
 0x23d   :  { %4070 = vmatprep.mubr.msk.bf16.mxu1 %vm4908_vm0, %v4907_v1 }
 0x244   :  { %4071 = vmatmul.mubr.msk.bf16.gmra.mxu1 %vm255_vm2, %v347_v52  ;;  %v87_v52 = vld [vmem:[%s6759_s5 + $0x58] sm:$0xff] }
 0x245   :  { %4100 = vmatprep.mubr.msk.f32.mxu1 %vm4908_vm0, %v4907_v1 }
 0x2dc   :  { %v407_v53 = vpop.f32.mrf.mxu1  ;;  %v551_v54 = vpop.f32.mrf.mxu0 }
 0x2de   :  { %v4048_v55 = vpop.f32.mrf.mxu1  ;;  %v4080_v56 = vpop.f32.mrf.mxu0 }
 0x2df   :  { %v90_v55 = vld [vmem:[%s6759_s5 + $0x70] sm:$0xff]  ;;  %v91_v56 = vld [vmem:[%s6759_s5 + $0x78] sm:$0xff] }
 0x2e0   :  { %v410_v57 = vpop.f32.mrf.mxu1  ;;  %v554_v58 = vpop.f32.mrf.mxu0 }
 0x2e1   :  { %v1144_v28 = vpack.c.bf16 %v554_v58, %v551_v54  ;;  %v89_v54 = vld [vmem:[%s6759_s5 + $0x68] sm:$0xff] }
 0x2e2   :  { %v4049_v59 = vpop.f32.mrf.mxu1  ;;  %v4081_v60 = vpop.f32.mrf.mxu0 }
 0x2e3   :  { %v5304_v59 = vld [vmem:[%s6760_s28] sm:$0xff] }
 0x2e4   :  { %v415_v61 = vpop.f32.mrf.mxu1  ;;  %v559_v62 = vpop.f32.mrf.mxu0 }
 0x2e6   :  { %v4052_v63 = vpop.f32.mrf.mxu1  ;;  %v4084_v0 = vpop.f32.mrf.mxu0 }
 0x2e8   :  { %v418_v2 = vpop.f32.mrf.mxu1  ;;  %v562_v3 = vpop.f32.mrf.mxu0 }
 0x2e9   :  { %v1145_v23 = vpack.c.bf16 %v562_v3, %v559_v62 }
 0x2ea   :  { %v4053_v4 = vpop.f32.mrf.mxu1  ;;  %v4085_v5 = vpop.f32.mrf.mxu0 }
 0x2eb   :  { %v5316_v4 = vld [vmem:[%s6760_s28 + $0x10] sm:$0xff] }
 0x2ec   :  { %v423_v6 = vpop.f32.mrf.mxu1  ;;  %v567_v7 = vpop.f32.mrf.mxu0 }
 0x2ed   :  { %4091 = vmatpush3.msk.msra.mxu1 %vm625_vm4, %v423_v6  ;;  %v1146_v12 = vpack.c.bf16 %v567_v7, %v567_v7  ;;  %v5322_v7 = vld [vmem:[%s6760_s28 + $0x18] sm:$0xff] }
 0x2ee   :  { %v4056_v8 = vpop.f32.mrf.mxu1  ;;  %v4088_v9 = vpop.f32.mrf.mxu0  ;;  %4092 = vmatprep.subr.mxu1 %v4907_v1 }
 0x2ef   :  { %4093 = vmatpush3.msra.mxu1 %v418_v2  ;;  %v1176_v18 = vsel %vm1174_vm5, %v1146_v12, 0 }
 0x2f0   :  { %v426_v10 = vpop.f32.mrf.mxu1  ;;  %v570_v11 = vpop.f32.mrf.mxu0  ;;  %4094 = vmatprep.subr.mxu1 %v4907_v1 }
 0x2f1   :  { %4095 = vmatpush3.msra.mxu1 %v415_v61  ;;  %v5309_v61 = vld [vmem:[%s6760_s28 + $0x8] sm:$0xff] }
 0x2f2   :  { %v4057_v13 = vpop.f32.mrf.mxu1  ;;  %v4089_v14 = vpop.f32.mrf.mxu0  ;;  %4096 = vmatprep.subr.mxu1 %v4907_v1 }
 0x2f3   :  { %4097 = vmatpush3.msra.mxu1 %v410_v57  ;;  %v92_v57 = vld [vmem:[%s6759_s5 + $0x80] sm:$0xff] }
 0x2f4   :  { %v479_v17 = vpop.f32.mrf.mxu1  ;;  %4098 = vmatprep.subr.mxu1 %v4907_v1  ;;  %v5331_v13 = vld [vmem:[%s6760_s28 + $0x20] sm:$0xff] }
 0x2f5   :  { %4099 = vmatpush3.msra.mxu1 %v407_v53  ;;  %v88_v53 = vld [vmem:[%s6759_s5 + $0x60] sm:$0xff] }
 0x2f6   :  { %v4064_v19 = vpop.f32.mrf.mxu1  ;;  %4101 = vmatmul.mubr.msk.f32.vlgmr.msra.gmra.mxu1 %vm573_vm6, %v76_v16  ;;  %4193 = vmatprep.subr.bf16.mxu1 %v4907_v1 }
 0x2f7   :  { %4194 = vmatpush3.bf16.msra.mxu1 %v1176_v18  ;;  %4103 = vmatprep.mubr.msk.f32.mxu1 %vm4908_vm0, %v4907_v1 }
 0x2f8   :  { %v482_v22 = vpop.f32.mrf.mxu1  ;;  %4195 = vmatprep.subr.bf16.mxu1 %v4907_v1 }
 0x2f9   :  { %v805_v47 = vpack.c.bf16 %v482_v22, %v479_v17  ;;  %v5337_v17 = vld [vmem:[%s6760_s28 + $0x28] sm:$0xff] }
 0x2fa   :  { %v4065_v24 = vpop.f32.mrf.mxu1  ;;  %4104 = vmatmul.mubr.msk.f32.gmra.mxu1 %vm573_vm6, %v77_v21 }
 0x2fb   :  { %4196 = vmatpush3.bf16.msra.mxu1 %v1145_v23  ;;  %4106 = vmatprep.mubr.msk.f32.mxu1 %vm4908_vm0, %v4907_v1  ;;  %v836_v49 = vsel %vm255_vm2, %v805_v47, 0  ;;  %v5346_v24 = vld [vmem:[%s6760_s28 + $0x30] sm:$0xff] }
 0x2fc   :  { %v487_v27 = vpop.f32.mrf.mxu1  ;;  %4197 = vmatprep.subr.bf16.mxu1 %v4907_v1 }
 0x2fe   :  { %v4068_v29 = vpop.f32.mrf.mxu1  ;;  %4107 = vmatmul.mubr.msk.f32.gmra.mxu1 %vm573_vm6, %v78_v26 }
 0x2ff   :  { %4198 = vmatpush3.bf16.msra.mxu1 %v1144_v28  ;;  %4109 = vmatprep.mubr.msk.f32.mxu1 %vm4908_vm0, %v4907_v1  ;;  %v5352_v28 = vld [vmem:[%s6760_s28 + $0x38] sm:$0xff] }
 0x300   :  { %v490_v32 = vpop.f32.mrf.mxu1  ;;  %4267 = vmatprep.subr.bf16.mxu1 %v4907_v1 }
 0x301   :  { %v806_v43 = vpack.c.bf16 %v490_v32, %v487_v27 }
 0x302   :  { %v4069_v33 = vpop.f32.mrf.mxu1  ;;  %4110 = vmatmul.mubr.msk.f32.gmra.mxu1 %vm573_vm6, %v79_v31 }
 0x303   :  { %4112 = vmatprep.mubr.msk.f32.mxu1 %vm4908_vm0, %v4907_v1  ;;  %v839_v45 = vsel %vm255_vm2, %v806_v43, 0 }
 0x304   :  { %v495_v36 = vpop.f32.mrf.mxu1 }
 0x305   :  { %v807_v37 = vpack.c.bf16 %v495_v36, %v495_v36  ;;  %v5361_v36 = vld [vmem:[%s6760_s28 + $0x40] sm:$0xff] }
 0x306   :  { %v4072_v38 = vpop.f32.mrf.mxu1  ;;  %4113 = vmatmul.mubr.msk.f32.gmra.mxu1 %vm573_vm6, %v80_v34 }
 0x307   :  { %v842_v39 = vsel %vm255_vm2, %v807_v37, 0  ;;  %4115 = vmatprep.mubr.msk.f32.mxu1 %vm4908_vm0, %v4907_v1 }
 0x308   :  { %v498_v41 = vpop.f32.mrf.mxu1  ;;  %4152 = vmatpush3.bf16.xpose.msra.mxu0 %v842_v39  ;;  %v5367_v39 = vld [vmem:[%s6760_s28 + $0x48] sm:$0xff] }
 0x309   :  { %4153 = vmatprep.subr.bf16.mxu0 %v4907_v1 }
 0x30a   :  { %v4073_v42 = vpop.f32.mrf.mxu1  ;;  %4116 = vmatmul.mubr.msk.f32.gmra.mxu1 %vm573_vm6, %v81_v40 }
 0x30b   :  { %4118 = vmatprep.mubr.msk.f32.mxu1 %vm4908_vm0, %v4907_v1 }
 0x30e   :  { %4119 = vmatmul.mubr.msk.f32.gmra.mxu1 %vm573_vm6, %v82_v44 }
 0x30f   :  { %4121 = vmatprep.mubr.msk.f32.mxu1 %vm4908_vm0, %v4907_v1 }
 0x310   :  { %4154 = vmatpush3.bf16.xpose.msra.mxu0 %v839_v45  ;;  %v5376_v45 = vld [vmem:[%s6760_s28 + $0x50] sm:$0xff] }
 0x311   :  { %4155 = vmatprep.subr.bf16.mxu0 %v4907_v1 }
 0x312   :  { %4122 = vmatmul.mubr.msk.f32.gmra.mxu1 %vm573_vm6, %v83_v46 }
 0x313   :  { %4124 = vmatprep.mubr.msk.f32.mxu1 %vm4908_vm0, %v4907_v1 }
 0x316   :  { %4125 = vmatmul.mubr.msk.f32.gmra.mxu1 %vm573_vm6, %v84_v48  ;;  %v5382_v48 = vld [vmem:[%s6760_s28 + $0x58] sm:$0xff] }
 0x317   :  { %4127 = vmatprep.mubr.msk.f32.mxu1 %vm4908_vm0, %v4907_v1 }
 0x318   :  { %4156 = vmatpush3.bf16.xpose.msra.mxu0 %v836_v49 }
 0x319   :  { %1315 = vmatprep.subr.mxu0 %v4907_v1 }
 0x31a   :  { %4128 = vmatmul.mubr.msk.f32.gmra.mxu1 %vm573_vm6, %v85_v50 }
 0x31b   :  { %4130 = vmatprep.mubr.msk.f32.mxu1 %vm4908_vm0, %v4907_v1 }
 0x31e   :  { %4131 = vmatmul.mubr.msk.f32.gmra.mxu1 %vm573_vm6, %v86_v51 }
 0x31f   :  { %4133 = vmatprep.mubr.msk.f32.mxu1 %vm4908_vm0, %v4907_v1 }
 0x322   :  { %4134 = vmatmul.mubr.msk.f32.gmra.mxu1 %vm573_vm6, %v87_v52 }
 0x323   :  { %4136 = vmatprep.mubr.msk.f32.mxu1 %vm4908_vm0, %v4907_v1 }
 0x326   :  { %4137 = vmatmul.mubr.msk.f32.gmra.mxu1 %vm573_vm6, %v88_v53 }
 0x327   :  { %4139 = vmatprep.mubr.msk.f32.mxu1 %vm4908_vm0, %v4907_v1 }
 0x32a   :  { %4140 = vmatmul.mubr.msk.f32.gmra.mxu1 %vm573_vm6, %v89_v54  ;;  %v5391_v54 = vld [vmem:[%s6760_s28 + $0x60] sm:$0xff] }
 0x32b   :  { %4142 = vmatprep.mubr.msk.f32.mxu1 %vm4908_vm0, %v4907_v1 }
 0x32e   :  { %4143 = vmatmul.mubr.msk.f32.gmra.mxu1 %vm573_vm6, %v90_v55 }
 0x32f   :  { %4145 = vmatprep.mubr.msk.f32.mxu1 %vm4908_vm0, %v4907_v1 }
 0x332   :  { %4146 = vmatmul.mubr.msk.f32.gmra.mxu1 %vm573_vm6, %v91_v56 }
 0x333   :  { %4148 = vmatprep.mubr.msk.f32.mxu1 %vm4908_vm0, %v4907_v1 }
 0x336   :  { %4149 = vmatmul.mubr.msk.f32.gmra.mxu1 %vm573_vm6, %v92_v57  ;;  %v5397_v57 = vld [vmem:[%s6760_s28 + $0x68] sm:$0xff] }
 0x337   :  { %4199 = vmatprep.mubr.msk.bf16.mxu1 %vm4908_vm0, %v4907_v1 }
 0x3b6   :  { %v695_v58 = vpop.f32.mrf.mxu1 }
 0x3b7   :  { %v779_v63 = vmul.f32 %v695_v58, %v5304_v59 }
 0x3b8   :  { %v4102_v60 = vpop.f32.mrf.mxu1 }
 0x3ba   :  { %v700_v62 = vpop.f32.mrf.mxu1 }
 0x3bb   :  { %v780_v0 = vmul.f32 %v700_v62, %v5309_v61 }
 0x3bc   :  { %v4105_v2 = vpop.f32.mrf.mxu1 }
 0x3bd   :  { %v796_v3 = vpack.c.bf16 %v780_v0, %v779_v63  ;;  %v5406_v2 = vld [vmem:[%s6760_s28 + $0x70] sm:$0xff] }
 0x3be   :  { %v705_v5 = vpop.f32.mrf.mxu1 }
 0x3bf   :  { %4158 = vmatmul.mubr.msk.bf16.vlgmr.msra.gmra.mxu0 %vm255_vm2, %v796_v3  ;;  %v781_v8 = vmul.f32 %v705_v5, %v5316_v4 }
 0x3c0   :  { %v4108_v6 = vpop.f32.mrf.mxu1  ;;  %4161 = vmatprep.mubr.msk.bf16.mxu0 %vm4908_vm0, %v4907_v1 }
 0x3c1   :  { %v5412_v6 = vld [vmem:[%s6760_s28 + $0x78] sm:$0xff] }
 0x3c2   :  { %v710_v9 = vpop.f32.mrf.mxu1 }
 0x3c3   :  { %v782_v10 = vmul.f32 %v710_v9, %v5322_v7 }
 0x3c4   :  { %v4111_v11 = vpop.f32.mrf.mxu1 }
 0x3c5   :  { %v797_v12 = vpack.c.bf16 %v782_v10, %v781_v8 }
 0x3c6   :  { %v715_v14 = vpop.f32.mrf.mxu1 }
 0x3c7   :  { %4162 = vmatmul.mubr.msk.bf16.gmra.mxu0 %vm255_vm2, %v797_v12  ;;  %v783_v18 = vmul.f32 %v715_v14, %v5331_v13  ;;  %v5421_v12 = vld [vmem:[%s6760_s28 + $0x80] sm:$0xff] }
 0x3c8   :  { %v4114_v16 = vpop.f32.mrf.mxu1  ;;  %4165 = vmatprep.mubr.msk.bf16.mxu0 %vm4908_vm0, %v4907_v1 }
 0x3ca   :  { %v720_v19 = vpop.f32.mrf.mxu1 }
 0x3cb   :  { %v784_v21 = vmul.f32 %v720_v19, %v5337_v17 }
 0x3cc   :  { %v4117_v22 = vpop.f32.mrf.mxu1 }
 0x3cd   :  { %v798_v23 = vpack.c.bf16 %v784_v21, %v783_v18  ;;  %v120_v22 = vld [vmem:[%s6761_s26] sm:$0xff] }
 0x3ce   :  { %v725_v26 = vpop.f32.mrf.mxu1 }
 0x3cf   :  { %4166 = vmatmul.mubr.msk.bf16.gmra.mxu0 %vm255_vm2, %v798_v23  ;;  %v785_v29 = vmul.f32 %v725_v26, %v5346_v24 }
 0x3d0   :  { %v4120_v27 = vpop.f32.mrf.mxu1  ;;  %4169 = vmatprep.mubr.msk.bf16.mxu0 %vm4908_vm0, %v4907_v1 }
 0x3d2   :  { %v730_v31 = vpop.f32.mrf.mxu1 }
 0x3d3   :  { %v786_v32 = vmul.f32 %v730_v31, %v5352_v28 }
 0x3d4   :  { %v4123_v33 = vpop.f32.mrf.mxu1 }
 0x3d5   :  { %v799_v34 = vpack.c.bf16 %v786_v32, %v785_v29  ;;  %v121_v29 = vld [vmem:[%s6761_s26 + $0x8] sm:$0xff] }
 0x3d6   :  { %v735_v37 = vpop.f32.mrf.mxu1 }
 0x3d7   :  { %4170 = vmatmul.mubr.msk.bf16.gmra.mxu0 %vm255_vm2, %v799_v34  ;;  %v787_v40 = vmul.f32 %v735_v37, %v5361_v36  ;;  %v122_v37 = vld [vmem:[%s6761_s26 + $0x10] sm:$0xff] }
 0x3d8   :  { %v4126_v38 = vpop.f32.mrf.mxu1  ;;  %4173 = vmatprep.mubr.msk.bf16.mxu0 %vm4908_vm0, %v4907_v1 }
 0x3da   :  { %v740_v41 = vpop.f32.mrf.mxu1 }
 0x3db   :  { %v788_v42 = vmul.f32 %v740_v41, %v5367_v39 }
 0x3dc   :  { %v4129_v43 = vpop.f32.mrf.mxu1 }
 0x3dd   :  { %v800_v44 = vpack.c.bf16 %v788_v42, %v787_v40  ;;  %v123_v43 = vld [vmem:[%s6761_s26 + $0x18] sm:$0xff] }
 0x3de   :  { %v745_v46 = vpop.f32.mrf.mxu1 }
 0x3df   :  { %4174 = vmatmul.mubr.msk.bf16.gmra.mxu0 %vm255_vm2, %v800_v44  ;;  %v789_v49 = vmul.f32 %v745_v46, %v5376_v45 }
 0x3e0   :  { %v4132_v47 = vpop.f32.mrf.mxu1  ;;  %4177 = vmatprep.mubr.msk.bf16.mxu0 %vm4908_vm0, %v4907_v1 }
 0x3e2   :  { %v750_v50 = vpop.f32.mrf.mxu1 }
 0x3e3   :  { %v790_v51 = vmul.f32 %v750_v50, %v5382_v48  ;;  %v124_v50 = vld [vmem:[%s6761_s26 + $0x20] sm:$0xff] }
 0x3e4   :  { %v4135_v52 = vpop.f32.mrf.mxu1 }
 0x3e5   :  { %v801_v53 = vpack.c.bf16 %v790_v51, %v789_v49 }
 0x3e6   :  { %v755_v55 = vpop.f32.mrf.mxu1 }
 0x3e7   :  { %4178 = vmatmul.mubr.msk.bf16.gmra.mxu0 %vm255_vm2, %v801_v53  ;;  %v791_v58 = vmul.f32 %v755_v55, %v5391_v54 }
 0x3e8   :  { %v4138_v56 = vpop.f32.mrf.mxu1  ;;  %4181 = vmatprep.mubr.msk.bf16.mxu0 %vm4908_vm0, %v4907_v1 }
 0x3e9   :  { %v125_v56 = vld [vmem:[%s6761_s26 + $0x28] sm:$0xff] }
 0x3ea   :  { %v760_v60 = vpop.f32.mrf.mxu1 }
 0x3eb   :  { %v792_v62 = vmul.f32 %v760_v60, %v5397_v57 }
 0x3ec   :  { %v4141_v63 = vpop.f32.mrf.mxu1 }
 0x3ed   :  { %v802_v0 = vpack.c.bf16 %v792_v62, %v791_v58 }
 0x3ee   :  { %v765_v3 = vpop.f32.mrf.mxu1 }
 0x3ef   :  { %4182 = vmatmul.mubr.msk.bf16.gmra.mxu0 %vm255_vm2, %v802_v0  ;;  %v793_v8 = vmul.f32 %v765_v3, %v5406_v2  ;;  %v126_v0 = vld [vmem:[%s6761_s26 + $0x30] sm:$0xff] }
 0x3f0   :  { %v4144_v5 = vpop.f32.mrf.mxu1  ;;  %4185 = vmatprep.mubr.msk.bf16.mxu0 %vm4908_vm0, %v4907_v1 }
 0x3f2   :  { %v770_v9 = vpop.f32.mrf.mxu1 }
 0x3f3   :  { %v794_v10 = vmul.f32 %v770_v9, %v5412_v6 }
 0x3f4   :  { %v4147_v11 = vpop.f32.mrf.mxu1 }
 0x3f5   :  { %v803_v14 = vpack.c.bf16 %v794_v10, %v793_v8  ;;  %v127_v10 = vld [vmem:[%s6761_s26 + $0x38] sm:$0xff] }
 0x3f6   :  { %v775_v16 = vpop.f32.mrf.mxu1 }
 0x3f7   :  { %4186 = vmatmul.mubr.msk.bf16.gmra.mxu0 %vm255_vm2, %v803_v14  ;;  %v795_v18 = vmul.f32 %v775_v16, %v5421_v12 }
 0x3f8   :  { %4189 = vmatprep.mubr.msk.bf16.mxu0 %vm4908_vm0, %v4907_v1  ;;  %v4150_v19 = vpop.f32.mrf.mxu1 }
 0x3f9   :  { %v804_v21 = vpack.c.bf16 %v795_v18, %v795_v18  ;;  %v128_v19 = vld [vmem:[%s6761_s26 + $0x40] sm:$0xff] }
 0x3ff   :  { %4190 = vmatmul.mubr.msk.bf16.gmra.mxu0 %vm255_vm2, %v804_v21 }
 0x47f   :  { %v878_v23 = vpop.f32.mrf.mxu0 }
 0x480   :  { %v5431_v26 = vadd.f32 %v878_v23, %v120_v22 }
 0x481   :  { %v4159_v27 = vpop.f32.mrf.mxu0 }
 0x482   :  { %v948_v31 = vsel %vm573_vm6, %v5431_v26, -inf }
 0x483   :  { %949 = vmax.xlane.f32.xlu0 %v948_v31  ;;  %v881_v32 = vpop.f32.mrf.mxu0 }
 0x484   :  { %v5438_v33 = vadd.f32 %v881_v32, %v121_v29  ;;  %v129_v29 = vld [vmem:[%s6761_s26 + $0x48] sm:$0xff] }
 0x485   :  { %v4160_v34 = vpop.f32.mrf.mxu0 }
 0x486   :  { %v951_v38 = vsel %vm573_vm6, %v5438_v33, -inf }
 0x487   :  { %952 = vmax.xlane.f32.xlu1 %v951_v38  ;;  %v886_v40 = vpop.f32.mrf.mxu0  ;;  %v130_v38 = vld [vmem:[%s6761_s26 + $0x50] sm:$0xff] }
 0x488   :  { %v5445_v41 = vadd.f32 %v886_v40, %v122_v37 }
 0x489   :  { %v4163_v42 = vpop.f32.mrf.mxu0 }
 0x48a   :  { %v954_v44 = vsel %vm573_vm6, %v5445_v41, -inf }
 0x48b   :  { %955 = vmax.xlane.f32.xlu0 %v954_v44  ;;  %v889_v46 = vpop.f32.mrf.mxu0 }
 0x48c   :  { %v5452_v47 = vadd.f32 %v889_v46, %v123_v43  ;;  %v131_v46 = vld [vmem:[%s6761_s26 + $0x58] sm:$0xff] }
 0x48d   :  { %v4164_v49 = vpop.f32.mrf.mxu0 }
 0x48e   :  { %v957_v51 = vsel %vm573_vm6, %v5452_v47, -inf }
 0x48f   :  { %958 = vmax.xlane.f32.xlu1 %v957_v51  ;;  %v894_v52 = vpop.f32.mrf.mxu0 }
 0x490   :  { %v5459_v53 = vadd.f32 %v894_v52, %v124_v50 }
 0x491   :  { %v4167_v55 = vpop.f32.mrf.mxu0 }
 0x492   :  { %v960_v58 = vsel %vm573_vm6, %v5459_v53, -inf  ;;  %v132_v55 = vld [vmem:[%s6761_s26 + $0x60] sm:$0xff] }
 0x493   :  { %961 = vmax.xlane.f32.xlu0 %v960_v58  ;;  %v897_v60 = vpop.f32.mrf.mxu0 }
 0x494   :  { %v5466_v62 = vadd.f32 %v897_v60, %v125_v56 }
 0x495   :  { %v4168_v63 = vpop.f32.mrf.mxu0 }
 0x496   :  { %v963_v3 = vsel %vm573_vm6, %v5466_v62, -inf }
 0x497   :  { %964 = vmax.xlane.f32.xlu1 %v963_v3  ;;  %v902_v5 = vpop.f32.mrf.mxu0 }
 0x498   :  { %v5473_v8 = vadd.f32 %v902_v5, %v126_v0  ;;  %v133_v0 = vld [vmem:[%s6761_s26 + $0x68] sm:$0xff] }
 0x499   :  { %v4171_v9 = vpop.f32.mrf.mxu0 }
 0x49a   :  { %v966_v11 = vsel %vm573_vm6, %v5473_v8, -inf }
 0x49b   :  { %967 = vmax.xlane.f32.xlu0 %v966_v11  ;;  %v905_v14 = vpop.f32.mrf.mxu0  ;;  %v134_v11 = vld [vmem:[%s6761_s26 + $0x70] sm:$0xff] }
 0x49c   :  { %v5480_v16 = vadd.f32 %v905_v14, %v127_v10 }
 0x49d   :  { %v4172_v18 = vpop.f32.mrf.mxu0 }
 0x49e   :  { %v969_v21 = vsel %vm573_vm6, %v5480_v16, -inf }
 0x49f   :  { %970 = vmax.xlane.f32.xlu1 %v969_v21  ;;  %v910_v22 = vpop.f32.mrf.mxu0 }
 0x4a0   :  { %v5487_v23 = vadd.f32 %v910_v22, %v128_v19  ;;  %v135_v22 = vld [vmem:[%s6761_s26 + $0x78] sm:$0xff] }
 0x4a1   :  { %v4175_v27 = vpop.f32.mrf.mxu0 }
 0x4a2   :  { %v972_v31 = vsel %vm573_vm6, %v5487_v23, -inf }
 0x4a3   :  { %973 = vmax.xlane.f32.xlu0 %v972_v31  ;;  %v913_v32 = vpop.f32.mrf.mxu0 }
 0x4a4   :  { %v5494_v34 = vadd.f32 %v913_v32, %v129_v29 }
 0x4a5   :  { %v4176_v37 = vpop.f32.mrf.mxu0 }
 0x4a6   :  { %v975_v40 = vsel %vm573_vm6, %v5494_v34, -inf }
 0x4a7   :  { %976 = vmax.xlane.f32.xlu1 %v975_v40  ;;  %v918_v42 = vpop.f32.mrf.mxu0 }
 0x4a8   :  { %v5501_v43 = vadd.f32 %v918_v42, %v130_v38 }
 0x4a9   :  { %v4179_v44 = vpop.f32.mrf.mxu0 }
 0x4aa   :  { %v978_v49 = vsel %vm573_vm6, %v5501_v43, -inf }
 0x4ab   :  { %979 = vmax.xlane.f32.xlu0 %v978_v49  ;;  %v921_v50 = vpop.f32.mrf.mxu0 }
 0x4ac   :  { %v5508_v51 = vadd.f32 %v921_v50, %v131_v46 }
 0x4ad   :  { %v4180_v52 = vpop.f32.mrf.mxu0 }
 0x4ae   :  { %v981_v56 = vsel %vm573_vm6, %v5508_v51, -inf }
 0x4af   :  { %982 = vmax.xlane.f32.xlu1 %v981_v56  ;;  %v926_v58 = vpop.f32.mrf.mxu0 }
 0x4b0   :  { %v5515_v60 = vadd.f32 %v926_v58, %v132_v55 }
 0x4b1   :  { %v4183_v63 = vpop.f32.mrf.mxu0 }
 0x4b2   :  { %v984_v3 = vsel %vm573_vm6, %v5515_v60, -inf }
 0x4b3   :  { %985 = vmax.xlane.f32.xlu0 %v984_v3  ;;  %v929_v5 = vpop.f32.mrf.mxu0 }
 0x4b4   :  { %v5522_v9 = vadd.f32 %v929_v5, %v133_v0 }
 0x4b5   :  { %v4184_v10 = vpop.f32.mrf.mxu0 }
 0x4b6   :  { %v987_v14 = vsel %vm573_vm6, %v5522_v9, -inf  ;;  %v136_v10 = vld [vmem:[%s6761_s26 + $0x80] sm:$0xff] }
 0x4b7   :  { %988 = vmax.xlane.f32.xlu1 %v987_v14  ;;  %v934_v18 = vpop.f32.mrf.mxu0 }
 0x4b8   :  { %v5529_v19 = vadd.f32 %v934_v18, %v134_v11 }
 0x4b9   :  { %v4187_v21 = vpop.f32.mrf.mxu0 }
 0x4ba   :  { %v990_v27 = vsel %vm573_vm6, %v5529_v19, -inf }
 0x4bb   :  { %991 = vmax.xlane.f32.xlu0 %v990_v27  ;;  %v937_v29 = vpop.f32.mrf.mxu0 }
 0x4bc   :  { %v5536_v31 = vadd.f32 %v937_v29, %v135_v22 }
 0x4bd   :  { %v4188_v32 = vpop.f32.mrf.mxu0 }
 0x4be   :  { %v993_v37 = vsel %vm573_vm6, %v5536_v31, -inf }
 0x4bf   :  { %994 = vmax.xlane.f32.xlu1 %v993_v37  ;;  %v942_v38 = vpop.f32.mrf.mxu0 }
 0x4c0   :  { %v5547_v14 = vadd.f32 %v942_v38, %v136_v10 }
 0x4c1   :  { %v4191_v40 = vpop.f32.mrf.mxu0 }
 0x4c2   :  { %v996_v27 = vsel %vm573_vm6, %v5547_v14, -inf }
 0x4c3   :  { %v945_v42 = vpop.f32.mrf.mxu0 }
 0x4c5   :  { %v4192_v44 = vpop.f32.mrf.mxu0 }
 0x50c   :  { %v950_v46 = vpop.xlane.xlu0 %949 }
 0x50d   :  { %v999_v49 = vsub.f32 %v5431_v26, %v950_v46 }
 0x50f   :  { %v1016_v50 = vmul.f32 1.442695, %v999_v49 }
 0x510   :  { %v953_v52 = vpop.xlane.xlu1 %952 }
 0x511   :  { %4624 = vpow2.f32 %v1016_v50  ;;  %v1000_v55 = vsub.f32 %v5438_v33, %v953_v52 }
 0x513   :  { %v1018_v56 = vmul.f32 1.442695, %v1000_v55 }
 0x514   :  { %v956_v58 = vpop.xlane.xlu0 %955 }
 0x515   :  { %4626 = vpow2.f32 %v1018_v56  ;;  %v1001_v63 = vsub.f32 %v5445_v41, %v956_v58 }
 0x517   :  { %v1020_v0 = vmul.f32 1.442695, %v1001_v63 }
 0x518   :  { %v959_v3 = vpop.xlane.xlu1 %958 }
 0x519   :  { %4628 = vpow2.f32 %v1020_v0  ;;  %v1002_v5 = vsub.f32 %v5452_v47, %v959_v3 }
 0x51b   :  { %v1022_v26 = vmul.f32 1.442695, %v1002_v5 }
 0x51c   :  { %v962_v11 = vpop.xlane.xlu0 %961 }
 0x51d   :  { %4630 = vpow2.f32 %v1022_v26  ;;  %v1003_v33 = vsub.f32 %v5459_v53, %v962_v11 }
 0x51e   :  { %v5550_v18 = vpop.eup %4624 }
 0x51f   :  { %v1024_v21 = vmul.f32 1.442695, %v1003_v33  ;;  %v1050_v41 = vsel %vm573_vm6, %v5550_v18, 0.0 }
 0x520   :  { %v965_v22 = vpop.xlane.xlu1 %964  ;;  %1051 = vadd.xlane.f32.xlu0 %v1050_v41 }
 0x521   :  { %4632 = vpow2.f32 %v1024_v21  ;;  %v1004_v47 = vsub.f32 %v5466_v62, %v965_v22 }
 0x522   :  { %v5557_v29 = vpop.eup %4626 }
 0x523   :  { %v1026_v32 = vmul.f32 1.442695, %v1004_v47  ;;  %v1053_v53 = vsel %vm573_vm6, %v5557_v29, 0.0 }
 0x524   :  { %v968_v37 = vpop.xlane.xlu0 %967  ;;  %1054 = vadd.xlane.f32.xlu1 %v1053_v53  ;;  %997 = vmax.xlane.f32.xlu0 %v996_v27 }
 0x525   :  { %4634 = vpow2.f32 %v1026_v32  ;;  %v1005_v38 = vsub.f32 %v5473_v8, %v968_v37 }
 0x526   :  { %v5562_v40 = vpop.eup %4628 }
 0x527   :  { %v1028_v42 = vmul.f32 1.442695, %v1005_v38  ;;  %v1056_v62 = vsel %vm573_vm6, %v5562_v40, 0.0 }
 0x528   :  { %v971_v44 = vpop.xlane.xlu1 %970  ;;  %1057 = vadd.xlane.f32.xlu1 %v1056_v62 }
 0x529   :  { %4636 = vpow2.f32 %v1028_v42  ;;  %v1006_v46 = vsub.f32 %v5480_v16, %v971_v44 }
 0x52a   :  { %v5567_v49 = vpop.eup %4630 }
 0x52b   :  { %v1030_v50 = vmul.f32 1.442695, %v1006_v46  ;;  %v1059_v52 = vsel %vm573_vm6, %v5567_v49, 0.0 }
 0x52c   :  { %v974_v55 = vpop.xlane.xlu0 %973  ;;  %1060 = vadd.xlane.f32.xlu0 %v1059_v52 }
 0x52d   :  { %4638 = vpow2.f32 %v1030_v50  ;;  %v1007_v8 = vsub.f32 %v5487_v23, %v974_v55 }
 0x52e   :  { %v5572_v56 = vpop.eup %4632 }
 0x52f   :  { %v1032_v58 = vmul.f32 1.442695, %v1007_v8  ;;  %v1062_v63 = vsel %vm573_vm6, %v5572_v56, 0.0 }
 0x530   :  { %v977_v0 = vpop.xlane.xlu1 %976  ;;  %1063 = vadd.xlane.f32.xlu1 %v1062_v63 }
 0x531   :  { %4640 = vpow2.f32 %v1032_v58  ;;  %v1008_v16 = vsub.f32 %v5494_v34, %v977_v0 }
 0x532   :  { %v5577_v3 = vpop.eup %4634 }
 0x533   :  { %v1034_v5 = vmul.f32 1.442695, %v1008_v16  ;;  %v1065_v10 = vsel %vm573_vm6, %v5577_v3, 0.0 }
 0x534   :  { %v980_v26 = vpop.xlane.xlu0 %979  ;;  %1066 = vadd.xlane.f32.xlu0 %v1065_v10 }
 0x535   :  { %4642 = vpow2.f32 %v1034_v5  ;;  %v1009_v23 = vsub.f32 %v5501_v43, %v980_v26 }
 0x536   :  { %v5582_v11 = vpop.eup %4636 }
 0x537   :  { %v1036_v33 = vmul.f32 1.442695, %v1009_v23  ;;  %v1068_v21 = vsel %vm573_vm6, %v5582_v11, 0.0 }
 0x538   :  { %v983_v41 = vpop.xlane.xlu1 %982  ;;  %1069 = vadd.xlane.f32.xlu1 %v1068_v21 }
 0x539   :  { %4644 = vpow2.f32 %v1036_v33  ;;  %v1010_v34 = vsub.f32 %v5508_v51, %v983_v41 }
 0x53a   :  { %v5587_v22 = vpop.eup %4638 }
 0x53b   :  { %v1038_v47 = vmul.f32 1.442695, %v1010_v34  ;;  %v1071_v27 = vsel %vm573_vm6, %v5587_v22, 0.0 }
 0x53c   :  { %v986_v32 = vpop.xlane.xlu0 %985  ;;  %1072 = vadd.xlane.f32.xlu0 %v1071_v27 }
 0x53d   :  { %4646 = vpow2.f32 %v1038_v47  ;;  %v1011_v43 = vsub.f32 %v5515_v60, %v986_v32 }
 0x53e   :  { %v5592_v53 = vpop.eup %4640 }
 0x53f   :  { %v1040_v37 = vmul.f32 1.442695, %v1011_v43  ;;  %v1074_v38 = vsel %vm573_vm6, %v5592_v53, 0.0 }
 0x540   :  { %v989_v42 = vpop.xlane.xlu1 %988  ;;  %1075 = vadd.xlane.f32.xlu1 %v1074_v38 }
 0x541   :  { %4648 = vpow2.f32 %v1040_v37  ;;  %v1012_v51 = vsub.f32 %v5522_v9, %v989_v42 }
 0x542   :  { %v5597_v62 = vpop.eup %4642 }
 0x543   :  { %v1042_v44 = vmul.f32 1.442695, %v1012_v51  ;;  %v1077_v46 = vsel %vm573_vm6, %v5597_v62, 0.0 }
 0x544   :  { %v992_v50 = vpop.xlane.xlu0 %991  ;;  %1078 = vadd.xlane.f32.xlu0 %v1077_v46 }
 0x545   :  { %4650 = vpow2.f32 %v1042_v44  ;;  %v1013_v60 = vsub.f32 %v5529_v19, %v992_v50 }
 0x546   :  { %v5602_v52 = vpop.eup %4644 }
 0x547   :  { %v1044_v55 = vmul.f32 1.442695, %v1013_v60  ;;  %v1080_v8 = vsel %vm573_vm6, %v5602_v52, 0.0 }
 0x548   :  { %1081 = vadd.xlane.f32.xlu1 %v1080_v8  ;;  %v995_v58 = vpop.xlane.xlu1 %994 }
 0x549   :  { %4652 = vpow2.f32 %v1044_v55  ;;  %v1014_v9 = vsub.f32 %v5536_v31, %v995_v58 }
 0x54a   :  { %v5607_v63 = vpop.eup %4646 }
 0x54b   :  { %v1046_v0 = vmul.f32 1.442695, %v1014_v9  ;;  %v1083_v16 = vsel %vm573_vm6, %v5607_v63, 0.0 }
 0x54c   :  { %1084 = vadd.xlane.f32.xlu0 %v1083_v16 }
 0x54d   :  { %4654 = vpow2.f32 %v1046_v0 }
 0x54e   :  { %v5611_v19 = vpop.eup %4648 }
 0x54f   :  { %v1086_v5 = vsel %vm573_vm6, %v5611_v19, 0.0 }
 0x550   :  { %1087 = vadd.xlane.f32.xlu1 %v1086_v5 }
 0x552   :  { %v5615_v10 = vpop.eup %4650 }
 0x553   :  { %v1089_v26 = vsel %vm573_vm6, %v5615_v10, 0.0 }
 0x554   :  { %1090 = vadd.xlane.f32.xlu0 %v1089_v26 }
 0x556   :  { %v5619_v31 = vpop.eup %4652 }
 0x557   :  { %v1092_v23 = vsel %vm573_vm6, %v5619_v31, 0.0 }
 0x558   :  { %1093 = vadd.xlane.f32.xlu1 %v1092_v23 }
 0x55a   :  { %v5623_v33 = vpop.eup %4654 }
 0x55b   :  { %v1095_v21 = vsel %vm573_vm6, %v5623_v33, 0.0 }
 0x55c   :  { %1096 = vadd.xlane.f32.xlu0 %v1095_v21 }
 0x5a9   :  { %v1052_v41 = vpop.xlane.xlu0 %1051 }
 0x5aa   :  { %4656 = vrcp.f32 %v1052_v41 }
 0x5ad   :  { %v1055_v34 = vpop.xlane.xlu1 %1054  ;;  %v998_v47 = vpop.xlane.xlu0 %997 }
 0x5ae   :  { %4658 = vrcp.f32 %v1055_v34  ;;  %v1015_v27 = vsub.f32 %v5547_v14, %v998_v47 }
 0x5b0   :  { %v1048_v32 = vmul.f32 1.442695, %v1015_v27 }
 0x5b1   :  { %v1058_v43 = vpop.xlane.xlu1 %1057 }
 0x5b2   :  { %4660 = vpow2.f32 %v1048_v32 }
 0x5b3   :  { %4662 = vrcp.f32 %v1058_v43 }
 0x5b5   :  { %v1061_v37 = vpop.xlane.xlu0 %1060 }
 0x5b6   :  { %4664 = vrcp.f32 %v1061_v37 }
 0x5b7   :  { %v4657_v38 = vpop.eup %4656 }
 0x5b8   :  { %v1118_v44 = vmul.f32 %v4657_v38, %v5550_v18 }
 0x5b9   :  { %v1064_v42 = vpop.xlane.xlu1 %1063 }
 0x5ba   :  { %4666 = vrcp.f32 %v1064_v42 }
 0x5bb   :  { %v4659_v51 = vpop.eup %4658 }
 0x5bc   :  { %v1119_v46 = vmul.f32 %v4659_v51, %v5557_v29 }
 0x5bd   :  { %v1067_v50 = vpop.xlane.xlu0 %1066 }
 0x5be   :  { %v1135_v60 = vpack.c.bf16 %v1119_v46, %v1118_v44  ;;  %4668 = vrcp.f32 %v1067_v50 }
 0x5bf   :  { %v5630_v55 = vpop.eup %4660 }
 0x5c0   :  { %4200 = vmatmul.mubr.msk.bf16.vlgmr.msra.gmra.mxu1 %vm573_vm6, %v1135_v60  ;;  %v1098_v14 = vsel %vm573_vm6, %v5630_v55, 0.0  ;;  %v4663_v8 = vpop.eup %4662 }
 0x5c1   :  { %v1070_v58 = vpop.xlane.xlu1 %1069  ;;  %1099 = vadd.xlane.f32.xlu1 %v1098_v14  ;;  %4203 = vmatprep.mubr.msk.bf16.mxu1 %vm4908_vm0, %v4907_v1  ;;  %v1120_v29 = vmul.f32 %v4663_v8, %v5562_v40 }
 0x5c2   :  { %4670 = vrcp.f32 %v1070_v58 }
 0x5c3   :  { %v4665_v18 = vpop.eup %4664 }
 0x5c4   :  { %v1121_v9 = vmul.f32 %v4665_v18, %v5567_v49 }
 0x5c5   :  { %v1073_v0 = vpop.xlane.xlu0 %1072 }
 0x5c6   :  { %4672 = vrcp.f32 %v1073_v0  ;;  %v1136_v16 = vpack.c.bf16 %v1121_v9, %v1120_v29 }
 0x5c7   :  { %v4667_v5 = vpop.eup %4666 }
 0x5c8   :  { %4204 = vmatmul.mubr.msk.bf16.gmra.mxu1 %vm573_vm6, %v1136_v16  ;;  %v1122_v21 = vmul.f32 %v4667_v5, %v5572_v56 }
 0x5c9   :  { %v1076_v26 = vpop.xlane.xlu1 %1075  ;;  %4207 = vmatprep.mubr.msk.bf16.mxu1 %vm4908_vm0, %v4907_v1 }
 0x5ca   :  { %4674 = vrcp.f32 %v1076_v26 }
 0x5cb   :  { %v4669_v23 = vpop.eup %4668 }
 0x5cc   :  { %v1123_v41 = vmul.f32 %v4669_v23, %v5577_v3 }
 0x5cd   :  { %v1079_v34 = vpop.xlane.xlu0 %1078 }
 0x5ce   :  { %4676 = vrcp.f32 %v1079_v34  ;;  %v1137_v40 = vpack.c.bf16 %v1123_v41, %v1122_v21 }
 0x5cf   :  { %v4671_v49 = vpop.eup %4670 }
 0x5d0   :  { %4208 = vmatmul.mubr.msk.bf16.gmra.mxu1 %vm573_vm6, %v1137_v40  ;;  %v1124_v32 = vmul.f32 %v4671_v49, %v5582_v11 }
 0x5d1   :  { %v1082_v47 = vpop.xlane.xlu1 %1081  ;;  %4211 = vmatprep.mubr.msk.bf16.mxu1 %vm4908_vm0, %v4907_v1 }
 0x5d2   :  { %4678 = vrcp.f32 %v1082_v47 }
 0x5d3   :  { %v4673_v27 = vpop.eup %4672 }
 0x5d4   :  { %v1125_v43 = vmul.f32 %v4673_v27, %v5587_v22 }
 0x5d5   :  { %v1085_v37 = vpop.xlane.xlu0 %1084 }
 0x5d6   :  { %4680 = vrcp.f32 %v1085_v37  ;;  %v1138_v56 = vpack.c.bf16 %v1125_v43, %v1124_v32 }
 0x5d7   :  { %v4675_v3 = vpop.eup %4674 }
 0x5d8   :  { %4212 = vmatmul.mubr.msk.bf16.gmra.mxu1 %vm573_vm6, %v1138_v56  ;;  %v1126_v51 = vmul.f32 %v4675_v3, %v5592_v53 }
 0x5d9   :  { %v1088_v38 = vpop.xlane.xlu1 %1087  ;;  %4215 = vmatprep.mubr.msk.bf16.mxu1 %vm4908_vm0, %v4907_v1 }
 0x5da   :  { %4682 = vrcp.f32 %v1088_v38 }
 0x5db   :  { %v4677_v42 = vpop.eup %4676 }
 0x5dc   :  { %v1127_v44 = vmul.f32 %v4677_v42, %v5597_v62 }
 0x5dd   :  { %v1091_v46 = vpop.xlane.xlu0 %1090 }
 0x5de   :  { %4684 = vrcp.f32 %v1091_v46  ;;  %v1139_v11 = vpack.c.bf16 %v1127_v44, %v1126_v51  ;;  %v94_v44 = vld [vmem:[%s6762_s25 + $0x8] sm:$0xff] }
 0x5df   :  { %v4679_v22 = vpop.eup %4678  ;;  %3688 = vmatprep.mubr.msk.f32.mxu0 %vm1299_vm7, %v94_v44 }
 0x5e0   :  { %4216 = vmatmul.mubr.msk.bf16.gmra.mxu1 %vm573_vm6, %v1139_v11  ;;  %v1128_v14 = vmul.f32 %v4679_v22, %v5602_v52 }
 0x5e1   :  { %v1094_v50 = vpop.xlane.xlu1 %1093  ;;  %4219 = vmatprep.mubr.msk.bf16.mxu1 %vm4908_vm0, %v4907_v1 }
 0x5e2   :  { %4686 = vrcp.f32 %v1094_v50 }
 0x5e3   :  { %v4681_v60 = vpop.eup %4680 }
 0x5e4   :  { %v1129_v8 = vmul.f32 %v4681_v60, %v5607_v63 }
 0x5e5   :  { %v1097_v58 = vpop.xlane.xlu0 %1096 }
 0x5e6   :  { %4688 = vrcp.f32 %v1097_v58  ;;  %v1140_v53 = vpack.c.bf16 %v1129_v8, %v1128_v14 }
 0x5e7   :  { %v4683_v62 = vpop.eup %4682 }
 0x5e8   :  { %4220 = vmatmul.mubr.msk.bf16.gmra.mxu1 %vm573_vm6, %v1140_v53  ;;  %v1130_v29 = vmul.f32 %v4683_v62, %v5611_v19 }
 0x5e9   :  { %4223 = vmatprep.mubr.msk.bf16.mxu1 %vm4908_vm0, %v4907_v1 }
 0x5eb   :  { %v4685_v18 = vpop.eup %4684 }
 0x5ec   :  { %v1131_v9 = vmul.f32 %v4685_v18, %v5615_v10 }
 0x5ee   :  { %v1141_v0 = vpack.c.bf16 %v1131_v9, %v1130_v29 }
 0x5ef   :  { %v4687_v52 = vpop.eup %4686 }
 0x5f0   :  { %4224 = vmatmul.mubr.msk.bf16.gmra.mxu1 %vm573_vm6, %v1141_v0  ;;  %v1132_v16 = vmul.f32 %v4687_v52, %v5619_v31 }
 0x5f1   :  { %4227 = vmatprep.mubr.msk.bf16.mxu1 %vm4908_vm0, %v4907_v1 }
 0x5f3   :  { %v4689_v63 = vpop.eup %4688 }
 0x5f4   :  { %v1133_v5 = vmul.f32 %v4689_v63, %v5623_v33 }
 0x5f6   :  { %v1142_v26 = vpack.c.bf16 %v1133_v5, %v1132_v16 }
 0x5f8   :  { %4228 = vmatmul.mubr.msk.bf16.gmra.mxu1 %vm573_vm6, %v1142_v26 }
 0x5f9   :  { %4231 = vmatprep.mubr.msk.bf16.mxu1 %vm4908_vm0, %v4907_v1 }
 0x64a   :  { %v1100_v19 = vpop.xlane.xlu1 %1099 }
 0x64b   :  { %4690 = vrcp.f32 %v1100_v19 }
 0x658   :  { %v4691_v10 = vpop.eup %4690 }
 0x659   :  { %v1134_v23 = vmul.f32 %v4691_v10, %v5630_v55  ;;  %v96_v10 = vld [vmem:[%s6762_s25 + $0x18] sm:$0xff] }
 0x65b   :  { %v1143_v21 = vpack.c.bf16 %v1134_v23, %v1134_v23 }
 0x65d   :  { %4232 = vmatmul.mubr.msk.bf16.gmra.mxu1 %vm573_vm6, %v1143_v21  ;;  %v98_v21 = vld [vmem:[%s6762_s25 + $0x28] sm:$0xff] }
 0x65e   :  { %4283 = vmatprep.mubr.msk.bf16.mxu1 %vm4908_vm0, %v4907_v1 }
 0x680   :  { %v5676_v31 = vpop.f32.mrf.mxu1 }
 0x682   :  { %v4201_v33 = vpop.f32.mrf.mxu1 }
 0x683   :  { %v100_v33 = vld [vmem:[%s6762_s25 + $0x38] sm:$0xff] }
 0x684   :  { %v5678_v41 = vpop.f32.mrf.mxu1 }
 0x686   :  { %v4202_v34 = vpop.f32.mrf.mxu1 }
 0x687   :  { %v102_v34 = vld [vmem:[%s6762_s25 + $0x48] sm:$0x3] }
 0x688   :  { %v5680_v40 = vpop.f32.mrf.mxu1 }
 0x68a   :  { %v4205_v49 = vpop.f32.mrf.mxu1 }
 0x68b   :  { %v4582_v49 = vld [vmem:[%s6730_s13 + $0x8] sm:$0xff]  }
 0x68c   :  { %v5682_v47 = vpop.f32.mrf.mxu1 }
 0x68e   :  { %v4206_v27 = vpop.f32.mrf.mxu1 }
 0x690   :  { %v1228_v32 = vpop.f32.mrf.mxu1 }
 0x692   :  { %v4209_v55 = vpop.f32.mrf.mxu1 }
 0x694   :  { %v1231_v43 = vpop.f32.mrf.mxu1 }
 0x696   :  { %v4210_v37 = vpop.f32.mrf.mxu1 }
 0x698   :  { %v1236_v56 = vpop.f32.mrf.mxu1 }
 0x69a   :  { %v4213_v3 = vpop.f32.mrf.mxu1 }
 0x69c   :  { %v1239_v38 = vpop.f32.mrf.mxu1 }
 0x69e   :  { %v4214_v42 = vpop.f32.mrf.mxu1 }
 0x6a0   :  { %v1244_v51 = vpop.f32.mrf.mxu1 }
 0x6a2   :  { %v4217_v46 = vpop.f32.mrf.mxu1 }
 0x6a4   :  { %v1247_v11 = vpop.f32.mrf.mxu1 }
 0x6a6   :  { %v4218_v22 = vpop.f32.mrf.mxu1 }
 0x6a7   :  { %v3693_v22 = vld [vmem:[%s6731_s14] ss:$0 sm:$0xff] }
 0x6a8   :  { %v1252_v50 = vpop.f32.mrf.mxu1 }
 0x6aa   :  { %v4221_v60 = vpop.f32.mrf.mxu1 }
 0x6ac   :  { %v1255_v14 = vpop.f32.mrf.mxu1 }
 0x6ad   :  { %v1293_v19 = vmul.f32 %v1255_v14, %v5382_v48  ;;  %v1289_v48 = vmul.f32 %v1239_v38, %v5352_v28  ;;  %v1285_v28 = vmul.f32 %v5682_v47, %v5322_v7  ;;  %v4583_v47 = vld [vmem:[%s6730_s13] sm:$0xff]  }
 0x6ae   :  { %v4222_v8 = vpop.f32.mrf.mxu1 }
 0x6b0   :  { %v1260_v58 = vpop.f32.mrf.mxu1 }
 0x6b1   :  { %v1294_v26 = vmul.f32 %v1260_v58, %v5391_v54  ;;  %v1290_v54 = vmul.f32 %v1244_v51, %v5361_v36  ;;  %v1286_v36 = vmul.f32 %v1228_v32, %v5331_v13  ;;  %v1282_v13 = vmul.f32 %v5676_v31, %v5304_v59  ;;  %v97_v31 = vld [vmem:[%s6762_s25 + $0x20] sm:$0xff] }
 0x6b2   :  { %v4225_v53 = vpop.f32.mrf.mxu1 }
 0x6b4   :  { %v1263_v62 = vpop.f32.mrf.mxu1 }
 0x6b5   :  { %v1295_v5 = vmul.f32 %v1263_v62, %v5397_v57  ;;  %v1291_v57 = vmul.f32 %v1247_v11, %v5367_v39  ;;  %v1287_v39 = vmul.f32 %v1231_v43, %v5337_v17  ;;  %v1283_v17 = vmul.f32 %v5678_v41, %v5309_v61  ;;  %v99_v41 = vld [vmem:[%s6762_s25 + $0x30] sm:$0xff] }
 0x6b6   :  { %v4226_v18 = vpop.f32.mrf.mxu1 }
 0x6b8   :  { %v1268_v29 = vpop.f32.mrf.mxu1 }
 0x6b9   :  { %v1296_v16 = vmul.f32 %v1268_v29, %v5406_v2  ;;  %v1292_v2 = vmul.f32 %v1252_v50, %v5376_v45  ;;  %v1288_v45 = vmul.f32 %v1236_v56, %v5346_v24  ;;  %v1284_v24 = vmul.f32 %v5680_v40, %v5316_v4  ;;  %v101_v40 = vld [vmem:[%s6762_s25 + $0x40] sm:$0x3] }
 0x6ba   :  { %v4229_v9 = vpop.f32.mrf.mxu1 }
 0x6bc   :  { %v1271_v0 = vpop.f32.mrf.mxu1 }
 0x6bd   :  { %v1297_v52 = vmul.f32 %v1271_v0, %v5412_v6  ;;  %v93_v6 = vld [vmem:[%s6762_s25] sm:$0xff] }
 0x6be   :  { %v4230_v63 = vpop.f32.mrf.mxu1 }
 0x6bf   :  { %1316 = vmatpush1.msra.mxu0 %v1297_v52 }
 0x6c0   :  { %1317 = vmatprep.subr.mxu0 %v4907_v1 }
 0x6c1   :  { %1318 = vmatpush1.msra.mxu0 %v1296_v16 }
 0x6c2   :  { %1319 = vmatprep.subr.mxu0 %v4907_v1 }
 0x6c3   :  { %1320 = vmatpush1.msra.mxu0 %v1295_v5 }
 0x6c4   :  { %1321 = vmatprep.subr.mxu0 %v4907_v1 }
 0x6c5   :  { %1322 = vmatpush1.msra.mxu0 %v1294_v26 }
 0x6c6   :  { %1323 = vmatprep.subr.mxu0 %v4907_v1 }
 0x6c7   :  { %1324 = vmatpush1.msra.mxu0 %v1293_v19 }
 0x6c8   :  { %1325 = vmatprep.subr.mxu0 %v4907_v1 }
 0x6c9   :  { %1326 = vmatpush1.msra.mxu0 %v1292_v2 }
 0x6ca   :  { %1327 = vmatprep.subr.mxu0 %v4907_v1 }
 0x6cb   :  { %1328 = vmatpush1.msra.mxu0 %v1291_v57 }
 0x6cc   :  { %1329 = vmatprep.subr.mxu0 %v4907_v1 }
 0x6cd   :  { %1330 = vmatpush1.msra.mxu0 %v1290_v54 }
 0x6ce   :  { %1331 = vmatprep.subr.mxu0 %v4907_v1 }
 0x6cf   :  { %1332 = vmatpush1.msra.mxu0 %v1289_v48 }
 0x6d0   :  { %1333 = vmatprep.subr.mxu0 %v4907_v1 }
 0x6d1   :  { %1334 = vmatpush1.msra.mxu0 %v1288_v45 }
 0x6d2   :  { %1335 = vmatprep.subr.mxu0 %v4907_v1 }
 0x6d3   :  { %1336 = vmatpush1.msra.mxu0 %v1287_v39 }
 0x6d4   :  { %1337 = vmatprep.subr.mxu0 %v4907_v1 }
 0x6d5   :  { %1338 = vmatpush1.msra.mxu0 %v1286_v36 }
 0x6d6   :  { %1339 = vmatprep.subr.mxu0 %v4907_v1 }
 0x6d7   :  { %1340 = vmatpush1.msra.mxu0 %v1285_v28 }
 0x6d8   :  { %1341 = vmatprep.subr.mxu0 %v4907_v1 }
 0x6d9   :  { %1342 = vmatpush1.msra.mxu0 %v1284_v24 }
 0x6da   :  { %1343 = vmatprep.subr.mxu0 %v4907_v1 }
 0x6db   :  { %1344 = vmatpush1.msra.mxu0 %v1283_v17 }
 0x6dc   :  { %1345 = vmatprep.subr.mxu0 %v4907_v1 }
 0x6dd   :  { %1346 = vmatpush1.msra.mxu0 %v1282_v13 }
 0x6de   :  { %1377 = vmatprep.subr.mxu0 %v4907_v1 }
 0x71d   :  { %v1276_v7 = vpop.f32.mrf.mxu1 }
 0x71e   :  { %v1298_v4 = vmul.f32 %v1276_v7, %v5421_v12  ;;  %v95_v12 = vld [vmem:[%s6762_s25 + $0x10] sm:$0xff] }
 0x71f   :  { %v4233_v61 = vpop.f32.mrf.mxu1 }
 0x720   :  { %1378 = vmatpush2.msra.mxu0 %v1298_v4 }
 0x721   :  { %v1279_v59 = vpop.f32.mrf.mxu1  ;;  %1380 = vmatmul.mubr.f32.vlgmr.msra.gmra.mxu0 %v93_v6  ;;  %4235 = vmatprep.subr.bf16.mxu0 %v4907_v1 }
 0x722   :  { %3689 = vmatprep.mubr.msk.f32.mxu0 %vm1299_vm7, %v96_v10  ;;  %4236 = vmatpush3.bf16.msra.mxu0 %v4582_v49 }
 0x723   :  { %v4234_v23 = vpop.f32.mrf.mxu1  ;;  %4237 = vmatprep.subr.bf16.mxu0 %v4907_v1 }
 0x725   :  { %1385 = vmatmul.mubr.f32.gmra.mxu0 %v95_v12 }
 0x726   :  { %3690 = vmatprep.mubr.msk.f32.mxu0 %vm1299_vm7, %v98_v21  ;;  %4238 = vmatpush3.bf16.msra.mxu0 %v4583_v47 }
 0x727   :  { %4251 = vmatprep.subr.bf16.mxu0 %v4907_v1 }
 0x729   :  { %1390 = vmatmul.mubr.f32.gmra.mxu0 %v97_v31 }
 0x72a   :  { %3691 = vmatprep.mubr.msk.f32.mxu0 %vm1299_vm7, %v100_v33 }
 0x72d   :  { %1395 = vmatmul.mubr.f32.gmra.mxu0 %v99_v41 }
 0x72e   :  { %3692 = vmatprep.mubr.msk.f32.mxu0 %vm1299_vm7, %v102_v34 }
 0x731   :  { %1400 = vmatmul.mubr.f32.gmra.mxu0 %v101_v40 }
 0x732   :  { %4239 = vmatprep.mubr.msk.bf16.mxu0 %vm4908_vm0, %v4907_v1 }
 0x7e1   :  { %v1381_v27 = vpop.f32.mrf.mxu0 }
 0x7e3   :  { %v1383_v32 = vpop.f32.mrf.mxu0 }
 0x7e5   :  { %v1386_v55 = vpop.f32.mrf.mxu0 }
 0x7e6   :  { %v1405_v43 = vpack.c.bf16 %v1386_v55, %v1381_v27 }
 0x7e7   :  { %v1388_v37 = vpop.f32.mrf.mxu0 }
 0x7e8   :  { %4240 = vmatmul.mubr.msk.bf16.vlgmr.msra.gmra.mxu0 %vm255_vm2, %v1405_v43  ;;  %v4584_v43 = vld [vmem:[%s6732_s15 + $0x8] sm:$0xff]   ;;  %v4585_v37 = vld [vmem:[%s6732_s15] sm:$0xff]  }
 0x7e9   :  { %v1391_v56 = vpop.f32.mrf.mxu0  ;;  %4243 = vmatprep.mubr.msk.bf16.mxu0 %vm4908_vm0, %v4907_v1  ;;  %4252 = vmatpush3.bf16.msra.mxu0 %v4584_v43 }
 0x7ea   :  { %4253 = vmatprep.subr.bf16.mxu0 %v4907_v1 }
 0x7eb   :  { %v1393_v3 = vpop.f32.mrf.mxu0 }
 0x7ec   :  { %v4587_v3 = vld [vmem:[%s6734_s17 + $0x30] sm:$0xff]  }
 0x7ed   :  { %v1396_v38 = vpop.f32.mrf.mxu0  ;;  %4254 = vmatpush3.bf16.msra.mxu0 %v4585_v37 }
 0x7ee   :  { %v1406_v42 = vpack.c.bf16 %v1396_v38, %v1391_v56  ;;  %4295 = vmatprep.subr.bf16.mxu0 %v4907_v1  ;;  %v4586_v56 = vld [vmem:[%s6734_s17 + $0x38] sm:$0xff]  }
 0x7ef   :  { %v1398_v51 = vpop.f32.mrf.mxu0  ;;  %4268 = vmatpush3.bf16.msra.mxu1 %v4586_v56 }
 0x7f0   :  { %4244 = vmatmul.mubr.msk.bf16.gmra.mxu0 %vm255_vm2, %v1406_v42  ;;  %4269 = vmatprep.subr.bf16.mxu1 %v4907_v1 }
 0x7f1   :  { %v1401_v44 = vpop.f32.mrf.mxu0  ;;  %4247 = vmatprep.mubr.msk.bf16.mxu0 %vm4908_vm0, %v4907_v1 }
 0x7f2   :  { %v1407_v11 = vpack.c.bf16 %v1401_v44, %v1401_v44 }
 0x7f3   :  { %v1403_v46 = vpop.f32.mrf.mxu0  ;;  %4270 = vmatpush3.bf16.msra.mxu1 %v4587_v3 }
 0x7f4   :  { %4271 = vmatprep.subr.bf16.mxu1 %v4907_v1 }
 0x7f8   :  { %4248 = vmatmul.mubr.msk.bf16.gmra.mxu0 %vm255_vm2, %v1407_v11 }
 0x7f9   :  { %4255 = vmatprep.mubr.msk.bf16.mxu0 %vm4908_vm0, %v4907_v1 }
 0x8a8   :  { %v1474_v50 = vpop.f32.mrf.mxu0 }
 0x8a9   :  { %v1475_v60 = vadd.f32 %v3693_v22, %v1474_v50 }
 0x8aa   :  { %v4241_v14 = vpop.f32.mrf.mxu0 }
 0x8ab   :  { %v5780_v8 = vadd.f32 %v1475_v60, %v5079_v15 }
 0x8ac   :  { %v1477_v58 = vpop.f32.mrf.mxu0 }
 0x8ad   :  { %v1478_v53 = vadd.f32 %v3693_v22, %v1477_v58  ;;  %v1501_v62 = vsel %vm255_vm2, %v5780_v8, 0.0 }
 0x8ae   :  { %1502 = vadd.xlane.f32.xlu0 %v1501_v62  ;;  %v4242_v18 = vpop.f32.mrf.mxu0 }
 0x8af   :  { %v5785_v29 = vadd.f32 %v1478_v53, %v5086_v20 }
 0x8b0   :  { %v1482_v9 = vpop.f32.mrf.mxu0 }
 0x8b1   :  { %v1483_v0 = vadd.f32 %v3693_v22, %v1482_v9  ;;  %v1504_v52 = vsel %vm255_vm2, %v5785_v29, 0.0 }
 0x8b2   :  { %1505 = vadd.xlane.f32.xlu1 %v1504_v52  ;;  %v4245_v63 = vpop.f32.mrf.mxu0 }
 0x8b3   :  { %v5790_v15 = vadd.f32 %v1483_v0, %v5093_v25 }
 0x8b4   :  { %v1485_v16 = vpop.f32.mrf.mxu0 }
 0x8b5   :  { %v1486_v5 = vadd.f32 %v3693_v22, %v1485_v16  ;;  %v1507_v26 = vsel %vm255_vm2, %v5790_v15, 0.0  ;;  %v4820_v16 = vld [vmem:[%s6725_s8] ss:$0 sm:$0xff] }
 0x8b6   :  { %1508 = vadd.xlane.f32.xlu0 %v1507_v26  ;;  %v4246_v19 = vpop.f32.mrf.mxu0 }
 0x8b7   :  { %v5795_v20 = vadd.f32 %v1486_v5, %v5100_v30 }
 0x8b8   :  { %v1490_v2 = vpop.f32.mrf.mxu0 }
 0x8b9   :  { %v1491_v57 = vadd.f32 %v3693_v22, %v1490_v2  ;;  %v1510_v54 = vsel %vm255_vm2, %v5795_v20, 0.0 }
 0x8ba   :  { %1511 = vadd.xlane.f32.xlu1 %v1510_v54  ;;  %v4249_v48 = vpop.f32.mrf.mxu0 }
 0x8bb   :  { %v5800_v25 = vadd.f32 %v1491_v57, %v5107_v35  ;;  %v4821_v57 = vld [vmem:[%s6726_s9] ss:$0 sm:$0xff] }
 0x8bc   :  { %v1493_v45 = vpop.f32.mrf.mxu0 }
 0x8bd   :  { %v1513_v39 = vsel %vm268_vm3, %v5800_v25, 0.0 }
 0x8be   :  { %1514 = vadd.xlane.f32.xlu0 %v1513_v39  ;;  %v4250_v36 = vpop.f32.mrf.mxu0 }
 0x937   :  { %v1503_v28 = vpop.xlane.xlu0 %1502 }
 0x938   :  { %v1516_v24 = vmul.f32 0.03125, %v1503_v28 }
 0x93a   :  { %v1521_v30 = vsub.f32 %v5780_v8, %v1516_v24 }
 0x93b   :  { %v1506_v17 = vpop.xlane.xlu1 %1505 }
 0x93c   :  { %v1517_v13 = vmul.f32 0.03125, %v1506_v17  ;;  %v1526_v7 = vmul.f32 %v1521_v30, %v1521_v30 }
 0x93e   :  { %v1522_v4 = vsub.f32 %v5785_v29, %v1517_v13  ;;  %v1531_v6 = vsel %vm255_vm2, %v1526_v7, 0.0 }
 0x93f   :  { %v1509_v61 = vpop.xlane.xlu0 %1508  ;;  %1532 = vadd.xlane.f32.xlu1 %v1531_v6 }
 0x940   :  { %v1518_v35 = vmul.f32 0.03125, %v1509_v61  ;;  %v1527_v10 = vmul.f32 %v1522_v4, %v1522_v4 }
 0x942   :  { %v1523_v59 = vsub.f32 %v5790_v15, %v1518_v35  ;;  %v1534_v12 = vsel %vm255_vm2, %v1527_v10, 0.0 }
 0x943   :  { %v1512_v23 = vpop.xlane.xlu1 %1511  ;;  %1535 = vadd.xlane.f32.xlu0 %v1534_v12  ;;  %v4589_v12 = vld [vmem:[%s6734_s17 + $0x20] sm:$0xff]  }
 0x944   :  { %v1519_v21 = vmul.f32 0.03125, %v1512_v23  ;;  %v1528_v31 = vmul.f32 %v1523_v59, %v1523_v59  ;;  %v4590_v23 = vld [vmem:[%s6734_s17 + $0x18] sm:$0xff]  }
 0x946   :  { %v1524_v33 = vsub.f32 %v5795_v20, %v1519_v21  ;;  %v1537_v41 = vsel %vm255_vm2, %v1528_v31, 0.0  ;;  %v4591_v21 = vld [vmem:[%s6734_s17 + $0x10] sm:$0xff]   ;;  %v4592_v31 = vld [vmem:[%s6734_s17 + $0x8] sm:$0xff]  }
 0x947   :  { %1538 = vadd.xlane.f32.xlu1 %v1537_v41  ;;  %v1515_v34 = vpop.xlane.xlu0 %1514  ;;  %v3699_v41 = vld [vmem:[%s6733_s16] ss:$0 sm:$0xff] }
 0x948   :  { %v1520_v40 = vmul.f32 0.03125, %v1515_v34  ;;  %v1529_v49 = vmul.f32 %v1524_v33, %v1524_v33 }
 0x94a   :  { %v1525_v47 = vsub.f32 %v5800_v25, %v1520_v40  ;;  %v1540_v27 = vsel %vm255_vm2, %v1529_v49, 0.0 }
 0x94b   :  { %1541 = vadd.xlane.f32.xlu0 %v1540_v27 }
 0x94c   :  { %v1530_v32 = vmul.f32 %v1525_v47, %v1525_v47 }
 0x94e   :  { %v1543_v55 = vsel %vm268_vm3, %v1530_v32, 0.0 }
 0x94f   :  { %1544 = vadd.xlane.f32.xlu1 %v1543_v55 }
 0x9c8   :  { %v1533_v38 = vpop.xlane.xlu1 %1532 }
 0x9c9   :  { %v1546_v42 = vmul.f32 0.03125, %v1533_v38 }
 0x9cb   :  { %v1551_v51 = vadd.f32 1e-05, %v1546_v42 }
 0x9cc   :  { %v1536_v44 = vpop.xlane.xlu0 %1535 }
 0x9cd   :  { %4692 = vrsqrt.f32 %v1551_v51  ;;  %v1547_v46 = vmul.f32 0.03125, %v1536_v44 }
 0x9cf   :  { %v1552_v11 = vadd.f32 1e-05, %v1547_v46 }
 0x9d0   :  { %v1539_v22 = vpop.xlane.xlu1 %1538 }
 0x9d1   :  { %4694 = vrsqrt.f32 %v1552_v11  ;;  %v1548_v50 = vmul.f32 0.03125, %v1539_v22 }
 0x9d3   :  { %v1553_v60 = vadd.f32 1e-05, %v1548_v50 }
 0x9d4   :  { %v1542_v14 = vpop.xlane.xlu0 %1541 }
 0x9d5   :  { %4696 = vrsqrt.f32 %v1553_v60  ;;  %v1549_v58 = vmul.f32 0.03125, %v1542_v14 }
 0x9d7   :  { %v1554_v53 = vadd.f32 1e-05, %v1549_v58 }
 0x9d8   :  { %v1545_v62 = vpop.xlane.xlu1 %1544 }
 0x9d9   :  { %4698 = vrsqrt.f32 %v1554_v53  ;;  %v1550_v18 = vmul.f32 0.03125, %v1545_v62 }
 0x9da   :  { %v4693_v9 = vpop.eup %4692 }
 0x9db   :  { %v1561_v0 = vmul.f32 %v4693_v9, %v1521_v30  ;;  %v1555_v52 = vadd.f32 1e-05, %v1550_v18 }
 0x9dd   :  { %4700 = vrsqrt.f32 %v1555_v52  ;;  %v1566_v5 = vmul.f32 %v4820_v16, %v1561_v0 }
 0x9de   :  { %v4695_v63 = vpop.eup %4694 }
 0x9df   :  { %v1562_v26 = vmul.f32 %v4695_v63, %v1522_v4  ;;  %v1571_v54 = vadd.f32 %v4821_v57, %v1566_v5 }
 0x9e1   :  { %v1567_v19 = vmul.f32 %v4820_v16, %v1562_v26 }
 0x9e2   :  { %v4697_v2 = vpop.eup %4696 }
 0x9e3   :  { %v1572_v48 = vadd.f32 %v4821_v57, %v1567_v19  ;;  %v1563_v45 = vmul.f32 %v4697_v2, %v1523_v59  ;;  %v4588_v59 = vld [vmem:[%s6734_s17 + $0x28] sm:$0xff]  }
 0x9e4   :  { %4272 = vmatpush3.bf16.msra.mxu1 %v4588_v59 }
 0x9e5   :  { %v1576_v39 = vpack.c.bf16 %v1572_v48, %v1571_v54  ;;  %v1568_v24 = vmul.f32 %v4820_v16, %v1563_v45  ;;  %4273 = vmatprep.subr.bf16.mxu1 %v4907_v1 }
 0x9e6   :  { %v4699_v36 = vpop.eup %4698 }
 0x9e7   :  { %4256 = vmatmul.mubr.msk.bf16.vlgmr.msra.gmra.mxu0 %vm255_vm2, %v1576_v39  ;;  %v1564_v28 = vmul.f32 %v4699_v36, %v1524_v33  ;;  %v1573_v13 = vadd.f32 %v4821_v57, %v1568_v24  ;;  %v4593_v33 = vld [vmem:[%s6734_s17] sm:$0xff]  }
 0x9e8   :  { %4259 = vmatprep.mubr.msk.bf16.mxu0 %vm4908_vm0, %v4907_v1  ;;  %4274 = vmatpush3.bf16.msra.mxu1 %v4589_v12 }
 0x9e9   :  { %v1569_v30 = vmul.f32 %v4820_v16, %v1564_v28  ;;  %4275 = vmatprep.subr.bf16.mxu1 %v4907_v1 }
 0x9ea   :  { %v4701_v17 = vpop.eup %4700 }
 0x9eb   :  { %v1574_v7 = vadd.f32 %v4821_v57, %v1569_v30  ;;  %v1565_v4 = vmul.f32 %v4701_v17, %v1525_v47 }
 0x9ec   :  { %4276 = vmatpush3.bf16.msra.mxu1 %v4590_v23 }
 0x9ed   :  { %v1577_v6 = vpack.c.bf16 %v1574_v7, %v1573_v13  ;;  %v1570_v61 = vmul.f32 %v4820_v16, %v1565_v4  ;;  %4277 = vmatprep.subr.bf16.mxu1 %v4907_v1 }
 0x9ef   :  { %4260 = vmatmul.mubr.msk.bf16.gmra.mxu0 %vm255_vm2, %v1577_v6  ;;  %v1575_v35 = vadd.f32 %v4821_v57, %v1570_v61 }
 0x9f0   :  { %4263 = vmatprep.mubr.msk.bf16.mxu0 %vm4908_vm0, %v4907_v1  ;;  %4278 = vmatpush3.bf16.msra.mxu1 %v4591_v21 }
 0x9f1   :  { %v1578_v10 = vpack.c.bf16 %v1575_v35, %v1575_v35  ;;  %4279 = vmatprep.subr.bf16.mxu1 %v4907_v1 }
 0x9f4   :  { %4280 = vmatpush3.bf16.msra.mxu1 %v4592_v31 }
 0x9f5   :  { %4281 = vmatprep.subr.bf16.mxu1 %v4907_v1 }
 0x9f7   :  { %4264 = vmatmul.mubr.msk.bf16.gmra.mxu0 %vm255_vm2, %v1578_v10 }
 0x9f8   :  { %4299 = vmatprep.mubr.msk.bf16.mxu0 %vm4908_vm0, %v4907_v1  ;;  %4282 = vmatpush3.bf16.msra.mxu1 %v4593_v33 }
 0x9f9   :  { %4311 = vmatprep.subr.bf16.mxu1 %v4907_v1 }
 0xaa7   :  { %v1645_v34 = vpop.f32.mrf.mxu0 }
 0xaa8   :  { %v1646_v40 = vadd.f32 %v3699_v41, %v1645_v34 }
 0xaa9   :  { %v4257_v49 = vpop.f32.mrf.mxu0 }
 0xaaa   :  { %v1667_v47 = vmul.f32 %v1646_v40, %v1646_v40 }
 0xaab   :  { %v1648_v27 = vpop.f32.mrf.mxu0 }
 0xaac   :  { %v1672_v32 = vmul.f32 %v1667_v47, %v1646_v40  ;;  %v1649_v55 = vadd.f32 %v3699_v41, %v1648_v27 }
 0xaad   :  { %v4258_v43 = vpop.f32.mrf.mxu0 }
 0xaae   :  { %v1677_v37 = vmul.f32 0.044715, %v1672_v32  ;;  %v1668_v56 = vmul.f32 %v1649_v55, %v1649_v55  ;;  %v3705_v43 = vld [vmem:[%s6735_s18] ss:$0 sm:$0xff] }
 0xaaf   :  { %v1653_v3 = vpop.f32.mrf.mxu0 }
 0xab0   :  { %v1682_v38 = vadd.f32 %v1677_v37, %v1646_v40  ;;  %v1673_v42 = vmul.f32 %v1668_v56, %v1649_v55  ;;  %v1654_v51 = vadd.f32 %v3699_v41, %v1653_v3 }
 0xab1   :  { %v4261_v44 = vpop.f32.mrf.mxu0 }
 0xab2   :  { %v1687_v46 = vmul.f32 0.7978846, %v1682_v38  ;;  %v1678_v11 = vmul.f32 0.044715, %v1673_v42  ;;  %v1669_v22 = vmul.f32 %v1654_v51, %v1654_v51 }
 0xab3   :  { %v1656_v50 = vpop.f32.mrf.mxu0 }
 0xab4   :  { %4702 = vtanh.f32 %v1687_v46  ;;  %v1683_v60 = vadd.f32 %v1678_v11, %v1649_v55  ;;  %v1674_v14 = vmul.f32 %v1669_v22, %v1654_v51  ;;  %v1657_v58 = vadd.f32 %v3699_v41, %v1656_v50 }
 0xab5   :  { %v4262_v53 = vpop.f32.mrf.mxu0 }
 0xab6   :  { %v1688_v62 = vmul.f32 0.7978846, %v1683_v60  ;;  %v1679_v18 = vmul.f32 0.044715, %v1674_v14  ;;  %v1670_v9 = vmul.f32 %v1657_v58, %v1657_v58 }
 0xab7   :  { %v1661_v0 = vpop.f32.mrf.mxu0 }
 0xab8   :  { %4704 = vtanh.f32 %v1688_v62  ;;  %v1684_v52 = vadd.f32 %v1679_v18, %v1654_v51  ;;  %v1675_v63 = vmul.f32 %v1670_v9, %v1657_v58  ;;  %v1662_v16 = vadd.f32 %v3699_v41, %v1661_v0 }
 0xab9   :  { %v4265_v5 = vpop.f32.mrf.mxu0 }
 0xaba   :  { %v1689_v26 = vmul.f32 0.7978846, %v1684_v52  ;;  %v1680_v19 = vmul.f32 0.044715, %v1675_v63  ;;  %v1671_v2 = vmul.f32 %v1662_v16, %v1662_v16 }
 0xabb   :  { %v1664_v57 = vpop.f32.mrf.mxu0 }
 0xabc   :  { %4706 = vtanh.f32 %v1689_v26  ;;  %v1685_v54 = vadd.f32 %v1680_v19, %v1657_v58  ;;  %v1676_v48 = vmul.f32 %v1671_v2, %v1662_v16 }
 0xabd   :  { %v4266_v45 = vpop.f32.mrf.mxu0 }
 0xabe   :  { %v1690_v39 = vmul.f32 0.7978846, %v1685_v54  ;;  %v1681_v36 = vmul.f32 0.044715, %v1676_v48 }
 0xac0   :  { %4708 = vtanh.f32 %v1690_v39  ;;  %v1686_v28 = vadd.f32 %v1681_v36, %v1662_v16 }
 0xac1   :  { %v4703_v24 = vpop.eup %4702 }
 0xac2   :  { %v1697_v30 = vadd.f32 1.0, %v4703_v24  ;;  %v1691_v17 = vmul.f32 0.7978846, %v1686_v28 }
 0xac4   :  { %4710 = vtanh.f32 %v1691_v17  ;;  %v1702_v7 = vmul.f32 0.5, %v1697_v30 }
 0xac5   :  { %v4705_v13 = vpop.eup %4704 }
 0xac6   :  { %v1698_v4 = vadd.f32 1.0, %v4705_v13  ;;  %v1707_v35 = vmul.f32 %v1702_v7, %v1646_v40 }
 0xac8   :  { %v1703_v6 = vmul.f32 0.5, %v1698_v4 }
 0xac9   :  { %v4707_v61 = vpop.eup %4706 }
 0xaca   :  { %v1708_v10 = vmul.f32 %v1703_v6, %v1649_v55  ;;  %v1699_v59 = vadd.f32 1.0, %v4707_v61 }
 0xacc   :  { %v1712_v12 = vpack.c.bf16 %v1708_v10, %v1707_v35  ;;  %v1704_v31 = vmul.f32 0.5, %v1699_v59 }
 0xacd   :  { %v4709_v23 = vpop.eup %4708 }
 0xace   :  { %4284 = vmatmul.mubr.bf16.vlgmr.msra.gmra.mxu1 %v1712_v12  ;;  %v1700_v21 = vadd.f32 1.0, %v4709_v23  ;;  %v1709_v34 = vmul.f32 %v1704_v31, %v1654_v51  ;;  %v4594_v31 = vld [vmem:[%s6727_s10 + $0x18] sm:$0xff]  }
 0xacf   :  { %4287 = vmatprep.mubr.msk.bf16.mxu1 %vm4908_vm0, %v4907_v1  ;;  %4296 = vmatpush3.bf16.msra.mxu0 %v4594_v31 }
 0xad0   :  { %v1705_v33 = vmul.f32 0.5, %v1700_v21  ;;  %4297 = vmatprep.subr.bf16.mxu0 %v4907_v1 }
 0xad1   :  { %v4711_v41 = vpop.eup %4710 }
 0xad2   :  { %v1710_v49 = vmul.f32 %v1705_v33, %v1657_v58  ;;  %v1701_v47 = vadd.f32 1.0, %v4711_v41  ;;  %v4595_v33 = vld [vmem:[%s6728_s11 + $0x18] sm:$0xff]   ;;  %v4596_v41 = vld [vmem:[%s6727_s10 + $0x10] sm:$0xff]  }
 0xad3   :  { %4312 = vmatpush3.bf16.msra.mxu1 %v4595_v33  ;;  %4298 = vmatpush3.bf16.msra.mxu0 %v4596_v41 }
 0xad4   :  { %v1713_v27 = vpack.c.bf16 %v1710_v49, %v1709_v34  ;;  %v1706_v32 = vmul.f32 0.5, %v1701_v47  ;;  %v4597_v34 = vld [vmem:[%s6728_s11 + $0x10] sm:$0xff]   ;;  %4313 = vmatprep.subr.bf16.mxu1 %v4907_v1  ;;  %4327 = vmatprep.subr.bf16.mxu0 %v4907_v1  ;;  %s6763_s11 = sld [smem:[#allocation12_spill]] }
 0xad6   :  { %4288 = vmatmul.mubr.bf16.gmra.mxu1 %v1713_v27  ;;  %v1711_v40 = vmul.f32 %v1706_v32, %v1662_v16 }
 0xad7   :  { %4291 = vmatprep.mubr.msk.bf16.mxu1 %vm4908_vm0, %v4907_v1  ;;  %4314 = vmatpush3.bf16.msra.mxu1 %v4597_v34 }
 0xad8   :  { %v1714_v55 = vpack.c.bf16 %v1711_v40, %v1711_v40  ;;  %4343 = vmatprep.subr.mxu1 %v4907_v1 }
 0xade   :  { %4292 = vmatmul.mubr.bf16.gmra.mxu1 %v1714_v55 }
 0xadf   :  { %4315 = vmatprep.mubr.msk.bf16.mxu1 %vm4908_vm0, %v4907_v1 }
 0xb8e   :  { %v1820_v37 = vpop.f32.mrf.mxu1 }
 0xb8f   :  { %v1821_v56 = vadd.f32 %v3705_v43, %v1820_v37 }
 0xb90   :  { %v4285_v3 = vpop.f32.mrf.mxu1 }
 0xb91   :  { %v5882_v38 = vadd.f32 %v1821_v56, %v5780_v8 }
 0xb92   :  { %v1823_v42 = vpop.f32.mrf.mxu1 }
 0xb93   :  { %v1824_v51 = vadd.f32 %v3705_v43, %v1823_v42  ;;  %v1851_v44 = vsel %vm255_vm2, %v5882_v38, 0.0 }
 0xb94   :  { %1852 = vadd.xlane.f32.xlu0 %v1851_v44  ;;  %v4286_v46 = vpop.f32.mrf.mxu1 }
 0xb95   :  { %v5887_v11 = vadd.f32 %v1824_v51, %v5785_v29 }
 0xb96   :  { %v1828_v22 = vpop.f32.mrf.mxu1 }
 0xb97   :  { %v1829_v50 = vadd.f32 %v3705_v43, %v1828_v22  ;;  %v1854_v60 = vsel %vm255_vm2, %v5887_v11, 0.0 }
 0xb98   :  { %1855 = vadd.xlane.f32.xlu1 %v1854_v60  ;;  %v4289_v14 = vpop.f32.mrf.mxu1 }
 0xb99   :  { %v5892_v8 = vadd.f32 %v1829_v50, %v5790_v15  ;;  %v3716_v14 = vld [vmem:[%s6725_s8 + $0x1] ss:$0 sm:$0xff] }
 0xb9a   :  { %v1831_v58 = vpop.f32.mrf.mxu1 }
 0xb9b   :  { %v1832_v53 = vadd.f32 %v3705_v43, %v1831_v58  ;;  %v1857_v62 = vsel %vm255_vm2, %v5892_v8, 0.0 }
 0xb9c   :  { %1858 = vadd.xlane.f32.xlu0 %v1857_v62  ;;  %v4290_v18 = vpop.f32.mrf.mxu1 }
 0xb9d   :  { %v5897_v29 = vadd.f32 %v1832_v53, %v5795_v20  ;;  %v3717_v18 = vld [vmem:[%s6726_s9 + $0x1] ss:$0 sm:$0xff] }
 0xb9e   :  { %v1836_v9 = vpop.f32.mrf.mxu1 }
 0xb9f   :  { %v1837_v0 = vadd.f32 %v3705_v43, %v1836_v9  ;;  %v1860_v52 = vsel %vm255_vm2, %v5897_v29, 0.0 }
 0xba0   :  { %1861 = vadd.xlane.f32.xlu1 %v1860_v52  ;;  %v4293_v63 = vpop.f32.mrf.mxu1 }
 0xba1   :  { %v5902_v15 = vadd.f32 %v1837_v0, %v5800_v25 }
 0xba2   :  { %v1839_v16 = vpop.f32.mrf.mxu1 }
 0xba3   :  { %v1863_v5 = vsel %vm268_vm3, %v5902_v15, 0.0 }
 0xba4   :  { %1864 = vadd.xlane.f32.xlu0 %v1863_v5  ;;  %v4294_v26 = vpop.f32.mrf.mxu1 }
 0xba5   :  { %v4598_v26 = vld [vmem:[%s6729_s12 + $0x18] sm:$0xff]  }
 0xc1d   :  { %v1853_v19 = vpop.xlane.xlu0 %1852 }
 0xc1e   :  { %v1866_v2 = vmul.f32 0.03125, %v1853_v19 }
 0xc20   :  { %v1871_v20 = vsub.f32 %v5882_v38, %v1866_v2 }
 0xc21   :  { %v1856_v57 = vpop.xlane.xlu1 %1855 }
 0xc22   :  { %v1867_v54 = vmul.f32 0.03125, %v1856_v57  ;;  %v1876_v48 = vmul.f32 %v1871_v20, %v1871_v20 }
 0xc24   :  { %v1872_v45 = vsub.f32 %v5887_v11, %v1867_v54  ;;  %v1881_v39 = vsel %vm255_vm2, %v1876_v48, 0.0  ;;  %v4599_v54 = vld [vmem:[%s6729_s12 + $0x10] sm:$0xff]  }
 0xc25   :  { %v1859_v36 = vpop.xlane.xlu0 %1858  ;;  %1882 = vadd.xlane.f32.xlu1 %v1881_v39 }
 0xc26   :  { %v1868_v25 = vmul.f32 0.03125, %v1859_v36  ;;  %v1877_v28 = vmul.f32 %v1872_v45, %v1872_v45 }
 0xc28   :  { %v1873_v24 = vsub.f32 %v5892_v8, %v1868_v25  ;;  %v1884_v30 = vsel %vm255_vm2, %v1877_v28, 0.0 }
 0xc29   :  { %v1862_v17 = vpop.xlane.xlu1 %1861  ;;  %1885 = vadd.xlane.f32.xlu0 %v1884_v30 }
 0xc2a   :  { %v1869_v13 = vmul.f32 0.03125, %v1862_v17  ;;  %v1878_v7 = vmul.f32 %v1873_v24, %v1873_v24 }
 0xc2c   :  { %v1874_v4 = vsub.f32 %v5897_v29, %v1869_v13  ;;  %v1887_v6 = vsel %vm255_vm2, %v1878_v7, 0.0 }
 0xc2d   :  { %1888 = vadd.xlane.f32.xlu1 %v1887_v6  ;;  %v1865_v61 = vpop.xlane.xlu0 %1864 }
 0xc2e   :  { %v1870_v35 = vmul.f32 0.03125, %v1865_v61  ;;  %v1879_v10 = vmul.f32 %v1874_v4, %v1874_v4 }
 0xc30   :  { %v5914_v59 = vsub.f32 %v5902_v15, %v1870_v35  ;;  %v1890_v12 = vsel %vm255_vm2, %v1879_v10, 0.0 }
 0xc31   :  { %1891 = vadd.xlane.f32.xlu0 %v1890_v12 }
 0xc32   :  { %v1880_v23 = vmul.f32 %v5914_v59, %v5914_v59 }
 0xc34   :  { %v1893_v21 = vsel %vm268_vm3, %v1880_v23, 0.0 }
 0xc35   :  { %1894 = vadd.xlane.f32.xlu1 %v1893_v21 }
 0xcae   :  { %v1883_v49 = vpop.xlane.xlu1 %1882 }
 0xcaf   :  { %v1896_v47 = vmul.f32 0.03125, %v1883_v49 }
 0xcb1   :  { %v1901_v27 = vadd.f32 1e-05, %v1896_v47 }
 0xcb2   :  { %v1886_v32 = vpop.xlane.xlu0 %1885 }
 0xcb3   :  { %4712 = vrsqrt.f32 %v1901_v27  ;;  %v1897_v40 = vmul.f32 0.03125, %v1886_v32 }
 0xcb5   :  { %v1902_v55 = vadd.f32 1e-05, %v1897_v40 }
 0xcb6   :  { %v1889_v43 = vpop.xlane.xlu1 %1888 }
 0xcb7   :  { %4714 = vrsqrt.f32 %v1902_v55  ;;  %v1898_v37 = vmul.f32 0.03125, %v1889_v43 }
 0xcb9   :  { %v1903_v56 = vadd.f32 1e-05, %v1898_v37 }
 0xcba   :  { %v1892_v3 = vpop.xlane.xlu0 %1891 }
 0xcbb   :  { %4716 = vrsqrt.f32 %v1903_v56  ;;  %v1899_v42 = vmul.f32 0.03125, %v1892_v3 }
 0xcbd   :  { %v1904_v51 = vadd.f32 1e-05, %v1899_v42 }
 0xcbe   :  { %v1895_v44 = vpop.xlane.xlu1 %1894 }
 0xcbf   :  { %4718 = vrsqrt.f32 %v1904_v51  ;;  %v1900_v46 = vmul.f32 0.03125, %v1895_v44 }
 0xcc0   :  { %v4713_v22 = vpop.eup %4712 }
 0xcc1   :  { %v1911_v50 = vmul.f32 %v4713_v22, %v1871_v20  ;;  %v1905_v60 = vadd.f32 1e-05, %v1900_v46  ;;  %v4822_v46 = vld [vmem:[%s6759_s5] sm:$0xff] }
 0xcc3   :  { %4720 = vrsqrt.f32 %v1905_v60  ;;  %v1922_v53 = vmul.f32 %v3716_v14, %v1911_v50 }
 0xcc4   :  { %v4715_v58 = vpop.eup %4714 }
 0xcc5   :  { %v1912_v62 = vmul.f32 %v4715_v58, %v1872_v45  ;;  %v1933_v52 = vadd.f32 %v3717_v18, %v1922_v53 }
 0xcc7   :  { %v1923_v9 = vmul.f32 %v3716_v14, %v1912_v62 }
 0xcc8   :  { %v4717_v0 = vpop.eup %4716 }
 0xcc9   :  { %v1934_v63 = vadd.f32 %v3717_v18, %v1923_v9  ;;  %v1913_v16 = vmul.f32 %v4717_v0, %v1873_v24 }
 0xccb   :  { %v1938_v5 = vpack.c.bf16 %v1934_v63, %v1933_v52  ;;  %v1924_v20 = vmul.f32 %v3716_v14, %v1913_v16  ;;  %v4825_v63 = vld [vmem:[%s6759_s5 + $0x18] sm:$0xff] }
 0xccc   :  { %v4719_v19 = vpop.eup %4718 }
 0xccd   :  { %4300 = vmatmul.mubr.msk.bf16.vlgmr.msra.gmra.mxu0 %vm255_vm2, %v1938_v5  ;;  %4316 = vmatmul.mubr.msk.bf16.vlgmr.msra.gmra.mxu1 %vm255_vm2, %v1938_v5  ;;  %v1914_v2 = vmul.f32 %v4719_v19, %v1874_v4  ;;  %v1935_v45 = vadd.f32 %v3717_v18, %v1924_v20  ;;  %v4826_v19 = vld [vmem:[%s6759_s5 + $0x20] sm:$0xff] }
 0xcce   :  { %4303 = vmatprep.mubr.msk.bf16.mxu0 %vm4908_vm0, %v4907_v1  ;;  %4319 = vmatprep.mubr.msk.bf16.mxu1 %vm4908_vm0, %v4907_v1 }
 0xccf   :  { %v1925_v57 = vmul.f32 %v3716_v14, %v1914_v2  ;;  %4328 = vmatpush3.bf16.msra.mxu0 %v4598_v26 }
 0xcd0   :  { %v4721_v48 = vpop.eup %4720  ;;  %4329 = vmatprep.subr.bf16.mxu0 %v4907_v1 }
 0xcd1   :  { %v1936_v39 = vadd.f32 %v3717_v18, %v1925_v57  ;;  %v1915_v36 = vmul.f32 %v4721_v48, %v5914_v59  ;;  %v4827_v48 = vld [vmem:[%s6759_s5 + $0x28] sm:$0xff] }
 0xcd3   :  { %v1939_v25 = vpack.c.bf16 %v1936_v39, %v1935_v45  ;;  %v1926_v28 = vmul.f32 %v3716_v14, %v1915_v36  ;;  %4330 = vmatpush3.bf16.msra.mxu0 %v4599_v54  ;;  %v4823_v14 = vld [vmem:[%s6759_s5 + $0x8] sm:$0xff]  ;;  %v4828_v39 = vld [vmem:[%s6759_s5 + $0x30] sm:$0xff]  ;;  %v4829_v36 = vld [vmem:[%s6759_s5 + $0x38] sm:$0xff] }
 0xcd4   :  { %4404 = vmatprep.subr.bf16.mxu0 %v4907_v1 }
 0xcd5   :  { %4304 = vmatmul.mubr.msk.bf16.gmra.mxu0 %vm255_vm2, %v1939_v25  ;;  %4320 = vmatmul.mubr.msk.bf16.gmra.mxu1 %vm255_vm2, %v1939_v25  ;;  %v1937_v24 = vadd.f32 %v3717_v18, %v1926_v28  ;;  %v4824_v18 = vld [vmem:[%s6759_s5 + $0x10] sm:$0xff]  ;;  %v4831_v28 = vld [vmem:[%s6759_s5 + $0x48] sm:$0xff] }
 0xcd6   :  { %4307 = vmatprep.mubr.msk.bf16.mxu0 %vm4908_vm0, %v4907_v1  ;;  %4323 = vmatprep.mubr.msk.bf16.mxu1 %vm4908_vm0, %v4907_v1 }
 0xcd7   :  { %v1940_v30 = vpack.c.bf16 %v1937_v24, %v1937_v24  ;;  %v4832_v24 = vld [vmem:[%s6759_s5 + $0x50] sm:$0xff] }
 0xcdd   :  { %4308 = vmatmul.mubr.msk.bf16.gmra.mxu0 %vm255_vm2, %v1940_v30  ;;  %4324 = vmatmul.mubr.msk.bf16.gmra.mxu1 %vm255_vm2, %v1940_v30 }
 0xcde   :  { %4331 = vmatprep.mubr.msk.bf16.mxu0 %vm4908_vm0, %v4907_v1  ;;  %4353 = vmatprep.mubr.msk.f32.mxu1 %vm4908_vm0, %v4907_v1 }
 0xce5   :  { %4332 = vmatmul.mubr.msk.bf16.vlgmr.msra.gmra.mxu0 %vm255_vm2, %v1938_v5 }
 0xce6   :  { %4335 = vmatprep.mubr.msk.bf16.mxu0 %vm4908_vm0, %v4907_v1 }
 0xced   :  { %4336 = vmatmul.mubr.msk.bf16.gmra.mxu0 %vm255_vm2, %v1939_v25  ;;  %v4830_v25 = vld [vmem:[%s6759_s5 + $0x40] sm:$0xff] }
 0xcee   :  { %4339 = vmatprep.mubr.msk.bf16.mxu0 %vm4908_vm0, %v4907_v1 }
 0xcf5   :  { %4340 = vmatmul.mubr.msk.bf16.gmra.mxu0 %vm255_vm2, %v1940_v30  ;;  %v4833_v30 = vld [vmem:[%s6759_s5 + $0x58] sm:$0xff] }
 0xcf6   :  { %4410 = vmatprep.mubr.msk.bf16.mxu0 %vm4908_vm0, %v4907_v1 }
 0xd8d   :  { %v2001_v17 = vpop.f32.mrf.mxu0  ;;  %v2074_v13 = vpop.f32.mrf.mxu1 }
 0xd8f   :  { %v4301_v7 = vpop.f32.mrf.mxu0  ;;  %v4317_v4 = vpop.f32.mrf.mxu1 }
 0xd90   :  { %v4836_v7 = vld [vmem:[%s6759_s5 + $0x70] sm:$0xff]  ;;  %v4837_v4 = vld [vmem:[%s6759_s5 + $0x78] sm:$0xff] }
 0xd91   :  { %v2004_v6 = vpop.f32.mrf.mxu0  ;;  %v2077_v61 = vpop.f32.mrf.mxu1 }
 0xd92   :  { %v2348_v58 = vpack.c.bf16 %v2077_v61, %v2074_v13  ;;  %v4835_v13 = vld [vmem:[%s6759_s5 + $0x68] sm:$0xff] }
 0xd93   :  { %v4302_v35 = vpop.f32.mrf.mxu0  ;;  %v4318_v10 = vpop.f32.mrf.mxu1 }
 0xd94   :  { %v2379_v9 = vsel %vm255_vm2, %v2348_v58, 0  ;;  %v6144_v58 = vld [vmem:[%s6760_s28 + $0x30] sm:$0xff] }
 0xd95   :  { %v2009_v59 = vpop.f32.mrf.mxu0  ;;  %v2082_v12 = vpop.f32.mrf.mxu1 }
 0xd97   :  { %v4305_v23 = vpop.f32.mrf.mxu0  ;;  %v4321_v21 = vpop.f32.mrf.mxu1 }
 0xd98   :  { %v6105_v23 = vld [vmem:[%s6760_s28 + $0x8] sm:$0xff] }
 0xd99   :  { %v2012_v31 = vpop.f32.mrf.mxu0  ;;  %v2085_v33 = vpop.f32.mrf.mxu1 }
 0xd9a   :  { %v2349_v42 = vpack.c.bf16 %v2085_v33, %v2082_v12 }
 0xd9b   :  { %v4306_v41 = vpop.f32.mrf.mxu0  ;;  %v4322_v34 = vpop.f32.mrf.mxu1 }
 0xd9c   :  { %v2382_v22 = vsel %vm255_vm2, %v2349_v42, 0 }
 0xd9d   :  { %v2017_v49 = vpop.f32.mrf.mxu0  ;;  %v2090_v47 = vpop.f32.mrf.mxu1 }
 0xd9e   :  { %v2350_v27 = vpack.c.bf16 %v2090_v47, %v2090_v47  ;;  %4344 = vmatpush3.msk.msra.mxu1 %vm625_vm4, %v2017_v49  ;;  %v6114_v49 = vld [vmem:[%s6760_s28 + $0x10] sm:$0xff] }
 0xd9f   :  { %v4309_v32 = vpop.f32.mrf.mxu0  ;;  %v4325_v40 = vpop.f32.mrf.mxu1  ;;  %4345 = vmatprep.subr.mxu1 %v4907_v1 }
 0xda0   :  { %v2385_v55 = vsel %vm255_vm2, %v2350_v27, 0  ;;  %4346 = vmatpush3.msra.mxu1 %v2012_v31  ;;  %v6120_v32 = vld [vmem:[%s6760_s28 + $0x18] sm:$0xff] }
 0xda1   :  { %v2020_v43 = vpop.f32.mrf.mxu0  ;;  %v2093_v37 = vpop.f32.mrf.mxu1  ;;  %4347 = vmatprep.subr.mxu1 %v4907_v1  ;;  %4405 = vmatpush3.bf16.xpose.msra.mxu0 %v2385_v55 }
 0xda2   :  { %4348 = vmatpush3.msra.mxu1 %v2009_v59  ;;  %4406 = vmatprep.subr.bf16.mxu0 %v4907_v1  ;;  %v6099_v59 = vld [vmem:[%s6760_s28] sm:$0xff] }
 0xda3   :  { %v4310_v56 = vpop.f32.mrf.mxu0  ;;  %v4326_v3 = vpop.f32.mrf.mxu1  ;;  %4349 = vmatprep.subr.mxu1 %v4907_v1 }
 0xda4   :  { %4350 = vmatpush3.msra.mxu1 %v2004_v6  ;;  %v4838_v6 = vld [vmem:[%s6759_s5 + $0x80] sm:$0xff] }
 0xda5   :  { %v2147_v51 = vpop.f32.mrf.mxu0  ;;  %4351 = vmatprep.subr.mxu1 %v4907_v1  ;;  %v6129_v3 = vld [vmem:[%s6760_s28 + $0x20] sm:$0xff] }
 0xda6   :  { %4352 = vmatpush3.msra.mxu1 %v2001_v17  ;;  %v4834_v17 = vld [vmem:[%s6759_s5 + $0x60] sm:$0xff] }
 0xda7   :  { %v4333_v44 = vpop.f32.mrf.mxu0  ;;  %4354 = vmatmul.mubr.msk.f32.vlgmr.msra.gmra.mxu1 %vm573_vm6, %v4822_v46  ;;  %4446 = vmatprep.subr.bf16.mxu1 %v4907_v1 }
 0xda8   :  { %4356 = vmatprep.mubr.msk.f32.mxu1 %vm4908_vm0, %v4907_v1  ;;  %v6135_v44 = vld [vmem:[%s6760_s28 + $0x28] sm:$0xff] }
 0xda9   :  { %v2150_v50 = vpop.f32.mrf.mxu0  ;;  %4407 = vmatpush3.bf16.xpose.msra.mxu0 %v2382_v22 }
 0xdaa   :  { %4408 = vmatprep.subr.bf16.mxu0 %v4907_v1  ;;  %v2687_v45 = vpack.c.bf16 %v2150_v50, %v2147_v51 }
 0xdab   :  { %v4334_v60 = vpop.f32.mrf.mxu0  ;;  %4357 = vmatmul.mubr.msk.f32.gmra.mxu1 %vm573_vm6, %v4823_v14 }
 0xdac   :  { %4359 = vmatprep.mubr.msk.f32.mxu1 %vm4908_vm0, %v4907_v1 }
 0xdad   :  { %v2155_v53 = vpop.f32.mrf.mxu0 }
 0xdaf   :  { %v4337_v62 = vpop.f32.mrf.mxu0  ;;  %4360 = vmatmul.mubr.msk.f32.gmra.mxu1 %vm573_vm6, %v4824_v18  ;;  %v6150_v18 = vld [vmem:[%s6760_s28 + $0x38] sm:$0xff] }
 0xdb0   :  { %4362 = vmatprep.mubr.msk.f32.mxu1 %vm4908_vm0, %v4907_v1 }
 0xdb1   :  { %v2158_v0 = vpop.f32.mrf.mxu0  ;;  %4409 = vmatpush3.bf16.xpose.msra.mxu0 %v2379_v9 }
 0xdb2   :  { %2841 = vmatprep.subr.mxu0 %v4907_v1  ;;  %v2688_v57 = vpack.c.bf16 %v2158_v0, %v2155_v53 }
 0xdb3   :  { %v4338_v52 = vpop.f32.mrf.mxu0  ;;  %4363 = vmatmul.mubr.msk.f32.gmra.mxu1 %vm573_vm6, %v4825_v63 }
 0xdb4   :  { %4365 = vmatprep.mubr.msk.f32.mxu1 %vm4908_vm0, %v4907_v1 }
 0xdb5   :  { %v2163_v16 = vpop.f32.mrf.mxu0 }
 0xdb6   :  { %v2689_v5 = vpack.c.bf16 %v2163_v16, %v2163_v16 }
 0xdb7   :  { %v4341_v26 = vpop.f32.mrf.mxu0  ;;  %4366 = vmatmul.mubr.msk.f32.gmra.mxu1 %vm573_vm6, %v4826_v19 }
 0xdb8   :  { %v2718_v2 = vsel %vm1174_vm5, %v2689_v5, 0  ;;  %4368 = vmatprep.mubr.msk.f32.mxu1 %vm4908_vm0, %v4907_v1  ;;  %v6159_v5 = vld [vmem:[%s6760_s28 + $0x40] sm:$0xff] }
 0xdb9   :  { %v2166_v20 = vpop.f32.mrf.mxu0  ;;  %4447 = vmatpush3.bf16.msra.mxu1 %v2718_v2  ;;  %v6165_v2 = vld [vmem:[%s6760_s28 + $0x48] sm:$0xff] }
 0xdba   :  { %4448 = vmatprep.subr.bf16.mxu1 %v4907_v1 }
 0xdbb   :  { %v4342_v54 = vpop.f32.mrf.mxu0  ;;  %4369 = vmatmul.mubr.msk.f32.gmra.mxu1 %vm573_vm6, %v4827_v48 }
 0xdbc   :  { %4371 = vmatprep.mubr.msk.f32.mxu1 %vm4908_vm0, %v4907_v1 }
 0xdbd   :  { %4449 = vmatpush3.bf16.msra.mxu1 %v2688_v57 }
 0xdbe   :  { %4450 = vmatprep.subr.bf16.mxu1 %v4907_v1 }
 0xdbf   :  { %4372 = vmatmul.mubr.msk.f32.gmra.mxu1 %vm573_vm6, %v4828_v39  ;;  %v6174_v39 = vld [vmem:[%s6760_s28 + $0x50] sm:$0xff] }
 0xdc0   :  { %4374 = vmatprep.mubr.msk.f32.mxu1 %vm4908_vm0, %v4907_v1 }
 0xdc1   :  { %4451 = vmatpush3.bf16.msra.mxu1 %v2687_v45 }
 0xdc2   :  { %4520 = vmatprep.subr.bf16.mxu1 %v4907_v1 }
 0xdc3   :  { %4375 = vmatmul.mubr.msk.f32.gmra.mxu1 %vm573_vm6, %v4829_v36 }
 0xdc4   :  { %4377 = vmatprep.mubr.msk.f32.mxu1 %vm4908_vm0, %v4907_v1 }
 0xdc7   :  { %4378 = vmatmul.mubr.msk.f32.gmra.mxu1 %vm573_vm6, %v4830_v25 }
 0xdc8   :  { %4380 = vmatprep.mubr.msk.f32.mxu1 %vm4908_vm0, %v4907_v1 }
 0xdcb   :  { %4381 = vmatmul.mubr.msk.f32.gmra.mxu1 %vm573_vm6, %v4831_v28  ;;  %v6180_v28 = vld [vmem:[%s6760_s28 + $0x58] sm:$0xff] }
 0xdcc   :  { %4383 = vmatprep.mubr.msk.f32.mxu1 %vm4908_vm0, %v4907_v1 }
 0xdcf   :  { %4384 = vmatmul.mubr.msk.f32.gmra.mxu1 %vm573_vm6, %v4832_v24 }
 0xdd0   :  { %4386 = vmatprep.mubr.msk.f32.mxu1 %vm4908_vm0, %v4907_v1 }
 0xdd3   :  { %4387 = vmatmul.mubr.msk.f32.gmra.mxu1 %vm573_vm6, %v4833_v30 }
 0xdd4   :  { %4389 = vmatprep.mubr.msk.f32.mxu1 %vm4908_vm0, %v4907_v1 }
 0xdd7   :  { %4390 = vmatmul.mubr.msk.f32.gmra.mxu1 %vm573_vm6, %v4834_v17 }
 0xdd8   :  { %4392 = vmatprep.mubr.msk.f32.mxu1 %vm4908_vm0, %v4907_v1 }
 0xddb   :  { %4393 = vmatmul.mubr.msk.f32.gmra.mxu1 %vm573_vm6, %v4835_v13 }
 0xddc   :  { %4395 = vmatprep.mubr.msk.f32.mxu1 %vm4908_vm0, %v4907_v1 }
 0xddf   :  { %4396 = vmatmul.mubr.msk.f32.gmra.mxu1 %vm573_vm6, %v4836_v7 }
 0xde0   :  { %4398 = vmatprep.mubr.msk.f32.mxu1 %vm4908_vm0, %v4907_v1 }
 0xde3   :  { %4399 = vmatmul.mubr.msk.f32.gmra.mxu1 %vm573_vm6, %v4837_v4  ;;  %v6189_v4 = vld [vmem:[%s6760_s28 + $0x60] sm:$0xff] }
 0xde4   :  { %4401 = vmatprep.mubr.msk.f32.mxu1 %vm4908_vm0, %v4907_v1 }
 0xde7   :  { %4402 = vmatmul.mubr.msk.f32.gmra.mxu1 %vm573_vm6, %v4838_v6 }
 0xde8   :  { %4452 = vmatprep.mubr.msk.bf16.mxu1 %vm4908_vm0, %v4907_v1 }
 0xe67   :  { %v2238_v61 = vpop.f32.mrf.mxu1 }
 0xe68   :  { %v2322_v12 = vmul.f32 %v6099_v59, %v2238_v61 }
 0xe69   :  { %v4355_v35 = vpop.f32.mrf.mxu1 }
 0xe6a   :  { %v6195_v35 = vld [vmem:[%s6760_s28 + $0x68] sm:$0xff] }
 0xe6b   :  { %v2243_v10 = vpop.f32.mrf.mxu1 }
 0xe6c   :  { %v2323_v21 = vmul.f32 %v6105_v23, %v2243_v10 }
 0xe6d   :  { %v4358_v31 = vpop.f32.mrf.mxu1 }
 0xe6e   :  { %v2339_v33 = vpack.c.bf16 %v2323_v21, %v2322_v12 }
 0xe6f   :  { %v2248_v41 = vpop.f32.mrf.mxu1 }
 0xe70   :  { %4411 = vmatmul.mubr.msk.bf16.vlgmr.msra.gmra.mxu0 %vm255_vm2, %v2339_v33  ;;  %v2324_v47 = vmul.f32 %v6114_v49, %v2248_v41  ;;  %v6204_v41 = vld [vmem:[%s6760_s28 + $0x70] sm:$0xff] }
 0xe71   :  { %v4361_v34 = vpop.f32.mrf.mxu1  ;;  %4414 = vmatprep.mubr.msk.bf16.mxu0 %vm4908_vm0, %v4907_v1 }
 0xe73   :  { %v2253_v27 = vpop.f32.mrf.mxu1 }
 0xe74   :  { %v2325_v40 = vmul.f32 %v6120_v32, %v2253_v27  ;;  %v6210_v27 = vld [vmem:[%s6760_s28 + $0x78] sm:$0xff] }
 0xe75   :  { %v4364_v55 = vpop.f32.mrf.mxu1 }
 0xe76   :  { %v2340_v43 = vpack.c.bf16 %v2325_v40, %v2324_v47 }
 0xe77   :  { %v2258_v37 = vpop.f32.mrf.mxu1 }
 0xe78   :  { %4415 = vmatmul.mubr.msk.bf16.gmra.mxu0 %vm255_vm2, %v2340_v43  ;;  %v2326_v42 = vmul.f32 %v6129_v3, %v2258_v37 }
 0xe79   :  { %v4367_v56 = vpop.f32.mrf.mxu1  ;;  %4418 = vmatprep.mubr.msk.bf16.mxu0 %vm4908_vm0, %v4907_v1 }
 0xe7a   :  { %v6217_v56 = vld [vmem:[%s6760_s28 + $0x80] sm:$0xff] }
 0xe7b   :  { %v2263_v51 = vpop.f32.mrf.mxu1 }
 0xe7c   :  { %v2327_v46 = vmul.f32 %v6135_v44, %v2263_v51 }
 0xe7d   :  { %v4370_v22 = vpop.f32.mrf.mxu1 }
 0xe7e   :  { %v2341_v50 = vpack.c.bf16 %v2327_v46, %v2326_v42  ;;  %v4856_v22 = vld [vmem:[%s6762_s25 + $0x8] sm:$0xff] }
 0xe7f   :  { %v2268_v60 = vpop.f32.mrf.mxu1 }
 0xe80   :  { %4419 = vmatmul.mubr.msk.bf16.gmra.mxu0 %vm255_vm2, %v2341_v50  ;;  %v2328_v53 = vmul.f32 %v6144_v58, %v2268_v60  ;;  %v4857_v60 = vld [vmem:[%s6761_s26] sm:$0xff] }
 0xe81   :  { %v4373_v14 = vpop.f32.mrf.mxu1  ;;  %4422 = vmatprep.mubr.msk.bf16.mxu0 %vm4908_vm0, %v4907_v1 }
 0xe83   :  { %v2273_v62 = vpop.f32.mrf.mxu1 }
 0xe84   :  { %v2329_v9 = vmul.f32 %v6150_v18, %v2273_v62 }
 0xe85   :  { %v4376_v0 = vpop.f32.mrf.mxu1 }
 0xe86   :  { %v2342_v52 = vpack.c.bf16 %v2329_v9, %v2328_v53  ;;  %v4858_v0 = vld [vmem:[%s6761_s26 + $0x8] sm:$0xff] }
 0xe87   :  { %v2278_v63 = vpop.f32.mrf.mxu1 }
 0xe88   :  { %4423 = vmatmul.mubr.msk.bf16.gmra.mxu0 %vm255_vm2, %v2342_v52  ;;  %v2330_v26 = vmul.f32 %v6159_v5, %v2278_v63 }
 0xe89   :  { %v4379_v16 = vpop.f32.mrf.mxu1  ;;  %4426 = vmatprep.mubr.msk.bf16.mxu0 %vm4908_vm0, %v4907_v1 }
 0xe8b   :  { %v2283_v19 = vpop.f32.mrf.mxu1 }
 0xe8c   :  { %v2331_v20 = vmul.f32 %v6165_v2, %v2283_v19  ;;  %v4859_v19 = vld [vmem:[%s6761_s26 + $0x10] sm:$0xff] }
 0xe8d   :  { %v4382_v57 = vpop.f32.mrf.mxu1 }
 0xe8e   :  { %v2343_v54 = vpack.c.bf16 %v2331_v20, %v2330_v26 }
 0xe8f   :  { %v2288_v48 = vpop.f32.mrf.mxu1 }
 0xe90   :  { %4427 = vmatmul.mubr.msk.bf16.gmra.mxu0 %vm255_vm2, %v2343_v54  ;;  %v2332_v36 = vmul.f32 %v6174_v39, %v2288_v48 }
 0xe91   :  { %v4385_v45 = vpop.f32.mrf.mxu1  ;;  %4430 = vmatprep.mubr.msk.bf16.mxu0 %vm4908_vm0, %v4907_v1 }
 0xe92   :  { %v4860_v45 = vld [vmem:[%s6761_s26 + $0x18] sm:$0xff] }
 0xe93   :  { %v2293_v25 = vpop.f32.mrf.mxu1 }
 0xe94   :  { %v2333_v24 = vmul.f32 %v6180_v28, %v2293_v25 }
 0xe95   :  { %v4388_v30 = vpop.f32.mrf.mxu1 }
 0xe96   :  { %v2344_v17 = vpack.c.bf16 %v2333_v24, %v2332_v36 }
 0xe97   :  { %v2298_v13 = vpop.f32.mrf.mxu1 }
 0xe98   :  { %4431 = vmatmul.mubr.msk.bf16.gmra.mxu0 %vm255_vm2, %v2344_v17  ;;  %v2334_v6 = vmul.f32 %v6189_v4, %v2298_v13  ;;  %v4861_v17 = vld [vmem:[%s6761_s26 + $0x20] sm:$0xff] }
 0xe99   :  { %v4391_v7 = vpop.f32.mrf.mxu1  ;;  %4434 = vmatprep.mubr.msk.bf16.mxu0 %vm4908_vm0, %v4907_v1 }
 0xe9b   :  { %v2303_v61 = vpop.f32.mrf.mxu1 }
 0xe9c   :  { %v2335_v10 = vmul.f32 %v6195_v35, %v2303_v61 }
 0xe9d   :  { %v4394_v12 = vpop.f32.mrf.mxu1 }
 0xe9e   :  { %v2345_v21 = vpack.c.bf16 %v2335_v10, %v2334_v6  ;;  %v4862_v10 = vld [vmem:[%s6761_s26 + $0x28] sm:$0xff] }
 0xe9f   :  { %v2308_v31 = vpop.f32.mrf.mxu1 }
 0xea0   :  { %4435 = vmatmul.mubr.msk.bf16.gmra.mxu0 %vm255_vm2, %v2345_v21  ;;  %v2336_v34 = vmul.f32 %v6204_v41, %v2308_v31 }
 0xea1   :  { %v4397_v33 = vpop.f32.mrf.mxu1  ;;  %4438 = vmatprep.mubr.msk.bf16.mxu0 %vm4908_vm0, %v4907_v1 }
 0xea3   :  { %v2313_v47 = vpop.f32.mrf.mxu1 }
 0xea4   :  { %v2337_v40 = vmul.f32 %v6210_v27, %v2313_v47 }
 0xea5   :  { %v4400_v55 = vpop.f32.mrf.mxu1 }
 0xea6   :  { %v2346_v43 = vpack.c.bf16 %v2337_v40, %v2336_v34  ;;  %v4863_v34 = vld [vmem:[%s6761_s26 + $0x30] sm:$0xff] }
 0xea7   :  { %v2318_v37 = vpop.f32.mrf.mxu1 }
 0xea8   :  { %4439 = vmatmul.mubr.msk.bf16.gmra.mxu0 %vm255_vm2, %v2346_v43  ;;  %v2338_v42 = vmul.f32 %v6217_v56, %v2318_v37  ;;  %v4864_v37 = vld [vmem:[%s6761_s26 + $0x38] sm:$0xff] }
 0xea9   :  { %4442 = vmatprep.mubr.msk.bf16.mxu0 %vm4908_vm0, %v4907_v1  ;;  %v4403_v51 = vpop.f32.mrf.mxu1 }
 0xeaa   :  { %v2347_v46 = vpack.c.bf16 %v2338_v42, %v2338_v42 }
 0xeb0   :  { %4443 = vmatmul.mubr.msk.bf16.gmra.mxu0 %vm255_vm2, %v2347_v46 }
 0xeb1   :  { %3781 = vmatprep.mubr.msk.f32.mxu0 %vm1299_vm7, %v4856_v22 }
 0xf30   :  { %v2421_v50 = vpop.f32.mrf.mxu0 }
 0xf31   :  { %v6230_v14 = vadd.f32 %v4857_v60, %v2421_v50  ;;  %v4865_v50 = vld [vmem:[%s6761_s26 + $0x40] sm:$0xff] }
 0xf32   :  { %v4412_v53 = vpop.f32.mrf.mxu0 }
 0xf33   :  { %v2491_v62 = vsel %vm573_vm6, %v6230_v14, -inf }
 0xf34   :  { %2492 = vmax.xlane.f32.xlu0 %v2491_v62  ;;  %v2424_v9 = vpop.f32.mrf.mxu0 }
 0xf35   :  { %v6237_v52 = vadd.f32 %v4858_v0, %v2424_v9  ;;  %v4866_v0 = vld [vmem:[%s6761_s26 + $0x48] sm:$0xff] }
 0xf36   :  { %v4413_v63 = vpop.f32.mrf.mxu0 }
 0xf37   :  { %v2494_v16 = vsel %vm573_vm6, %v6237_v52, -inf }
 0xf38   :  { %2495 = vmax.xlane.f32.xlu1 %v2494_v16  ;;  %v2429_v26 = vpop.f32.mrf.mxu0 }
 0xf39   :  { %v6244_v20 = vadd.f32 %v4859_v19, %v2429_v26 }
 0xf3a   :  { %v4416_v57 = vpop.f32.mrf.mxu0 }
 0xf3b   :  { %v2497_v54 = vsel %vm573_vm6, %v6244_v20, -inf  ;;  %v4867_v57 = vld [vmem:[%s6761_s26 + $0x50] sm:$0xff] }
 0xf3c   :  { %2498 = vmax.xlane.f32.xlu0 %v2497_v54  ;;  %v2432_v48 = vpop.f32.mrf.mxu0 }
 0xf3d   :  { %v6251_v36 = vadd.f32 %v4860_v45, %v2432_v48 }
 0xf3e   :  { %v4417_v25 = vpop.f32.mrf.mxu0 }
 0xf3f   :  { %v2500_v24 = vsel %vm573_vm6, %v6251_v36, -inf }
 0xf40   :  { %2501 = vmax.xlane.f32.xlu1 %v2500_v24  ;;  %v2437_v30 = vpop.f32.mrf.mxu0  ;;  %v4868_v24 = vld [vmem:[%s6761_s26 + $0x58] sm:$0xff] }
 0xf41   :  { %v6258_v13 = vadd.f32 %v4861_v17, %v2437_v30 }
 0xf42   :  { %v4420_v7 = vpop.f32.mrf.mxu0 }
 0xf43   :  { %v2503_v6 = vsel %vm573_vm6, %v6258_v13, -inf }
 0xf44   :  { %2504 = vmax.xlane.f32.xlu0 %v2503_v6  ;;  %v2440_v61 = vpop.f32.mrf.mxu0 }
 0xf45   :  { %v6265_v12 = vadd.f32 %v4862_v10, %v2440_v61  ;;  %v4869_v61 = vld [vmem:[%s6761_s26 + $0x60] sm:$0xff] }
 0xf46   :  { %v4421_v21 = vpop.f32.mrf.mxu0 }
 0xf47   :  { %v2506_v31 = vsel %vm573_vm6, %v6265_v12, -inf }
 0xf48   :  { %2507 = vmax.xlane.f32.xlu1 %v2506_v31  ;;  %v2445_v33 = vpop.f32.mrf.mxu0 }
 0xf49   :  { %v6272_v47 = vadd.f32 %v4863_v34, %v2445_v33  ;;  %v4870_v34 = vld [vmem:[%s6761_s26 + $0x68] sm:$0xff] }
 0xf4a   :  { %v4424_v40 = vpop.f32.mrf.mxu0 }
 0xf4b   :  { %v2509_v55 = vsel %vm573_vm6, %v6272_v47, -inf }
 0xf4c   :  { %2510 = vmax.xlane.f32.xlu0 %v2509_v55  ;;  %v2448_v43 = vpop.f32.mrf.mxu0 }
 0xf4d   :  { %v6279_v42 = vadd.f32 %v4864_v37, %v2448_v43 }
 0xf4e   :  { %v4425_v51 = vpop.f32.mrf.mxu0 }
 0xf4f   :  { %v2512_v46 = vsel %vm573_vm6, %v6279_v42, -inf  ;;  %v4871_v51 = vld [vmem:[%s6761_s26 + $0x70] sm:$0xff] }
 0xf50   :  { %2513 = vmax.xlane.f32.xlu1 %v2512_v46  ;;  %v2453_v22 = vpop.f32.mrf.mxu0 }
 0xf51   :  { %v6286_v60 = vadd.f32 %v4865_v50, %v2453_v22 }
 0xf52   :  { %v4428_v53 = vpop.f32.mrf.mxu0 }
 0xf53   :  { %v2515_v62 = vsel %vm573_vm6, %v6286_v60, -inf }
 0xf54   :  { %2516 = vmax.xlane.f32.xlu0 %v2515_v62  ;;  %v2456_v9 = vpop.f32.mrf.mxu0  ;;  %v4872_v62 = vld [vmem:[%s6761_s26 + $0x78] sm:$0xff] }
 0xf55   :  { %v6293_v63 = vadd.f32 %v4866_v0, %v2456_v9 }
 0xf56   :  { %v4429_v16 = vpop.f32.mrf.mxu0 }
 0xf57   :  { %v2518_v26 = vsel %vm573_vm6, %v6293_v63, -inf }
 0xf58   :  { %2519 = vmax.xlane.f32.xlu1 %v2518_v26  ;;  %v2461_v19 = vpop.f32.mrf.mxu0 }
 0xf59   :  { %v6300_v54 = vadd.f32 %v4867_v57, %v2461_v19 }
 0xf5a   :  { %v4432_v48 = vpop.f32.mrf.mxu0 }
 0xf5b   :  { %v2521_v45 = vsel %vm573_vm6, %v6300_v54, -inf }
 0xf5c   :  { %2522 = vmax.xlane.f32.xlu0 %v2521_v45  ;;  %v2464_v25 = vpop.f32.mrf.mxu0 }
 0xf5d   :  { %v6307_v30 = vadd.f32 %v4868_v24, %v2464_v25 }
 0xf5e   :  { %v4433_v17 = vpop.f32.mrf.mxu0 }
 0xf5f   :  { %v2524_v7 = vsel %vm573_vm6, %v6307_v30, -inf }
 0xf60   :  { %2525 = vmax.xlane.f32.xlu1 %v2524_v7  ;;  %v2469_v6 = vpop.f32.mrf.mxu0 }
 0xf61   :  { %v6314_v10 = vadd.f32 %v4869_v61, %v2469_v6 }
 0xf62   :  { %v4436_v21 = vpop.f32.mrf.mxu0 }
 0xf63   :  { %v2527_v31 = vsel %vm573_vm6, %v6314_v10, -inf }
 0xf64   :  { %2528 = vmax.xlane.f32.xlu0 %v2527_v31  ;;  %v2472_v33 = vpop.f32.mrf.mxu0 }
 0xf65   :  { %v6321_v40 = vadd.f32 %v4870_v34, %v2472_v33 }
 0xf66   :  { %v4437_v55 = vpop.f32.mrf.mxu0 }
 0xf67   :  { %v2530_v43 = vsel %vm573_vm6, %v6321_v40, -inf }
 0xf68   :  { %2531 = vmax.xlane.f32.xlu1 %v2530_v43  ;;  %v2477_v37 = vpop.f32.mrf.mxu0 }
 0xf69   :  { %v6328_v46 = vadd.f32 %v4871_v51, %v2477_v37 }
 0xf6a   :  { %v4440_v22 = vpop.f32.mrf.mxu0 }
 0xf6b   :  { %v2533_v50 = vsel %vm573_vm6, %v6328_v46, -inf }
 0xf6c   :  { %2534 = vmax.xlane.f32.xlu0 %v2533_v50  ;;  %v2480_v53 = vpop.f32.mrf.mxu0 }
 0xf6d   :  { %v6335_v9 = vadd.f32 %v4872_v62, %v2480_v53 }
 0xf6e   :  { %v4441_v0 = vpop.f32.mrf.mxu0 }
 0xf6f   :  { %v2536_v16 = vsel %vm573_vm6, %v6335_v9, -inf }
 0xf70   :  { %2537 = vmax.xlane.f32.xlu1 %v2536_v16  ;;  %v2485_v26 = vpop.f32.mrf.mxu0 }
 0xf72   :  { %v4444_v19 = vpop.f32.mrf.mxu0 }
 0xf74   :  { %v2488_v57 = vpop.f32.mrf.mxu0 }
 0xf76   :  { %v4445_v48 = vpop.f32.mrf.mxu0 }
 0xfbd   :  { %v2493_v45 = vpop.xlane.xlu0 %2492 }
 0xfbe   :  { %v2542_v25 = vsub.f32 %v6230_v14, %v2493_v45  ;;  %v4873_v14 = vld [vmem:[%s6761_s26 + $0x80] sm:$0xff] }
 0xfbf   :  { %v6346_v37 = vadd.f32 %v4873_v14, %v2485_v26 }
 0xfc0   :  { %v2559_v24 = vmul.f32 1.442695, %v2542_v25 }
 0xfc1   :  { %v2496_v17 = vpop.xlane.xlu1 %2495  ;;  %v2539_v53 = vsel %vm573_vm6, %v6346_v37, -inf }
 0xfc2   :  { %4722 = vpow2.f32 %v2559_v24  ;;  %v2543_v7 = vsub.f32 %v6237_v52, %v2496_v17 }
 0xfc4   :  { %v2561_v6 = vmul.f32 1.442695, %v2543_v7 }
 0xfc5   :  { %v2499_v61 = vpop.xlane.xlu0 %2498 }
 0xfc6   :  { %4724 = vpow2.f32 %v2561_v6  ;;  %v2544_v21 = vsub.f32 %v6244_v20, %v2499_v61 }
 0xfc8   :  { %v2563_v31 = vmul.f32 1.442695, %v2544_v21 }
 0xfc9   :  { %v2502_v33 = vpop.xlane.xlu1 %2501 }
 0xfca   :  { %4726 = vpow2.f32 %v2563_v31  ;;  %v2545_v34 = vsub.f32 %v6251_v36, %v2502_v33 }
 0xfcc   :  { %v2565_v55 = vmul.f32 1.442695, %v2545_v34 }
 0xfcd   :  { %v2505_v43 = vpop.xlane.xlu0 %2504 }
 0xfce   :  { %4728 = vpow2.f32 %v2565_v55  ;;  %v2546_v52 = vsub.f32 %v6258_v13, %v2505_v43 }
 0xfcf   :  { %v6349_v51 = vpop.eup %4722 }
 0xfd0   :  { %v2567_v22 = vmul.f32 1.442695, %v2546_v52  ;;  %v2593_v20 = vsel %vm573_vm6, %v6349_v51, 0.0 }
 0xfd1   :  { %v2508_v50 = vpop.xlane.xlu1 %2507  ;;  %2594 = vadd.xlane.f32.xlu0 %v2593_v20 }
 0xfd2   :  { %4730 = vpow2.f32 %v2567_v22  ;;  %v2547_v36 = vsub.f32 %v6265_v12, %v2508_v50 }
 0xfd3   :  { %v6356_v62 = vpop.eup %4724 }
 0xfd4   :  { %v2569_v0 = vmul.f32 1.442695, %v2547_v36  ;;  %v2596_v13 = vsel %vm573_vm6, %v6356_v62, 0.0 }
 0xfd5   :  { %v2511_v16 = vpop.xlane.xlu0 %2510  ;;  %2597 = vadd.xlane.f32.xlu1 %v2596_v13  ;;  %2540 = vmax.xlane.f32.xlu0 %v2539_v53 }
 0xfd6   :  { %4732 = vpow2.f32 %v2569_v0  ;;  %v2548_v26 = vsub.f32 %v6272_v47, %v2511_v16 }
 0xfd7   :  { %v6361_v19 = vpop.eup %4726 }
 0xfd8   :  { %v2571_v57 = vmul.f32 1.442695, %v2548_v26  ;;  %v2599_v12 = vsel %vm573_vm6, %v6361_v19, 0.0 }
 0xfd9   :  { %v2514_v48 = vpop.xlane.xlu1 %2513  ;;  %2600 = vadd.xlane.f32.xlu1 %v2599_v12 }
 0xfda   :  { %4734 = vpow2.f32 %v2571_v57  ;;  %v2549_v45 = vsub.f32 %v6279_v42, %v2514_v48 }
 0xfdb   :  { %v6366_v25 = vpop.eup %4728 }
 0xfdc   :  { %v2573_v24 = vmul.f32 1.442695, %v2549_v45  ;;  %v2602_v17 = vsel %vm573_vm6, %v6366_v25, 0.0 }
 0xfdd   :  { %v2517_v7 = vpop.xlane.xlu0 %2516  ;;  %2603 = vadd.xlane.f32.xlu0 %v2602_v17 }
 0xfde   :  { %4736 = vpow2.f32 %v2573_v24  ;;  %v2550_v47 = vsub.f32 %v6286_v60, %v2517_v7 }
 0xfdf   :  { %v6371_v6 = vpop.eup %4730 }
 0xfe0   :  { %v2575_v61 = vmul.f32 1.442695, %v2550_v47  ;;  %v2605_v21 = vsel %vm573_vm6, %v6371_v6, 0.0 }
 0xfe1   :  { %v2520_v31 = vpop.xlane.xlu1 %2519  ;;  %2606 = vadd.xlane.f32.xlu1 %v2605_v21 }
 0xfe2   :  { %4738 = vpow2.f32 %v2575_v61  ;;  %v2551_v42 = vsub.f32 %v6293_v63, %v2520_v31 }
 0xfe3   :  { %v6376_v33 = vpop.eup %4732 }
 0xfe4   :  { %v2577_v34 = vmul.f32 1.442695, %v2551_v42  ;;  %v2608_v55 = vsel %vm573_vm6, %v6376_v33, 0.0 }
 0xfe5   :  { %v2523_v43 = vpop.xlane.xlu0 %2522  ;;  %2609 = vadd.xlane.f32.xlu0 %v2608_v55 }
 0xfe6   :  { %4740 = vpow2.f32 %v2577_v34  ;;  %v2552_v60 = vsub.f32 %v6300_v54, %v2523_v43 }
 0xfe7   :  { %v6381_v14 = vpop.eup %4734 }
 0xfe8   :  { %v2579_v52 = vmul.f32 1.442695, %v2552_v60  ;;  %v2611_v22 = vsel %vm573_vm6, %v6381_v14, 0.0 }
 0xfe9   :  { %v2526_v20 = vpop.xlane.xlu1 %2525  ;;  %2612 = vadd.xlane.f32.xlu1 %v2611_v22 }
 0xfea   :  { %4742 = vpow2.f32 %v2579_v52  ;;  %v2553_v63 = vsub.f32 %v6307_v30, %v2526_v20 }
 0xfeb   :  { %v6386_v50 = vpop.eup %4736 }
 0xfec   :  { %v2581_v36 = vmul.f32 1.442695, %v2553_v63  ;;  %v2614_v53 = vsel %vm573_vm6, %v6386_v50, 0.0 }
 0xfed   :  { %v2529_v0 = vpop.xlane.xlu0 %2528  ;;  %2615 = vadd.xlane.f32.xlu0 %v2614_v53 }
 0xfee   :  { %4744 = vpow2.f32 %v2581_v36  ;;  %v2554_v54 = vsub.f32 %v6314_v10, %v2529_v0 }
 0xfef   :  { %v6391_v13 = vpop.eup %4738 }
 0xff0   :  { %v2583_v16 = vmul.f32 1.442695, %v2554_v54  ;;  %v2617_v26 = vsel %vm573_vm6, %v6391_v13, 0.0 }
 0xff1   :  { %v2532_v57 = vpop.xlane.xlu1 %2531  ;;  %2618 = vadd.xlane.f32.xlu1 %v2617_v26 }
 0xff2   :  { %4746 = vpow2.f32 %v2583_v16  ;;  %v2555_v30 = vsub.f32 %v6321_v40, %v2532_v57 }
 0xff3   :  { %v6396_v12 = vpop.eup %4740 }
 0xff4   :  { %v2585_v48 = vmul.f32 1.442695, %v2555_v30  ;;  %v2620_v45 = vsel %vm573_vm6, %v6396_v12, 0.0 }
 0xff5   :  { %v2535_v24 = vpop.xlane.xlu0 %2534  ;;  %2621 = vadd.xlane.f32.xlu0 %v2620_v45 }
 0xff6   :  { %4748 = vpow2.f32 %v2585_v48  ;;  %v2556_v10 = vsub.f32 %v6328_v46, %v2535_v24 }
 0xff7   :  { %v6401_v17 = vpop.eup %4742 }
 0xff8   :  { %v2587_v7 = vmul.f32 1.442695, %v2556_v10  ;;  %v2623_v47 = vsel %vm573_vm6, %v6401_v17, 0.0 }
 0xff9   :  { %2624 = vadd.xlane.f32.xlu1 %v2623_v47  ;;  %v2538_v61 = vpop.xlane.xlu1 %2537 }
 0xffa   :  { %4750 = vpow2.f32 %v2587_v7  ;;  %v2557_v40 = vsub.f32 %v6335_v9, %v2538_v61 }
 0xffb   :  { %v6406_v21 = vpop.eup %4744 }
 0xffc   :  { %v2589_v31 = vmul.f32 1.442695, %v2557_v40  ;;  %v2626_v42 = vsel %vm573_vm6, %v6406_v21, 0.0 }
 0xffd   :  { %2627 = vadd.xlane.f32.xlu0 %v2626_v42 }
 0xffe   :  { %4752 = vpow2.f32 %v2589_v31 }
 0xfff   :  { %v6410_v46 = vpop.eup %4746 }
0x1000   :  { %v2629_v34 = vsel %vm573_vm6, %v6410_v46, 0.0 }
0x1001   :  { %2630 = vadd.xlane.f32.xlu1 %v2629_v34 }
0x1003   :  { %v6414_v55 = vpop.eup %4748 }
0x1004   :  { %v2632_v43 = vsel %vm573_vm6, %v6414_v55, 0.0 }
0x1005   :  { %2633 = vadd.xlane.f32.xlu0 %v2632_v43 }
0x1007   :  { %v6418_v9 = vpop.eup %4750 }
0x1008   :  { %v2635_v60 = vsel %vm573_vm6, %v6418_v9, 0.0 }
0x1009   :  { %2636 = vadd.xlane.f32.xlu1 %v2635_v60 }
0x100b   :  { %v6422_v52 = vpop.eup %4752 }
0x100c   :  { %v2638_v22 = vsel %vm573_vm6, %v6422_v52, 0.0 }
0x100d   :  { %2639 = vadd.xlane.f32.xlu0 %v2638_v22 }
0x105a   :  { %v2595_v20 = vpop.xlane.xlu0 %2594 }
0x105b   :  { %4754 = vrcp.f32 %v2595_v20 }
0x105e   :  { %v2598_v63 = vpop.xlane.xlu1 %2597  ;;  %v2541_v36 = vpop.xlane.xlu0 %2540 }
0x105f   :  { %4756 = vrcp.f32 %v2598_v63  ;;  %v2558_v53 = vsub.f32 %v6346_v37, %v2541_v36 }
0x1061   :  { %v2591_v0 = vmul.f32 1.442695, %v2558_v53 }
0x1062   :  { %v2601_v54 = vpop.xlane.xlu1 %2600 }
0x1063   :  { %4758 = vpow2.f32 %v2591_v0 }
0x1064   :  { %4760 = vrcp.f32 %v2601_v54 }
0x1066   :  { %v2604_v16 = vpop.xlane.xlu0 %2603 }
0x1067   :  { %4762 = vrcp.f32 %v2604_v16 }
0x1068   :  { %v4755_v26 = vpop.eup %4754 }
0x1069   :  { %v2661_v48 = vmul.f32 %v4755_v26, %v6349_v51 }
0x106a   :  { %v2607_v57 = vpop.xlane.xlu1 %2606 }
0x106b   :  { %4764 = vrcp.f32 %v2607_v57 }
0x106c   :  { %v4757_v30 = vpop.eup %4756 }
0x106d   :  { %v2662_v45 = vmul.f32 %v4757_v30, %v6356_v62 }
0x106e   :  { %v2610_v24 = vpop.xlane.xlu0 %2609 }
0x106f   :  { %v2678_v10 = vpack.c.bf16 %v2662_v45, %v2661_v48  ;;  %4766 = vrcp.f32 %v2610_v24 }
0x1070   :  { %v6429_v7 = vpop.eup %4758 }
0x1071   :  { %4453 = vmatmul.mubr.msk.bf16.vlgmr.msra.gmra.mxu1 %vm573_vm6, %v2678_v10  ;;  %v2641_v37 = vsel %vm573_vm6, %v6429_v7, 0.0  ;;  %v4761_v47 = vpop.eup %4760 }
0x1072   :  { %v2613_v61 = vpop.xlane.xlu1 %2612  ;;  %2642 = vadd.xlane.f32.xlu1 %v2641_v37  ;;  %4456 = vmatprep.mubr.msk.bf16.mxu1 %vm4908_vm0, %v4907_v1  ;;  %v2663_v62 = vmul.f32 %v4761_v47, %v6361_v19 }
0x1073   :  { %4768 = vrcp.f32 %v2613_v61 }
0x1074   :  { %v4763_v51 = vpop.eup %4762 }
0x1075   :  { %v2664_v40 = vmul.f32 %v4763_v51, %v6366_v25 }
0x1076   :  { %v2616_v31 = vpop.xlane.xlu0 %2615 }
0x1077   :  { %4770 = vrcp.f32 %v2616_v31  ;;  %v2679_v42 = vpack.c.bf16 %v2664_v40, %v2663_v62 }
0x1078   :  { %v4765_v34 = vpop.eup %4764 }
0x1079   :  { %4457 = vmatmul.mubr.msk.bf16.gmra.mxu1 %vm573_vm6, %v2679_v42  ;;  %v2665_v22 = vmul.f32 %v4765_v34, %v6371_v6 }
0x107a   :  { %v2619_v43 = vpop.xlane.xlu1 %2618  ;;  %4460 = vmatprep.mubr.msk.bf16.mxu1 %vm4908_vm0, %v4907_v1 }
0x107b   :  { %4772 = vrcp.f32 %v2619_v43 }
0x107c   :  { %v4767_v60 = vpop.eup %4766 }
0x107d   :  { %v2666_v20 = vmul.f32 %v4767_v60, %v6376_v33 }
0x107e   :  { %v2622_v63 = vpop.xlane.xlu0 %2621 }
0x107f   :  { %4774 = vrcp.f32 %v2622_v63  ;;  %v2680_v19 = vpack.c.bf16 %v2666_v20, %v2665_v22 }
0x1080   :  { %v4769_v25 = vpop.eup %4768 }
0x1081   :  { %4461 = vmatmul.mubr.msk.bf16.gmra.mxu1 %vm573_vm6, %v2680_v19  ;;  %v2667_v0 = vmul.f32 %v4769_v25, %v6381_v14 }
0x1082   :  { %v2625_v36 = vpop.xlane.xlu1 %2624  ;;  %4464 = vmatprep.mubr.msk.bf16.mxu1 %vm4908_vm0, %v4907_v1 }
0x1083   :  { %4776 = vrcp.f32 %v2625_v36 }
0x1084   :  { %v4771_v53 = vpop.eup %4770 }
0x1085   :  { %v2668_v54 = vmul.f32 %v4771_v53, %v6386_v50 }
0x1086   :  { %v2628_v16 = vpop.xlane.xlu0 %2627 }
0x1087   :  { %4778 = vrcp.f32 %v2628_v16  ;;  %v2681_v6 = vpack.c.bf16 %v2668_v54, %v2667_v0 }
0x1088   :  { %v4773_v33 = vpop.eup %4772 }
0x1089   :  { %4465 = vmatmul.mubr.msk.bf16.gmra.mxu1 %vm573_vm6, %v2681_v6  ;;  %v2669_v30 = vmul.f32 %v4773_v33, %v6391_v13 }
0x108a   :  { %v2631_v26 = vpop.xlane.xlu1 %2630  ;;  %4468 = vmatprep.mubr.msk.bf16.mxu1 %vm4908_vm0, %v4907_v1 }
0x108b   :  { %4780 = vrcp.f32 %v2631_v26 }
0x108c   :  { %v4775_v57 = vpop.eup %4774 }
0x108d   :  { %v2670_v48 = vmul.f32 %v4775_v57, %v6396_v12 }
0x108e   :  { %v2634_v45 = vpop.xlane.xlu0 %2633 }
0x108f   :  { %4782 = vrcp.f32 %v2634_v45  ;;  %v2682_v14 = vpack.c.bf16 %v2670_v48, %v2669_v30 }
0x1090   :  { %v4777_v50 = vpop.eup %4776 }
0x1091   :  { %4469 = vmatmul.mubr.msk.bf16.gmra.mxu1 %vm573_vm6, %v2682_v14  ;;  %v2671_v37 = vmul.f32 %v4777_v50, %v6401_v17 }
0x1092   :  { %v2637_v24 = vpop.xlane.xlu1 %2636  ;;  %4472 = vmatprep.mubr.msk.bf16.mxu1 %vm4908_vm0, %v4907_v1 }
0x1093   :  { %4784 = vrcp.f32 %v2637_v24 }
0x1094   :  { %v4779_v10 = vpop.eup %4778 }
0x1095   :  { %v2672_v47 = vmul.f32 %v4779_v10, %v6406_v21 }
0x1096   :  { %v2640_v61 = vpop.xlane.xlu0 %2639 }
0x1097   :  { %4786 = vrcp.f32 %v2640_v61  ;;  %v2683_v13 = vpack.c.bf16 %v2672_v47, %v2671_v37 }
0x1098   :  { %v4781_v12 = vpop.eup %4780 }
0x1099   :  { %4473 = vmatmul.mubr.msk.bf16.gmra.mxu1 %vm573_vm6, %v2683_v13  ;;  %v2673_v62 = vmul.f32 %v4781_v12, %v6410_v46 }
0x109a   :  { %4476 = vmatprep.mubr.msk.bf16.mxu1 %vm4908_vm0, %v4907_v1 }
0x109c   :  { %v4783_v51 = vpop.eup %4782 }
0x109d   :  { %v2674_v40 = vmul.f32 %v4783_v51, %v6414_v55 }
0x109f   :  { %v2684_v31 = vpack.c.bf16 %v2674_v40, %v2673_v62 }
0x10a0   :  { %v4785_v17 = vpop.eup %4784 }
0x10a1   :  { %4477 = vmatmul.mubr.msk.bf16.gmra.mxu1 %vm573_vm6, %v2684_v31  ;;  %v2675_v42 = vmul.f32 %v4785_v17, %v6418_v9 }
0x10a2   :  { %4480 = vmatprep.mubr.msk.bf16.mxu1 %vm4908_vm0, %v4907_v1 }
0x10a4   :  { %v4787_v21 = vpop.eup %4786 }
0x10a5   :  { %v2676_v34 = vmul.f32 %v4787_v21, %v6422_v52 }
0x10a7   :  { %v2685_v43 = vpack.c.bf16 %v2676_v34, %v2675_v42 }
0x10a9   :  { %4481 = vmatmul.mubr.msk.bf16.gmra.mxu1 %vm573_vm6, %v2685_v43 }
0x10aa   :  { %4484 = vmatprep.mubr.msk.bf16.mxu1 %vm4908_vm0, %v4907_v1 }
0x10fb   :  { %v2643_v46 = vpop.xlane.xlu1 %2642 }
0x10fc   :  { %4788 = vrcp.f32 %v2643_v46 }
0x1109   :  { %v4789_v55 = vpop.eup %4788 }
0x110a   :  { %v2677_v60 = vmul.f32 %v4789_v55, %v6429_v7 }
0x110c   :  { %v2686_v22 = vpack.c.bf16 %v2677_v60, %v2677_v60  ;;  %v4877_v60 = vld [vmem:[%s6762_s25 + $0x28] sm:$0xff] }
0x110e   :  { %4485 = vmatmul.mubr.msk.bf16.gmra.mxu1 %vm573_vm6, %v2686_v22  ;;  %v4878_v22 = vld [vmem:[%s6762_s25 + $0x20] sm:$0xff] }
0x110f   :  { %4536 = vmatprep.mubr.msk.bf16.mxu1 %vm4908_vm0, %v4907_v1 }
0x1131   :  { %v6475_v9 = vpop.f32.mrf.mxu1 }
0x1133   :  { %v4454_v52 = vpop.f32.mrf.mxu1 }
0x1134   :  { %v4880_v52 = vld [vmem:[%s6762_s25 + $0x30] sm:$0xff] }
0x1135   :  { %v6477_v20 = vpop.f32.mrf.mxu1 }
0x1137   :  { %v4455_v63 = vpop.f32.mrf.mxu1 }
0x1138   :  { %v4882_v63 = vld [vmem:[%s6762_s25 + $0x40] sm:$0x3] }
0x1139   :  { %v6479_v19 = vpop.f32.mrf.mxu1 }
0x113b   :  { %v4458_v25 = vpop.f32.mrf.mxu1 }
0x113c   :  { %v4601_v25 = vld [vmem:[%s6730_s13 + $0x10] sm:$0xff]  }
0x113d   :  { %v2765_v36 = vpop.f32.mrf.mxu1 }
0x113f   :  { %v4459_v53 = vpop.f32.mrf.mxu1 }
0x1141   :  { %v2770_v0 = vpop.f32.mrf.mxu1 }
0x1143   :  { %v4462_v54 = vpop.f32.mrf.mxu1 }
0x1145   :  { %v2773_v7 = vpop.f32.mrf.mxu1 }
0x1147   :  { %v4463_v16 = vpop.f32.mrf.mxu1 }
0x1149   :  { %v2778_v6 = vpop.f32.mrf.mxu1 }
0x114b   :  { %v4466_v33 = vpop.f32.mrf.mxu1 }
0x114d   :  { %v2781_v26 = vpop.f32.mrf.mxu1 }
0x114f   :  { %v4467_v57 = vpop.f32.mrf.mxu1 }
0x1151   :  { %v2786_v30 = vpop.f32.mrf.mxu1 }
0x1153   :  { %v4470_v48 = vpop.f32.mrf.mxu1 }
0x1155   :  { %v2789_v45 = vpop.f32.mrf.mxu1 }
0x1157   :  { %v4471_v14 = vpop.f32.mrf.mxu1 }
0x1158   :  { %v3791_v14 = vld [vmem:[%s6731_s14 + $0x1] ss:$0 sm:$0xff] }
0x1159   :  { %v2794_v50 = vpop.f32.mrf.mxu1 }
0x115b   :  { %v4474_v24 = vpop.f32.mrf.mxu1 }
0x115d   :  { %v2797_v10 = vpop.f32.mrf.mxu1 }
0x115e   :  { %v2835_v43 = vmul.f32 %v6180_v28, %v2797_v10  ;;  %v2831_v28 = vmul.f32 %v6150_v18, %v2781_v26  ;;  %v2827_v18 = vmul.f32 %v6120_v32, %v2765_v36 }
0x115f   :  { %v4475_v37 = vpop.f32.mrf.mxu1 }
0x1161   :  { %v2802_v47 = vpop.f32.mrf.mxu1 }
0x1162   :  { %v2836_v34 = vmul.f32 %v6189_v4, %v2802_v47  ;;  %v2832_v4 = vmul.f32 %v6159_v5, %v2786_v30  ;;  %v2828_v5 = vmul.f32 %v6129_v3, %v2770_v0  ;;  %v2824_v3 = vmul.f32 %v6099_v59, %v6475_v9  ;;  %v4875_v59 = vld [vmem:[%s6762_s25 + $0x18] sm:$0xff] }
0x1163   :  { %v4478_v61 = vpop.f32.mrf.mxu1  ;;  %v4879_v9 = vld [vmem:[%s6762_s25 + $0x38] sm:$0xff] }
0x1165   :  { %v2805_v13 = vpop.f32.mrf.mxu1 }
0x1166   :  { %v2837_v42 = vmul.f32 %v6195_v35, %v2805_v13  ;;  %v2833_v35 = vmul.f32 %v6165_v2, %v2789_v45  ;;  %v2829_v2 = vmul.f32 %v6135_v44, %v2773_v7  ;;  %v2825_v44 = vmul.f32 %v6105_v23, %v6477_v20  ;;  %v4874_v23 = vld [vmem:[%s6762_s25] sm:$0xff]  ;;  %v4881_v20 = vld [vmem:[%s6762_s25 + $0x48] sm:$0x3] }
0x1167   :  { %v4479_v12 = vpop.f32.mrf.mxu1 }
0x1169   :  { %v2810_v51 = vpop.f32.mrf.mxu1 }
0x116a   :  { %v2838_v21 = vmul.f32 %v6204_v41, %v2810_v51  ;;  %v2834_v41 = vmul.f32 %v6174_v39, %v2794_v50  ;;  %v2830_v39 = vmul.f32 %v6144_v58, %v2778_v6  ;;  %v2826_v58 = vmul.f32 %v6114_v49, %v6479_v19  ;;  %v4600_v19 = vld [vmem:[%s6730_s13 + $0x18] sm:$0xff]  }
0x116b   :  { %v4482_v62 = vpop.f32.mrf.mxu1 }
0x116d   :  { %v2813_v40 = vpop.f32.mrf.mxu1 }
0x116e   :  { %v2839_v31 = vmul.f32 %v6210_v27, %v2813_v40 }
0x116f   :  { %v4483_v17 = vpop.f32.mrf.mxu1 }
0x1170   :  { %2842 = vmatpush1.msra.mxu0 %v2839_v31 }
0x1171   :  { %2843 = vmatprep.subr.mxu0 %v4907_v1 }
0x1172   :  { %2844 = vmatpush1.msra.mxu0 %v2838_v21 }
0x1173   :  { %2845 = vmatprep.subr.mxu0 %v4907_v1 }
0x1174   :  { %2846 = vmatpush1.msra.mxu0 %v2837_v42 }
0x1175   :  { %2847 = vmatprep.subr.mxu0 %v4907_v1 }
0x1176   :  { %2848 = vmatpush1.msra.mxu0 %v2836_v34 }
0x1177   :  { %2849 = vmatprep.subr.mxu0 %v4907_v1 }
0x1178   :  { %2850 = vmatpush1.msra.mxu0 %v2835_v43 }
0x1179   :  { %2851 = vmatprep.subr.mxu0 %v4907_v1 }
0x117a   :  { %2852 = vmatpush1.msra.mxu0 %v2834_v41 }
0x117b   :  { %2853 = vmatprep.subr.mxu0 %v4907_v1 }
0x117c   :  { %2854 = vmatpush1.msra.mxu0 %v2833_v35 }
0x117d   :  { %2855 = vmatprep.subr.mxu0 %v4907_v1 }
0x117e   :  { %2856 = vmatpush1.msra.mxu0 %v2832_v4 }
0x117f   :  { %2857 = vmatprep.subr.mxu0 %v4907_v1 }
0x1180   :  { %2858 = vmatpush1.msra.mxu0 %v2831_v28 }
0x1181   :  { %2859 = vmatprep.subr.mxu0 %v4907_v1 }
0x1182   :  { %2860 = vmatpush1.msra.mxu0 %v2830_v39 }
0x1183   :  { %2861 = vmatprep.subr.mxu0 %v4907_v1 }
0x1184   :  { %2862 = vmatpush1.msra.mxu0 %v2829_v2 }
0x1185   :  { %2863 = vmatprep.subr.mxu0 %v4907_v1 }
0x1186   :  { %2864 = vmatpush1.msra.mxu0 %v2828_v5 }
0x1187   :  { %2865 = vmatprep.subr.mxu0 %v4907_v1 }
0x1188   :  { %2866 = vmatpush1.msra.mxu0 %v2827_v18 }
0x1189   :  { %2867 = vmatprep.subr.mxu0 %v4907_v1 }
0x118a   :  { %2868 = vmatpush1.msra.mxu0 %v2826_v58 }
0x118b   :  { %2869 = vmatprep.subr.mxu0 %v4907_v1 }
0x118c   :  { %2870 = vmatpush1.msra.mxu0 %v2825_v44 }
0x118d   :  { %2871 = vmatprep.subr.mxu0 %v4907_v1 }
0x118e   :  { %2872 = vmatpush1.msra.mxu0 %v2824_v3 }
0x118f   :  { %2903 = vmatprep.subr.mxu0 %v4907_v1 }
0x11ce   :  { %v2818_v32 = vpop.f32.mrf.mxu1 }
0x11cf   :  { %v2840_v49 = vmul.f32 %v6217_v56, %v2818_v32  ;;  %v4876_v56 = vld [vmem:[%s6762_s25 + $0x10] sm:$0xff] }
0x11d0   :  { %v4486_v27 = vpop.f32.mrf.mxu1 }
0x11d1   :  { %2904 = vmatpush2.msra.mxu0 %v2840_v49 }
0x11d2   :  { %v2821_v46 = vpop.f32.mrf.mxu1  ;;  %2906 = vmatmul.mubr.f32.vlgmr.msra.gmra.mxu0 %v4874_v23  ;;  %4488 = vmatprep.subr.bf16.mxu0 %v4907_v1 }
0x11d3   :  { %3782 = vmatprep.mubr.msk.f32.mxu0 %vm1299_vm7, %v4875_v59  ;;  %4489 = vmatpush3.bf16.msra.mxu0 %v4600_v19 }
0x11d4   :  { %v4487_v55 = vpop.f32.mrf.mxu1  ;;  %4490 = vmatprep.subr.bf16.mxu0 %v4907_v1 }
0x11d6   :  { %2911 = vmatmul.mubr.f32.gmra.mxu0 %v4876_v56 }
0x11d7   :  { %3783 = vmatprep.mubr.msk.f32.mxu0 %vm1299_vm7, %v4877_v60  ;;  %4491 = vmatpush3.bf16.msra.mxu0 %v4601_v25 }
0x11d8   :  { %4504 = vmatprep.subr.bf16.mxu0 %v4907_v1 }
0x11da   :  { %2916 = vmatmul.mubr.f32.gmra.mxu0 %v4878_v22 }
0x11db   :  { %3784 = vmatprep.mubr.msk.f32.mxu0 %vm1299_vm7, %v4879_v9 }
0x11de   :  { %2921 = vmatmul.mubr.f32.gmra.mxu0 %v4880_v52 }
0x11df   :  { %3785 = vmatprep.mubr.msk.f32.mxu0 %vm1299_vm7, %v4881_v20 }
0x11e2   :  { %2926 = vmatmul.mubr.f32.gmra.mxu0 %v4882_v63 }
0x11e3   :  { %4492 = vmatprep.mubr.msk.bf16.mxu0 %vm4908_vm0, %v4907_v1 }
0x1292   :  { %v2907_v36 = vpop.f32.mrf.mxu0 }
0x1294   :  { %v2909_v53 = vpop.f32.mrf.mxu0 }
0x1296   :  { %v2912_v0 = vpop.f32.mrf.mxu0 }
0x1297   :  { %v2931_v54 = vpack.c.bf16 %v2912_v0, %v2907_v36 }
0x1298   :  { %v2914_v7 = vpop.f32.mrf.mxu0 }
0x1299   :  { %4493 = vmatmul.mubr.msk.bf16.vlgmr.msra.gmra.mxu0 %vm255_vm2, %v2931_v54  ;;  %v4602_v54 = vld [vmem:[%s6732_s15 + $0x18] sm:$0xff]   ;;  %v4603_v7 = vld [vmem:[%s6732_s15 + $0x10] sm:$0xff]  }
0x129a   :  { %v2917_v16 = vpop.f32.mrf.mxu0  ;;  %4496 = vmatprep.mubr.msk.bf16.mxu0 %vm4908_vm0, %v4907_v1  ;;  %4505 = vmatpush3.bf16.msra.mxu0 %v4602_v54 }
0x129b   :  { %4506 = vmatprep.subr.bf16.mxu0 %v4907_v1 }
0x129c   :  { %v2919_v6 = vpop.f32.mrf.mxu0 }
0x129d   :  { %v4605_v6 = vld [vmem:[%s6734_s17 + $0x70] sm:$0xff]  }
0x129e   :  { %v2922_v33 = vpop.f32.mrf.mxu0  ;;  %4507 = vmatpush3.bf16.msra.mxu0 %v4603_v7 }
0x129f   :  { %v2932_v26 = vpack.c.bf16 %v2922_v33, %v2917_v16  ;;  %4548 = vmatprep.subr.mxu0 %v4907_v1  ;;  %v4604_v16 = vld [vmem:[%s6734_s17 + $0x78] sm:$0xff]  }
0x12a0   :  { %v2924_v57 = vpop.f32.mrf.mxu0  ;;  %4521 = vmatpush3.bf16.msra.mxu1 %v4604_v16 }
0x12a1   :  { %4497 = vmatmul.mubr.msk.bf16.gmra.mxu0 %vm255_vm2, %v2932_v26  ;;  %4522 = vmatprep.subr.bf16.mxu1 %v4907_v1 }
0x12a2   :  { %v2927_v30 = vpop.f32.mrf.mxu0  ;;  %4500 = vmatprep.mubr.msk.bf16.mxu0 %vm4908_vm0, %v4907_v1 }
0x12a3   :  { %v2933_v45 = vpack.c.bf16 %v2927_v30, %v2927_v30 }
0x12a4   :  { %v2929_v48 = vpop.f32.mrf.mxu0  ;;  %4523 = vmatpush3.bf16.msra.mxu1 %v4605_v6 }
0x12a5   :  { %4524 = vmatprep.subr.bf16.mxu1 %v4907_v1 }
0x12a9   :  { %4501 = vmatmul.mubr.msk.bf16.gmra.mxu0 %vm255_vm2, %v2933_v45 }
0x12aa   :  { %4508 = vmatprep.mubr.msk.bf16.mxu0 %vm4908_vm0, %v4907_v1 }
0x1359   :  { %v3002_v50 = vpop.f32.mrf.mxu0 }
0x135a   :  { %v3003_v24 = vadd.f32 %v3791_v14, %v3002_v50 }
0x135b   :  { %v4494_v10 = vpop.f32.mrf.mxu0 }
0x135c   :  { %v6572_v37 = vadd.f32 %v3003_v24, %v5882_v38 }
0x135d   :  { %v3005_v47 = vpop.f32.mrf.mxu0 }
0x135e   :  { %v3006_v61 = vadd.f32 %v3791_v14, %v3005_v47  ;;  %v3029_v13 = vsel %vm255_vm2, %v6572_v37, 0.0 }
0x135f   :  { %3030 = vadd.xlane.f32.xlu0 %v3029_v13  ;;  %v4495_v12 = vpop.f32.mrf.mxu0 }
0x1360   :  { %v6577_v51 = vadd.f32 %v3006_v61, %v5887_v11 }
0x1361   :  { %v3010_v62 = vpop.f32.mrf.mxu0 }
0x1362   :  { %v3011_v40 = vadd.f32 %v3791_v14, %v3010_v62  ;;  %v3032_v31 = vsel %vm255_vm2, %v6577_v51, 0.0 }
0x1363   :  { %3033 = vadd.xlane.f32.xlu1 %v3032_v31  ;;  %v4498_v17 = vpop.f32.mrf.mxu0 }
0x1364   :  { %v6582_v38 = vadd.f32 %v3011_v40, %v5892_v8 }
0x1365   :  { %v3013_v21 = vpop.f32.mrf.mxu0 }
0x1366   :  { %v3014_v42 = vadd.f32 %v3791_v14, %v3013_v21  ;;  %v3035_v34 = vsel %vm255_vm2, %v6582_v38, 0.0  ;;  %v4883_v21 = vld [vmem:[%s6725_s8 + $0x1] ss:$0 sm:$0xff] }
0x1367   :  { %3036 = vadd.xlane.f32.xlu0 %v3035_v34  ;;  %v4499_v43 = vpop.f32.mrf.mxu0 }
0x1368   :  { %v6587_v11 = vadd.f32 %v3014_v42, %v5897_v29 }
0x1369   :  { %v3018_v41 = vpop.f32.mrf.mxu0 }
0x136a   :  { %v3019_v35 = vadd.f32 %v3791_v14, %v3018_v41  ;;  %v3038_v4 = vsel %vm255_vm2, %v6587_v11, 0.0 }
0x136b   :  { %3039 = vadd.xlane.f32.xlu1 %v3038_v4  ;;  %v4502_v28 = vpop.f32.mrf.mxu0 }
0x136c   :  { %v6592_v8 = vadd.f32 %v3019_v35, %v5902_v15  ;;  %v4884_v35 = vld [vmem:[%s6726_s9 + $0x1] ss:$0 sm:$0xff]  ;;  %s4909_s9 = smov [#allocation2]  }
0x136d   :  { %v3021_v39 = vpop.f32.mrf.mxu0  ;;  %s3620_s4 = sshll.u32 %s4909_s9, 4  ;;  %s3621_s4 = int_to_ptr.vmem [resolvable:$true] %s3620_s4 }
0x136e   :  { %v3041_v2 = vsel %vm268_vm3, %v6592_v8, 0.0  ;;  %p4890_p1 = scmp.lt.s32.totalorder %s3621_s4, %s3621_s4 }
0x136f   :  { %3042 = vadd.xlane.f32.xlu0 %v3041_v2  ;;  %v4503_v5 = vpop.f32.mrf.mxu0 }
0x13e8   :  { %v3031_v18 = vpop.xlane.xlu0 %3030 }
0x13e9   :  { %v3044_v58 = vmul.f32 0.03125, %v3031_v18 }
0x13eb   :  { %v3049_v29 = vsub.f32 %v6572_v37, %v3044_v58 }
0x13ec   :  { %v3034_v44 = vpop.xlane.xlu1 %3033 }
0x13ed   :  { %v3045_v3 = vmul.f32 0.03125, %v3034_v44  ;;  %v3054_v32 = vmul.f32 %v3049_v29, %v3049_v29 }
0x13ef   :  { %v3050_v49 = vsub.f32 %v6577_v51, %v3045_v3  ;;  %v3059_v27 = vsel %vm255_vm2, %v3054_v32, 0.0 }
0x13f0   :  { %v3037_v46 = vpop.xlane.xlu0 %3036  ;;  %3060 = vadd.xlane.f32.xlu1 %v3059_v27 }
0x13f1   :  { %v3046_v15 = vmul.f32 0.03125, %v3037_v46  ;;  %v3055_v23 = vmul.f32 %v3050_v49, %v3050_v49 }
0x13f3   :  { %v3051_v59 = vsub.f32 %v6582_v38, %v3046_v15  ;;  %v3062_v55 = vsel %vm255_vm2, %v3055_v23, 0.0 }
0x13f4   :  { %v3040_v56 = vpop.xlane.xlu1 %3039  ;;  %3063 = vadd.xlane.f32.xlu0 %v3062_v55  ;;  %v4607_v55 = vld [vmem:[%s6734_s17 + $0x60] sm:$0xff]  }
0x13f5   :  { %v3047_v60 = vmul.f32 0.03125, %v3040_v56  ;;  %v3056_v22 = vmul.f32 %v3051_v59, %v3051_v59  ;;  %v4608_v56 = vld [vmem:[%s6734_s17 + $0x58] sm:$0xff]  }
0x13f7   :  { %v3052_v9 = vsub.f32 %v6587_v11, %v3047_v60  ;;  %v3065_v52 = vsel %vm255_vm2, %v3056_v22, 0.0  ;;  %v4609_v60 = vld [vmem:[%s6734_s17 + $0x50] sm:$0xff]   ;;  %v4610_v22 = vld [vmem:[%s6734_s17 + $0x48] sm:$0xff]  }
0x13f8   :  { %3066 = vadd.xlane.f32.xlu1 %v3065_v52  ;;  %v3043_v20 = vpop.xlane.xlu0 %3042  ;;  %v3802_v52 = vld [vmem:[%s6733_s16 + $0x1] ss:$0 sm:$0xff] }
0x13f9   :  { %v3048_v63 = vmul.f32 0.03125, %v3043_v20  ;;  %v3057_v19 = vmul.f32 %v3052_v9, %v3052_v9 }
0x13fb   :  { %v3053_v25 = vsub.f32 %v6592_v8, %v3048_v63  ;;  %v3068_v36 = vsel %vm255_vm2, %v3057_v19, 0.0 }
0x13fc   :  { %3069 = vadd.xlane.f32.xlu0 %v3068_v36 }
0x13fd   :  { %v3058_v53 = vmul.f32 %v3053_v25, %v3053_v25 }
0x13ff   :  { %v3071_v0 = vsel %vm268_vm3, %v3058_v53, 0.0 }
0x1400   :  { %3072 = vadd.xlane.f32.xlu1 %v3071_v0 }
0x1479   :  { %v3061_v33 = vpop.xlane.xlu1 %3060 }
0x147a   :  { %v3074_v26 = vmul.f32 0.03125, %v3061_v33 }
0x147c   :  { %v3079_v57 = vadd.f32 1e-05, %v3074_v26 }
0x147d   :  { %v3064_v30 = vpop.xlane.xlu0 %3063 }
0x147e   :  { %4790 = vrsqrt.f32 %v3079_v57  ;;  %v3075_v48 = vmul.f32 0.03125, %v3064_v30 }
0x1480   :  { %v3080_v45 = vadd.f32 1e-05, %v3075_v48 }
0x1481   :  { %v3067_v14 = vpop.xlane.xlu1 %3066 }
0x1482   :  { %4792 = vrsqrt.f32 %v3080_v45  ;;  %v3076_v50 = vmul.f32 0.03125, %v3067_v14 }
0x1484   :  { %v3081_v24 = vadd.f32 1e-05, %v3076_v50 }
0x1485   :  { %v3070_v10 = vpop.xlane.xlu0 %3069 }
0x1486   :  { %4794 = vrsqrt.f32 %v3081_v24  ;;  %v3077_v47 = vmul.f32 0.03125, %v3070_v10 }
0x1488   :  { %v3082_v61 = vadd.f32 1e-05, %v3077_v47 }
0x1489   :  { %v3073_v13 = vpop.xlane.xlu1 %3072 }
0x148a   :  { %4796 = vrsqrt.f32 %v3082_v61  ;;  %v3078_v12 = vmul.f32 0.03125, %v3073_v13 }
0x148b   :  { %v4791_v62 = vpop.eup %4790 }
0x148c   :  { %v3089_v40 = vmul.f32 %v4791_v62, %v3049_v29  ;;  %v3083_v31 = vadd.f32 1e-05, %v3078_v12 }
0x148e   :  { %4798 = vrsqrt.f32 %v3083_v31  ;;  %v3094_v42 = vmul.f32 %v4883_v21, %v3089_v40 }
0x148f   :  { %v4793_v17 = vpop.eup %4792 }
0x1490   :  { %v3090_v34 = vmul.f32 %v4793_v17, %v3050_v49  ;;  %v3099_v4 = vadd.f32 %v4884_v35, %v3094_v42 }
0x1492   :  { %v3095_v43 = vmul.f32 %v4883_v21, %v3090_v34 }
0x1493   :  { %v4795_v41 = vpop.eup %4794 }
0x1494   :  { %v3100_v28 = vadd.f32 %v4884_v35, %v3095_v43  ;;  %v3091_v39 = vmul.f32 %v4795_v41, %v3051_v59  ;;  %v4606_v59 = vld [vmem:[%s6734_s17 + $0x68] sm:$0xff]  }
0x1495   :  { %4525 = vmatpush3.bf16.msra.mxu1 %v4606_v59 }
0x1496   :  { %v3104_v2 = vpack.c.bf16 %v3100_v28, %v3099_v4  ;;  %v3096_v58 = vmul.f32 %v4883_v21, %v3091_v39  ;;  %4526 = vmatprep.subr.bf16.mxu1 %v4907_v1 }
0x1497   :  { %v4797_v5 = vpop.eup %4796 }
0x1498   :  { %v3092_v18 = vmul.f32 %v4797_v5, %v3052_v9  ;;  %4509 = vmatmul.mubr.msk.bf16.vlgmr.msra.gmra.mxu0 %vm255_vm2, %v3104_v2  ;;  %v3101_v32 = vadd.f32 %v4884_v35, %v3096_v58  ;;  %v4611_v9 = vld [vmem:[%s6734_s17 + $0x40] sm:$0xff]  }
0x1499   :  { %4512 = vmatprep.mubr.msk.bf16.mxu0 %vm4908_vm0, %v4907_v1  ;;  %4527 = vmatpush3.bf16.msra.mxu1 %v4607_v55 }
0x149a   :  { %v3097_v29 = vmul.f32 %v4883_v21, %v3092_v18  ;;  %4528 = vmatprep.subr.bf16.mxu1 %v4907_v1 }
0x149b   :  { %v4799_v44 = vpop.eup %4798 }
0x149c   :  { %v3093_v3 = vmul.f32 %v4799_v44, %v3053_v25  ;;  %v3102_v49 = vadd.f32 %v4884_v35, %v3097_v29 }
0x149d   :  { %4529 = vmatpush3.bf16.msra.mxu1 %v4608_v56 }
0x149e   :  { %v3105_v27 = vpack.c.bf16 %v3102_v49, %v3101_v32  ;;  %v3098_v46 = vmul.f32 %v4883_v21, %v3093_v3  ;;  %4530 = vmatprep.subr.bf16.mxu1 %v4907_v1 }
0x14a0   :  { %4513 = vmatmul.mubr.msk.bf16.gmra.mxu0 %vm255_vm2, %v3105_v27  ;;  %v3103_v15 = vadd.f32 %v4884_v35, %v3098_v46 }
0x14a1   :  { %4516 = vmatprep.mubr.msk.bf16.mxu0 %vm4908_vm0, %v4907_v1  ;;  %4531 = vmatpush3.bf16.msra.mxu1 %v4609_v60 }
0x14a2   :  { %v3106_v23 = vpack.c.bf16 %v3103_v15, %v3103_v15  ;;  %4532 = vmatprep.subr.bf16.mxu1 %v4907_v1 }
0x14a5   :  { %4533 = vmatpush3.bf16.msra.mxu1 %v4610_v22 }
0x14a6   :  { %4534 = vmatprep.subr.bf16.mxu1 %v4907_v1 }
0x14a8   :  { %4517 = vmatmul.mubr.msk.bf16.gmra.mxu0 %vm255_vm2, %v3106_v23 }
0x14a9   :  { %4558 = vmatprep.mubr.msk.f32.mxu0 %vm4908_vm0, %v4907_v1  ;;  %4535 = vmatpush3.bf16.msra.mxu1 %v4611_v9 }
0x1558   :  { %v3175_v20 = vpop.f32.mrf.mxu0 }
0x1559   :  { %v3176_v63 = vadd.f32 %v3802_v52, %v3175_v20 }
0x155a   :  { %v4510_v19 = vpop.f32.mrf.mxu0 }
0x155b   :  { %v3197_v25 = vmul.f32 %v3176_v63, %v3176_v63 }
0x155c   :  { %v3178_v36 = vpop.f32.mrf.mxu0 }
0x155d   :  { %v3202_v53 = vmul.f32 %v3197_v25, %v3176_v63  ;;  %v3179_v0 = vadd.f32 %v3802_v52, %v3178_v36 }
0x155e   :  { %v4511_v54 = vpop.f32.mrf.mxu0 }
0x155f   :  { %v3207_v7 = vmul.f32 0.044715, %v3202_v53  ;;  %v3198_v16 = vmul.f32 %v3179_v0, %v3179_v0 }
0x1560   :  { %v3183_v6 = vpop.f32.mrf.mxu0 }
0x1561   :  { %v3212_v33 = vadd.f32 %v3207_v7, %v3176_v63  ;;  %v3203_v26 = vmul.f32 %v3198_v16, %v3179_v0  ;;  %v3184_v57 = vadd.f32 %v3802_v52, %v3183_v6 }
0x1562   :  { %v4514_v30 = vpop.f32.mrf.mxu0 }
0x1563   :  { %v3217_v48 = vmul.f32 0.7978846, %v3212_v33  ;;  %v3208_v45 = vmul.f32 0.044715, %v3203_v26  ;;  %v3199_v14 = vmul.f32 %v3184_v57, %v3184_v57 }
0x1564   :  { %v3186_v50 = vpop.f32.mrf.mxu0 }
0x1565   :  { %4800 = vtanh.f32 %v3217_v48  ;;  %v3213_v24 = vadd.f32 %v3208_v45, %v3179_v0  ;;  %v3204_v10 = vmul.f32 %v3199_v14, %v3184_v57  ;;  %v3187_v47 = vadd.f32 %v3802_v52, %v3186_v50 }
0x1566   :  { %v4515_v61 = vpop.f32.mrf.mxu0 }
0x1567   :  { %v3218_v13 = vmul.f32 0.7978846, %v3213_v24  ;;  %v3209_v12 = vmul.f32 0.044715, %v3204_v10  ;;  %v3200_v62 = vmul.f32 %v3187_v47, %v3187_v47 }
0x1568   :  { %v3191_v40 = vpop.f32.mrf.mxu0 }
0x1569   :  { %4802 = vtanh.f32 %v3218_v13  ;;  %v3214_v31 = vadd.f32 %v3209_v12, %v3184_v57  ;;  %v3205_v17 = vmul.f32 %v3200_v62, %v3187_v47  ;;  %v3192_v21 = vadd.f32 %v3802_v52, %v3191_v40 }
0x156a   :  { %v4518_v42 = vpop.f32.mrf.mxu0 }
0x156b   :  { %v3219_v34 = vmul.f32 0.7978846, %v3214_v31  ;;  %v3210_v43 = vmul.f32 0.044715, %v3205_v17  ;;  %v3201_v41 = vmul.f32 %v3192_v21, %v3192_v21 }
0x156c   :  { %v3194_v35 = vpop.f32.mrf.mxu0 }
0x156d   :  { %4804 = vtanh.f32 %v3219_v34  ;;  %v3215_v4 = vadd.f32 %v3210_v43, %v3187_v47  ;;  %v3206_v28 = vmul.f32 %v3201_v41, %v3192_v21 }
0x156e   :  { %v4519_v39 = vpop.f32.mrf.mxu0 }
0x156f   :  { %v3220_v2 = vmul.f32 0.7978846, %v3215_v4  ;;  %v3211_v5 = vmul.f32 0.044715, %v3206_v28 }
0x1571   :  { %4806 = vtanh.f32 %v3220_v2  ;;  %v3216_v18 = vadd.f32 %v3211_v5, %v3192_v21 }
0x1572   :  { %v4801_v58 = vpop.eup %4800 }
0x1573   :  { %v3227_v29 = vadd.f32 1.0, %v4801_v58  ;;  %v3221_v44 = vmul.f32 0.7978846, %v3216_v18 }
0x1575   :  { %4808 = vtanh.f32 %v3221_v44  ;;  %v3232_v32 = vmul.f32 0.5, %v3227_v29 }
0x1576   :  { %v4803_v3 = vpop.eup %4802 }
0x1577   :  { %v3228_v49 = vadd.f32 1.0, %v4803_v3  ;;  %v3237_v15 = vmul.f32 %v3232_v32, %v3176_v63 }
0x1579   :  { %v3233_v27 = vmul.f32 0.5, %v3228_v49 }
0x157a   :  { %v4805_v46 = vpop.eup %4804 }
0x157b   :  { %v3238_v23 = vmul.f32 %v3233_v27, %v3179_v0  ;;  %v3229_v59 = vadd.f32 1.0, %v4805_v46 }
0x157d   :  { %v3242_v55 = vpack.c.bf16 %v3238_v23, %v3237_v15  ;;  %v3234_v60 = vmul.f32 0.5, %v3229_v59 }
0x157e   :  { %v4807_v56 = vpop.eup %4806 }
0x157f   :  { %v3230_v22 = vadd.f32 1.0, %v4807_v56  ;;  %4537 = vmatmul.mubr.bf16.vlgmr.msra.gmra.mxu1 %v3242_v55  ;;  %v3239_v20 = vmul.f32 %v3234_v60, %v3184_v57  ;;  %v3825_v57 = vld [vmem:[%s6735_s18 + $0x1] ss:$0 sm:$0xff] }
0x1580   :  { %4540 = vmatprep.mubr.msk.bf16.mxu1 %vm4908_vm0, %v4907_v1 }
0x1581   :  { %v3235_v9 = vmul.f32 0.5, %v3230_v22 }
0x1582   :  { %v4809_v52 = vpop.eup %4808 }
0x1583   :  { %v3240_v19 = vmul.f32 %v3235_v9, %v3187_v47  ;;  %v3231_v25 = vadd.f32 1.0, %v4809_v52 }
0x1585   :  { %v3243_v36 = vpack.c.bf16 %v3240_v19, %v3239_v20  ;;  %v3236_v53 = vmul.f32 0.5, %v3231_v25 }
0x1587   :  { %4541 = vmatmul.mubr.bf16.gmra.mxu1 %v3243_v36  ;;  %v3241_v63 = vmul.f32 %v3236_v53, %v3192_v21 }
0x1588   :  { %4544 = vmatprep.mubr.msk.bf16.mxu1 %vm4908_vm0, %v4907_v1 }
0x1589   :  { %v3244_v0 = vpack.c.bf16 %v3241_v63, %v3241_v63 }
0x158f   :  { %4545 = vmatmul.mubr.bf16.gmra.mxu1 %v3244_v0 }
0x163f   :  { %v3352_v54 = vpop.f32.mrf.mxu1 }
0x1640   :  { %v3353_v31 = vadd.f32 %v3825_v57, %v3352_v54 }
0x1641   :  { %v4538_v7 = vpop.f32.mrf.mxu1 }
0x1643   :  { %v3355_v16 = vpop.f32.mrf.mxu1 }
0x1644   :  { %v3356_v48 = vadd.f32 %v3825_v57, %v3355_v16 }
0x1645   :  { %v4539_v6 = vpop.f32.mrf.mxu1 }
0x1646   :  { %v3375_v10 = vadd.f32 %v3356_v48, %v6577_v51  ;;  %v3374_v51 = vadd.f32 %v3353_v31, %v6572_v37  ;;  %v3834_v48 = vld [vmem:[%s6736_s19] ss:$0 sm:$0xff] }
0x1647   :  { %v3360_v33 = vpop.f32.mrf.mxu1 }
0x1648   :  { %v3361_v47 = vadd.f32 %v3825_v57, %v3360_v33  ;;  %v3384_v21 = vsel %vm255_vm2, %v3375_v10, 0.0  ;;  %v3381_v43 = vsel %vm255_vm2, %v3374_v51, 0.0 }
0x1649   :  { %v4542_v26 = vpop.f32.mrf.mxu1 }
0x164a   :  { %v3376_v17 = vadd.f32 %v3361_v47, %v6582_v38 }
0x164b   :  { %v3363_v30 = vpop.f32.mrf.mxu1 }
0x164c   :  { %v3364_v45 = vadd.f32 %v3825_v57, %v3363_v30  ;;  %v3387_v34 = vsel %vm255_vm2, %v3376_v17, 0.0 }
0x164d   :  { %v4543_v14 = vpop.f32.mrf.mxu1 }
0x164e   :  { %v3377_v50 = vadd.f32 %v3364_v45, %v6587_v11 }
0x164f   :  { %v3368_v24 = vpop.f32.mrf.mxu1 }
0x1650   :  { %v3369_v61 = vadd.f32 %v3825_v57, %v3368_v24  ;;  %v3390_v13 = vsel %vm255_vm2, %v3377_v50, 0.0 }
0x1651   :  { %3391 = vadd.xlane.f32.xlu1 %v3390_v13  ;;  %v4546_v12 = vpop.f32.mrf.mxu1 }
0x1652   :  { %v3378_v62 = vadd.f32 %v3369_v61, %v6592_v8  ;;  %v3835_v61 = vld [vmem:[%s6737_s20] ss:$0 sm:$0xff] }
0x1653   :  { %v3371_v40 = vpop.f32.mrf.mxu1 }
0x1654   :  { %v3393_v42 = vsel %vm268_vm3, %v3378_v62, 0.0 }
0x1655   :  { %3385 = vadd.xlane.f32.xlu1 %v3384_v21  ;;  %3394 = vadd.xlane.f32.xlu0 %v3393_v42  ;;  %v4547_v11 = vpop.f32.mrf.mxu1 }
0x1659   :  { %3388 = vadd.xlane.f32.xlu0 %v3387_v34 }
0x165d   :  { %3382 = vadd.xlane.f32.xlu0 %v3381_v43  ;;  %v3468_v43 = vld [vmem:[%s6763_s11] sm:$0x3] }
0x16da   :  { %v3392_v8 = vpop.xlane.xlu1 %3391 }
0x16db   :  { %v3399_v41 = vmul.f32 0.03125, %v3392_v8  ;;  %v4612_v8 = vld [vmem:[%s6738_s21 + $0x8] sm:$0xff]  }
0x16dd   :  { %v3404_v35 = vsub.f32 %v3377_v50, %v3399_v41  ;;  %v4613_v41 = vld [vmem:[%s6738_s21] sm:$0xff]   ;;  %s4885_s21 = scalar_lea.vmem %s3621_s4, 32 }
0x16de   :  { %v3386_v4 = vpop.xlane.xlu1 %3385  ;;  %v3395_v38 = vpop.xlane.xlu0 %3394  ;;  %p4886_p0 = scmp.ne.s32.totalorder %s3621_s4, %s4885_s21  ;;  %p4891_p2 = scmp.lt.s32.totalorder %s4885_s21, %s4885_s21 }
0x16df   :  { %v3397_v28 = vmul.f32 0.03125, %v3386_v4  ;;  %v3400_v39 = vmul.f32 0.03125, %v3395_v38  ;;  %v3409_v2 = vmul.f32 %v3404_v35, %v3404_v35 }
0x16e0   :  { %p4892_p3 = por %p4891_p2, %p4890_p1 }
0x16e1   :  { %v3402_v5 = vsub.f32 %v3375_v10, %v3397_v28  ;;  %v3405_v18 = vsub.f32 %v3378_v62, %v3400_v39  ;;  %v3420_v58 = vsel %vm255_vm2, %v3409_v2, 0.0  ;;  %v3838_v28 = vld [vmem:[%s6739_s22] ss:$0 sm:$0xff] }
0x16e2   :  { %3421 = vadd.xlane.f32.xlu0 %v3420_v58  ;;  %v3389_v37 = vpop.xlane.xlu0 %3388  ;;  %p4893_p4 = pnand %p4892_p3, %p4886_p0 }
0x16e3   :  { %v3398_v29 = vmul.f32 0.03125, %v3389_v37  ;;  %v3407_v44 = vmul.f32 %v3402_v5, %v3402_v5  ;;  %v3410_v3 = vmul.f32 %v3405_v18, %v3405_v18 }
0x16e5   :  { %v3403_v32 = vsub.f32 %v3376_v17, %v3398_v29  ;;  %v3414_v49 = vsel %vm255_vm2, %v3407_v44, 0.0  ;;  %v3423_v27 = vsel %vm268_vm3, %v3410_v3, 0.0 }
0x16e6   :  { %3415 = vadd.xlane.f32.xlu0 %v3414_v49  ;;  %3424 = vadd.xlane.f32.xlu1 %v3423_v27  ;;  %v3383_v46 = vpop.xlane.xlu0 %3382 }
0x16e7   :  { %v3396_v15 = vmul.f32 0.03125, %v3383_v46  ;;  %v3408_v23 = vmul.f32 %v3403_v32, %v3403_v32 }
0x16e9   :  { %v3401_v59 = vsub.f32 %v3374_v51, %v3396_v15  ;;  %v3417_v55 = vsel %vm255_vm2, %v3408_v23, 0.0 }
0x16ea   :  { %3418 = vadd.xlane.f32.xlu1 %v3417_v55 }
0x16eb   :  { %v3406_v56 = vmul.f32 %v3401_v59, %v3401_v59 }
0x16ed   :  { %v3411_v60 = vsel %vm255_vm2, %v3406_v56, 0.0 }
0x16ee   :  { %3412 = vadd.xlane.f32.xlu1 %v3411_v60 }
0x176b   :  { %v3422_v22 = vpop.xlane.xlu0 %3421 }
0x176c   :  { %v3429_v9 = vmul.f32 0.03125, %v3422_v22 }
0x176e   :  { %v3434_v52 = vadd.f32 1e-06, %v3429_v9 }
0x176f   :  { %v3425_v20 = vpop.xlane.xlu1 %3424  ;;  %v3416_v19 = vpop.xlane.xlu0 %3415 }
0x1770   :  { %4810 = vrsqrt.f32 %v3434_v52  ;;  %v3430_v25 = vmul.f32 0.03125, %v3425_v20  ;;  %v3427_v36 = vmul.f32 0.03125, %v3416_v19 }
0x1772   :  { %v3435_v53 = vadd.f32 1e-06, %v3430_v25  ;;  %v3432_v63 = vadd.f32 1e-06, %v3427_v36 }
0x1773   :  { %v3419_v0 = vpop.xlane.xlu1 %3418 }
0x1774   :  { %4812 = vrsqrt.f32 %v3435_v53  ;;  %v3428_v54 = vmul.f32 0.03125, %v3419_v0 }
0x1775   :  { %4814 = vrsqrt.f32 %v3432_v63 }
0x1776   :  { %v3433_v7 = vadd.f32 1e-06, %v3428_v54 }
0x1777   :  { %v3413_v16 = vpop.xlane.xlu1 %3412 }
0x1778   :  { %4816 = vrsqrt.f32 %v3433_v7  ;;  %v3426_v6 = vmul.f32 0.03125, %v3413_v16 }
0x177a   :  { %v3431_v33 = vadd.f32 1e-06, %v3426_v6 }
0x177c   :  { %4818 = vrsqrt.f32 %v3431_v33 }
0x177d   :  { %v4811_v26 = vpop.eup %4810 }
0x177e   :  { %v3444_v57 = vmul.f32 %v4811_v26, %v3404_v35 }
0x1780   :  { %v3455_v24 = vmul.f32 %v3834_v48, %v3444_v57 }
0x1781   :  { %v4813_v30 = vpop.eup %4812 }
0x1782   :  { %v4815_v45 = vpop.eup %4814  ;;  %v3445_v14 = vmul.f32 %v4813_v30, %v3405_v18  ;;  %v3466_v62 = vadd.f32 %v3835_v61, %v3455_v24 }
0x1783   :  { %v3442_v10 = vmul.f32 %v4815_v45, %v3402_v5 }
0x1784   :  { %v3456_v50 = vmul.f32 %v3834_v48, %v3445_v14 }
0x1785   :  { %v4817_v47 = vpop.eup %4816  ;;  %v3453_v31 = vmul.f32 %v3834_v48, %v3442_v10 }
0x1786   :  { %v3467_v13 = vadd.f32 %v3835_v61, %v3456_v50  ;;  %v3443_v12 = vmul.f32 %v4817_v47, %v3403_v32 }
0x1787   :  { %v3464_v11 = vadd.f32 %v3835_v61, %v3453_v31 }
0x1788   :  { %4549 = vmatpush3.msk.msra.mxu0 %vm625_vm4, %v3467_v13  ;;  %v3454_v40 = vmul.f32 %v3834_v48, %v3443_v12 }
0x1789   :  { %v4819_v17 = vpop.eup %4818  ;;  %4550 = vmatprep.subr.mxu0 %v4907_v1 }
0x178a   :  { %4551 = vmatpush3.msra.mxu0 %v3466_v62  ;;  %v3465_v21 = vadd.f32 %v3835_v61, %v3454_v40  ;;  %v3441_v42 = vmul.f32 %v4819_v17, %v3401_v59 }
0x178b   :  { %4552 = vmatprep.subr.mxu0 %v4907_v1 }
0x178c   :  { %4553 = vmatpush3.msra.mxu0 %v3465_v21  ;;  %v3452_v51 = vmul.f32 %v3834_v48, %v3441_v42 }
0x178d   :  { %4554 = vmatprep.subr.mxu0 %v4907_v1 }
0x178e   :  { %4555 = vmatpush3.msra.mxu0 %v3464_v11  ;;  %v3463_v34 = vadd.f32 %v3835_v61, %v3452_v51 }
0x178f   :  { %4556 = vmatprep.subr.mxu0 %v4907_v1 }
0x1790   :  { %4557 = vmatpush3.msra.mxu0 %v3463_v34 }
0x1791   :  { %4559 = vmatmul.mubr.msk.f32.vlgmr.msra.gmra.mxu0 %vm573_vm6, %v3468_v43  ;;  %4561 = vmatprep.subr.bf16.mxu0 %v4907_v1 }
0x1792   :  { %4562 = vmatpush3.bf16.msra.mxu0 %v4612_v8  ;;  %4565 = vmatprep.mubr.msk.bf16.mxu0 %vm4908_vm0, %v4907_v1 }
0x1793   :  { %4563 = vmatprep.subr.bf16.mxu0 %v4907_v1 }
0x1796   :  { %4564 = vmatpush3.bf16.msra.mxu0 %v4613_v41 }
0x1851   :  { %v3541_v35 = vpop.f32.mrf.mxu0 }
0x1852   :  { %v3545_v4 = vpack.c.bf16 %v3541_v35, %v3541_v35 }
0x1853   :  { %v4560_v38 = vpop.f32.mrf.mxu0 }
0x1854   :  { %4566 = vmatmul.mubr.msk.bf16.vlgmr.msra.gmra.mxu0 %vm255_vm2, %v3545_v4 }
0x1914   :  { %v3606_v39 = vpop.f32.mrf.mxu0 }
0x1915   :  { %v3607_v2 = vadd.f32 %v3838_v28, %v3606_v39 }
0x1916   :  { %v4567_v1 = vpop.f32.mrf.mxu0 }
0x1917   :  { %3613 = vst.msk [vmem:[#allocation2] sm:$0x3] %vm3612_vm8, %v3607_v2 }
0x1918   :  { %v3609_v5 = vpop.f32.mrf.mxu0 }
0x1919   :  { %4896 = shalt.err (!%p4893_p4)
}
0x191a   :  { %3623 = dma.vmem_to_hbm [thread:$0]  %s3621_s4, 32, %s6740_s23, [#allocation3]   ;;  %v4568_v18 = vpop.f32.mrf.mxu0 }
0x191b   :  { %4905 = dma.done.wait [#allocation3], 32  }
0x191c   :  { %4906 = vsyncadd [#allocation3], 4294967264 }
0x191d   :  { %3627 = vsyncpa [#allocation3], 1 }

</bundles_post_ra>
